<compile_context>
chip_gen: v7x
topology: tpu7x:2x2x1
jax: 0.10.0
libtpu: 0.0.40
codegen_flags: <defaults>
</compile_context>

<pallas_src>
import jax
import jax.numpy as jnp
from jax import lax
from jax.experimental import pallas as pl
from jax.experimental.pallas import tpu as pltpu


def _fold_bn(gamma, beta, mean, var, eps):
    """Inference-mode BatchNorm folded to per-channel scale/shift (f32)."""
    inv = lax.rsqrt(var.astype(jnp.float32) + eps)
    scale = gamma.astype(jnp.float32) * inv
    shift = beta.astype(jnp.float32) - mean.astype(jnp.float32) * scale
    return scale, shift


def _conv3x3(xpad_scr, w_ref, B, H, W, C):
    """3x3 'same' conv of the padded bf16 slab.

    dx-only im2col (3x duplication instead of 9x): the three sublane-shifted
    dx slices are materialized once into col3; the dy taps are free major-dim
    slices of col3, accumulated with 3 MXU matmuls (f32 accumulation).

    xpad_scr: (B, H+2, W+2, C) bf16 scratch (zero border, valid interior).
    w_ref   : (3, 3*C, C) bf16 weights; w_ref[dy] rows ordered (dx, cin).
    Returns (B*H*W, C) float32.
    """
    col3 = jnp.concatenate(
        [xpad_scr[:, :, dx:dx + W, :] for dx in range(3)], axis=-1)   # (B,H+2,W,3C)
    acc = jnp.dot(col3[:, 0:H].reshape(B * H * W, 3 * C), w_ref[0],
                  preferred_element_type=jnp.float32)
    for dy in range(1, 3):
        acc = acc + jnp.dot(col3[:, dy:dy + H].reshape(B * H * W, 3 * C),
                            w_ref[dy], preferred_element_type=jnp.float32)
    return acc


def _residual_block_bn2_kernel(x_ref, scale_ref, shift_ref, w1_ref, b1_ref,
                               w2_ref, b2_ref, out_ref, xpad_scr):
    # x_ref    : (B, H, W, C) f32 NHWC input block (also the identity)
    # scale/shift_ref : (1, C) f32 folded BatchNorm
    # w1/w2_ref: (3, 3C, C) bf16 conv weights; b1/b2_ref: (1, C) f32
    # out_ref  : (B, H, W, C) f32
    # xpad_scr : (B, H+2, W+2, C) bf16 padded-activation scratch (both convs)
    B, H, W, C = out_ref.shape
    bf16 = xpad_scr.dtype

    # Zero only the 1-pixel border of the padded scratch.  Done every grid
    # step so there is no cross-step scratch dependency and the batch axis can
    # stay 'parallel'; on single-TC chips the batch is merged so it runs once.
    zrow = jnp.zeros((B, 1, W + 2, C), dtype=bf16)
    zcol = jnp.zeros((B, H, 1, C), dtype=bf16)
    xpad_scr[:, 0:1, :, :] = zrow
    xpad_scr[:, H + 1:H + 2, :, :] = zrow
    xpad_scr[:, 1:1 + H, 0:1, :] = zcol
    xpad_scr[:, 1:1 + H, W + 1:W + 2, :] = zcol

    # ---- BatchNorm (inference mode, folded scale/shift) in f32; bf16 store ----
    x = x_ref[...]                                                 # (B,H,W,C) f32
    bn = (x * scale_ref[...].reshape(1, 1, 1, C)
          + shift_ref[...].reshape(1, 1, 1, C))
    xpad_scr[:, 1:1 + H, 1:1 + W, :] = bn.astype(bf16)

    # ---- conv1: dx-concat im2col + 3 accumulating matmuls; bias+ReLU in f32 ----
    acc1 = _conv3x3(xpad_scr, w1_ref, B, H, W, C)                  # (B*H*W, C) f32
    out1 = jnp.maximum(acc1 + b1_ref[...], 0.0)

    # ---- conv2: reuse the padded scratch (border is still zero) ----
    xpad_scr[:, 1:1 + H, 1:1 + W, :] = out1.astype(bf16).reshape(B, H, W, C)
    acc2 = _conv3x3(xpad_scr, w2_ref, B, H, W, C) + b2_ref[...]

    # ---- residual add in f32 ----
    out_ref[...] = (x + acc2.reshape(B, H, W, C)).astype(out_ref.dtype)


def _default_images_per_block(n):
    """Batch merging policy: merge the whole batch into one grid step on
    single-TensorCore chips (v5e/v6e) to kill per-step overhead and double the
    matmul M; keep one image per 'parallel' step otherwise (v7x: 2 TCs/chip
    shard the batch across cores)."""
    try:
        kind = jax.devices()[0].device_kind.lower()
    except Exception:
        return 1
    single_tc = any(s in kind for s in ("v5e", "v5 lite", "v5lite",
                                        "v6e", "v6 lite", "v6lite"))
    return n if single_tc else 1


def residual_block_bn2_nhwc(x, bn_gamma, bn_beta, bn_mean, bn_var,
                            w1, b1, w2, b2, eps=1e-5, images_per_block=None):
    """NHWC entry point. x: (N,H,W,C) f32; w1/w2: (3,3,C,C) HWIO; b*/bn_*: (C,)."""
    N, H, W, C = x.shape
    B = images_per_block if images_per_block is not None else _default_images_per_block(N)
    assert N % B == 0, (N, B)

    scale, shift = _fold_bn(bn_gamma, bn_beta, bn_mean, bn_var, eps)
    scale_2d = scale.reshape(1, C)
    shift_2d = shift.reshape(1, C)
    # Weights as (3, 3C, C): w_r[dy] rows ordered (dx, cin); bf16 for the MXU.
    w1_r = w1.reshape(3, 3 * C, C).astype(jnp.bfloat16)
    w2_r = w2.reshape(3, 3 * C, C).astype(jnp.bfloat16)
    b1_2d = b1.reshape(1, C).astype(jnp.float32)
    b2_2d = b2.reshape(1, C).astype(jnp.float32)

    # TODO(synk): for large images (e.g. >=128x128 @ nf>=64) tile the grid over
    # H with a 1-row halo, size the scratch/col3 to the row tile and set
    # vmem_limit_bytes so live VMEM stays inside v7x's 64 MiB; whole-image
    # blocks are fine at these small shapes.
    out = pl.pallas_call(
        _residual_block_bn2_kernel,
        out_shape=jax.ShapeDtypeStruct((N, H, W, C), jnp.float32),
        grid_spec=pltpu.PrefetchScalarGridSpec(
            num_scalar_prefetch=0,
            grid=(N // B,),
            in_specs=[
                pl.BlockSpec((B, H, W, C), lambda i: (i, 0, 0, 0)),   # x (identity too)
                pl.BlockSpec((1, C), lambda i: (0, 0)),               # bn scale
                pl.BlockSpec((1, C), lambda i: (0, 0)),               # bn shift
                pl.BlockSpec((3, 3 * C, C), lambda i: (0, 0, 0)),     # w1 (bf16)
                pl.BlockSpec((1, C), lambda i: (0, 0)),               # b1
                pl.BlockSpec((3, 3 * C, C), lambda i: (0, 0, 0)),     # w2 (bf16)
                pl.BlockSpec((1, C), lambda i: (0, 0)),               # b2
            ],
            out_specs=pl.BlockSpec((B, H, W, C), lambda i: (i, 0, 0, 0)),
            scratch_shapes=[pltpu.VMEM((B, H + 2, W + 2, C), jnp.bfloat16)],
        ),
        compiler_params=pltpu.CompilerParams(
            dimension_semantics=("parallel",)),
    )(x, scale_2d, shift_2d, w1_r, b1_2d, w2_r, b2_2d)
    return out


def residual_block_bn2(x_nchw, bn_gamma, bn_beta, bn_mean, bn_var,
                       w1, b1, w2, b2, eps=1e-5, images_per_block=None):
    """NCHW wrapper matching the PyTorch module interface.

    TODO(synk): the NCHW<->NHWC transposes are pure HBM-copy overhead around a
    latency-bound kernel; keep the surrounding model NHWC and call
    residual_block_bn2_nhwc directly to drop them.
    """
    x = jnp.transpose(x_nchw, (0, 2, 3, 1))                        # NHWC, no pad copy
    out = residual_block_bn2_nhwc(x, bn_gamma, bn_beta, bn_mean, bn_var,
                                  w1, b1, w2, b2, eps=eps,
                                  images_per_block=images_per_block)
    return jnp.transpose(out, (0, 3, 1, 2))                        # back to NCHW


def _reference(x_nchw, bn_gamma, bn_beta, bn_mean, bn_var, w1, b1, w2, b2, eps=1e-5):
    """Pure-JAX reference mirroring the kernel's precision (bf16 matmuls, f32 acc)."""
    x = jnp.transpose(x_nchw, (0, 2, 3, 1)).astype(jnp.float32)
    scale, shift = _fold_bn(bn_gamma, bn_beta, bn_mean, bn_var, eps)
    h = x * scale + shift
    dn = lax.conv_dimension_numbers(x.shape, w1.shape, ("NHWC", "HWIO", "NHWC"))
    o = lax.conv_general_dilated(h.astype(jnp.bfloat16), w1.astype(jnp.bfloat16),
                                 (1, 1), "SAME", dimension_numbers=dn,
                                 preferred_element_type=jnp.float32) + b1
    o = jnp.maximum(o, 0.0)
    o = lax.conv_general_dilated(o.astype(jnp.bfloat16), w2.astype(jnp.bfloat16),
                                 (1, 1), "SAME", dimension_numbers=dn,
                                 preferred_element_type=jnp.float32) + b2
    return jnp.transpose(x + o, (0, 3, 1, 2))


if __name__ == "__main__":
    key = jax.random.PRNGKey(0)
    N, nf, H, W = 2, 64, 16, 16
    keys = jax.random.split(key, 9)

    x = jax.random.normal(keys[0], (N, nf, H, W), dtype=jnp.float32)
    fan_in = 3 * 3 * nf
    wscale = (2.0 / fan_in) ** 0.5
    w1 = wscale * jax.random.normal(keys[1], (3, 3, nf, nf), dtype=jnp.float32)
    w2 = wscale * jax.random.normal(keys[2], (3, 3, nf, nf), dtype=jnp.float32)
    b1 = 0.01 * jax.random.normal(keys[3], (nf,), dtype=jnp.float32)
    b2 = 0.01 * jax.random.normal(keys[4], (nf,), dtype=jnp.float32)
    # TODO(synk): BatchNorm is implemented in inference mode (running stats);
    # training-mode batch-statistic computation is not done in-kernel.
    bn_gamma = 1.0 + 0.1 * jax.random.normal(keys[5], (nf,), dtype=jnp.float32)
    bn_beta = 0.1 * jax.random.normal(keys[6], (nf,), dtype=jnp.float32)
    bn_mean = 0.1 * jax.random.normal(keys[7], (nf,), dtype=jnp.float32)
    bn_var = 1.0 + 0.1 * jax.random.uniform(keys[8], (nf,), dtype=jnp.float32)

    out = residual_block_bn2(x, bn_gamma, bn_beta, bn_mean, bn_var, w1, b1, w2, b2)
    out = jax.block_until_ready(out)

    ref = _reference(x, bn_gamma, bn_beta, bn_mean, bn_var, w1, b1, w2, b2)
    assert out.shape == (N, nf, H, W)
    err = float(jnp.max(jnp.abs(out - ref)))
    assert jnp.allclose(out, ref, atol=5e-3, rtol=5e-3), err
    print("KERNEL_OK")
</pallas_src>

<mosaic_0001>
module attributes {stable_mosaic.version = 11 : i64} {
  func.func @_residual_block_bn2_kernel(%arg0: i32, %arg1: memref<1x16x16x64xf32, #tpu.memory_space<vmem>>, %arg2: memref<1x64xf32, #tpu.memory_space<vmem>>, %arg3: memref<1x64xf32, #tpu.memory_space<vmem>>, %arg4: memref<3x192x64xbf16, #tpu.memory_space<vmem>>, %arg5: memref<1x64xf32, #tpu.memory_space<vmem>>, %arg6: memref<3x192x64xbf16, #tpu.memory_space<vmem>>, %arg7: memref<1x64xf32, #tpu.memory_space<vmem>>, %arg8: memref<1x16x16x64xf32, #tpu.memory_space<vmem>>, %arg9: memref<1x18x18x64xbf16, #tpu.memory_space<vmem>>) attributes {dimension_semantics = [#tpu.dimension_semantics<parallel>], iteration_bounds = array<i64: 2>, scalar_prefetch = 0 : i64, scratch_operands = 1 : i64, tpu.core_type = #tpu.core_type<tc>, window_params = [{transform_indices = @transform_0, window_bounds = array<i64: 1, 16, 16, 64>}, {pipeline_mode = #tpu.pipeline_mode<synchronous>, transform_indices = @transform_1, window_bounds = array<i64: 1, 64>}, {pipeline_mode = #tpu.pipeline_mode<synchronous>, transform_indices = @transform_2, window_bounds = array<i64: 1, 64>}, {pipeline_mode = #tpu.pipeline_mode<synchronous>, transform_indices = @transform_3, window_bounds = array<i64: 3, 192, 64>}, {pipeline_mode = #tpu.pipeline_mode<synchronous>, transform_indices = @transform_4, window_bounds = array<i64: 1, 64>}, {pipeline_mode = #tpu.pipeline_mode<synchronous>, transform_indices = @transform_5, window_bounds = array<i64: 3, 192, 64>}, {pipeline_mode = #tpu.pipeline_mode<synchronous>, transform_indices = @transform_6, window_bounds = array<i64: 1, 64>}, {transform_indices = @transform_7, window_bounds = array<i64: 1, 16, 16, 64>}]} {
    %cst = arith.constant 0.000000e+00 : bf16
    %0 = vector.broadcast %cst : bf16 to vector<1x1x18x64xbf16>
    %cst_0 = arith.constant 0.000000e+00 : bf16
    %1 = vector.broadcast %cst_0 : bf16 to vector<1x16x1x64xbf16>
    %c0 = arith.constant 0 : index
    %c0_1 = arith.constant 0 : index
    %c0_2 = arith.constant 0 : index
    %c0_3 = arith.constant 0 : index
    %2 = vector.load %arg9[%c0, %c0_1, %c0_2, %c0_3] : memref<1x18x18x64xbf16, #tpu.memory_space<vmem>>, vector<1x1x18x64xbf16>
    tpu.vector_store %arg9[%c0, %c0_1, %c0_2, %c0_3], %0 {strides = array<i32>} : memref<1x18x18x64xbf16, #tpu.memory_space<vmem>>, vector<1x1x18x64xbf16>,
    %c0_4 = arith.constant 0 : index
    %c17 = arith.constant 17 : index
    %c0_5 = arith.constant 0 : index
    %c0_6 = arith.constant 0 : index
    %3 = vector.load %arg9[%c0_4, %c17, %c0_5, %c0_6] : memref<1x18x18x64xbf16, #tpu.memory_space<vmem>>, vector<1x1x18x64xbf16>
    tpu.vector_store %arg9[%c0_4, %c17, %c0_5, %c0_6], %0 {strides = array<i32>} : memref<1x18x18x64xbf16, #tpu.memory_space<vmem>>, vector<1x1x18x64xbf16>,
    %c0_7 = arith.constant 0 : index
    %c1 = arith.constant 1 : index
    %c0_8 = arith.constant 0 : index
    %c0_9 = arith.constant 0 : index
    %4 = vector.load %arg9[%c0_7, %c1, %c0_8, %c0_9] : memref<1x18x18x64xbf16, #tpu.memory_space<vmem>>, vector<1x16x1x64xbf16>
    tpu.vector_store %arg9[%c0_7, %c1, %c0_8, %c0_9], %1 {strides = array<i32>} : memref<1x18x18x64xbf16, #tpu.memory_space<vmem>>, vector<1x16x1x64xbf16>,
    %c0_10 = arith.constant 0 : index
    %c1_11 = arith.constant 1 : index
    %c17_12 = arith.constant 17 : index
    %c0_13 = arith.constant 0 : index
    %5 = vector.load %arg9[%c0_10, %c1_11, %c17_12, %c0_13] : memref<1x18x18x64xbf16, #tpu.memory_space<vmem>>, vector<1x16x1x64xbf16>
    tpu.vector_store %arg9[%c0_10, %c1_11, %c17_12, %c0_13], %1 {strides = array<i32>} : memref<1x18x18x64xbf16, #tpu.memory_space<vmem>>, vector<1x16x1x64xbf16>,
    %c0_14 = arith.constant 0 : index
    %c0_15 = arith.constant 0 : index
    %c0_16 = arith.constant 0 : index
    %c0_17 = arith.constant 0 : index
    %6 = vector.load %arg1[%c0_14, %c0_15, %c0_16, %c0_17] : memref<1x16x16x64xf32, #tpu.memory_space<vmem>>, vector<1x16x16x64xf32>
    %c0_18 = arith.constant 0 : index
    %c0_19 = arith.constant 0 : index
    %7 = vector.load %arg2[%c0_18, %c0_19] : memref<1x64xf32, #tpu.memory_space<vmem>>, vector<1x64xf32>
    %8 = vector.shape_cast %7 : vector<1x64xf32> to vector<1x1x1x64xf32>
    %9 = vector.broadcast %8 : vector<1x1x1x64xf32> to vector<1x16x16x64xf32>
    %10 = arith.mulf %6, %9 : vector<1x16x16x64xf32>
    %c0_20 = arith.constant 0 : index
    %c0_21 = arith.constant 0 : index
    %11 = vector.load %arg3[%c0_20, %c0_21] : memref<1x64xf32, #tpu.memory_space<vmem>>, vector<1x64xf32>
    %12 = vector.shape_cast %11 : vector<1x64xf32> to vector<1x1x1x64xf32>
    %13 = vector.broadcast %12 : vector<1x1x1x64xf32> to vector<1x16x16x64xf32>
    %14 = arith.addf %10, %13 : vector<1x16x16x64xf32>
    %15 = arith.truncf %14 : vector<1x16x16x64xf32> to vector<1x16x16x64xbf16>
    %c0_22 = arith.constant 0 : index
    %c1_23 = arith.constant 1 : index
    %c1_24 = arith.constant 1 : index
    %c0_25 = arith.constant 0 : index
    %16 = vector.load %arg9[%c0_22, %c1_23, %c1_24, %c0_25] : memref<1x18x18x64xbf16, #tpu.memory_space<vmem>>, vector<1x16x16x64xbf16>
    tpu.vector_store %arg9[%c0_22, %c1_23, %c1_24, %c0_25], %15 {strides = array<i32>} : memref<1x18x18x64xbf16, #tpu.memory_space<vmem>>, vector<1x16x16x64xbf16>,
    %c0_26 = arith.constant 0 : index
    %c0_27 = arith.constant 0 : index
    %c0_28 = arith.constant 0 : index
    %c0_29 = arith.constant 0 : index
    %17 = vector.load %arg9[%c0_26, %c0_27, %c0_28, %c0_29] : memref<1x18x18x64xbf16, #tpu.memory_space<vmem>>, vector<1x18x16x64xbf16>
    %c0_30 = arith.constant 0 : index
    %c0_31 = arith.constant 0 : index
    %c1_32 = arith.constant 1 : index
    %c0_33 = arith.constant 0 : index
    %18 = vector.load %arg9[%c0_30, %c0_31, %c1_32, %c0_33] : memref<1x18x18x64xbf16, #tpu.memory_space<vmem>>, vector<1x18x16x64xbf16>
    %c0_34 = arith.constant 0 : index
    %c0_35 = arith.constant 0 : index
    %c2 = arith.constant 2 : index
    %c0_36 = arith.constant 0 : index
    %19 = vector.load %arg9[%c0_34, %c0_35, %c2, %c0_36] : memref<1x18x18x64xbf16, #tpu.memory_space<vmem>>, vector<1x18x16x64xbf16>
    %20 = tpu.concatenate %17, %18, %19 in 3 : vector<1x18x16x64xbf16>, vector<1x18x16x64xbf16>, vector<1x18x16x64xbf16> -> vector<1x18x16x192xbf16>
    %21 = vector.extract_strided_slice %20 {offsets = [0, 0, 0, 0], sizes = [1, 16, 16, 192], strides = [1, 1, 1, 1]} : vector<1x18x16x192xbf16> to vector<1x16x16x192xbf16>
    %22 = vector.shape_cast %21 : vector<1x16x16x192xbf16> to vector<256x192xbf16>
    %c0_37 = arith.constant 0 : index
    %c0_38 = arith.constant 0 : index
    %c0_39 = arith.constant 0 : index
    %23 = vector.load %arg4[%c0_37, %c0_38, %c0_39] : memref<3x192x64xbf16, #tpu.memory_space<vmem>>, vector<1x192x64xbf16>
    %24 = vector.shape_cast %23 : vector<1x192x64xbf16> to vector<192x64xbf16>
    %cst_40 = arith.constant dense<0.000000e+00> : vector<256x64xf32>
    %25 = tpu.matmul %22, %24, %cst_40 {dimension_numbers = #tpu.dot_dimension_numbers<[1], [0], [0], [1], [0, 0, 1, 1], [], []>} : vector<256x192xbf16>, vector<192x64xbf16>, vector<256x64xf32> -> vector<256x64xf32>
    %26 = vector.extract_strided_slice %20 {offsets = [0, 1, 0, 0], sizes = [1, 16, 16, 192], strides = [1, 1, 1, 1]} : vector<1x18x16x192xbf16> to vector<1x16x16x192xbf16>
    %27 = vector.shape_cast %26 : vector<1x16x16x192xbf16> to vector<256x192xbf16>
    %c1_41 = arith.constant 1 : index
    %c0_42 = arith.constant 0 : index
    %c0_43 = arith.constant 0 : index
    %28 = vector.load %arg4[%c1_41, %c0_42, %c0_43] : memref<3x192x64xbf16, #tpu.memory_space<vmem>>, vector<1x192x64xbf16>
    %29 = vector.shape_cast %28 : vector<1x192x64xbf16> to vector<192x64xbf16>
    %cst_44 = arith.constant dense<0.000000e+00> : vector<256x64xf32>
    %30 = tpu.matmul %27, %29, %cst_44 {dimension_numbers = #tpu.dot_dimension_numbers<[1], [0], [0], [1], [0, 0, 1, 1], [], []>} : vector<256x192xbf16>, vector<192x64xbf16>, vector<256x64xf32> -> vector<256x64xf32>
    %31 = arith.addf %25, %30 : vector<256x64xf32>
    %32 = vector.extract_strided_slice %20 {offsets = [0, 2, 0, 0], sizes = [1, 16, 16, 192], strides = [1, 1, 1, 1]} : vector<1x18x16x192xbf16> to vector<1x16x16x192xbf16>
    %33 = vector.shape_cast %32 : vector<1x16x16x192xbf16> to vector<256x192xbf16>
    %c2_45 = arith.constant 2 : index
    %c0_46 = arith.constant 0 : index
    %c0_47 = arith.constant 0 : index
    %34 = vector.load %arg4[%c2_45, %c0_46, %c0_47] : memref<3x192x64xbf16, #tpu.memory_space<vmem>>, vector<1x192x64xbf16>
    %35 = vector.shape_cast %34 : vector<1x192x64xbf16> to vector<192x64xbf16>
    %cst_48 = arith.constant dense<0.000000e+00> : vector<256x64xf32>
    %36 = tpu.matmul %33, %35, %cst_48 {dimension_numbers = #tpu.dot_dimension_numbers<[1], [0], [0], [1], [0, 0, 1, 1], [], []>} : vector<256x192xbf16>, vector<192x64xbf16>, vector<256x64xf32> -> vector<256x64xf32>
    %37 = arith.addf %31, %36 : vector<256x64xf32>
    %c0_49 = arith.constant 0 : index
    %c0_50 = arith.constant 0 : index
    %38 = vector.load %arg5[%c0_49, %c0_50] : memref<1x64xf32, #tpu.memory_space<vmem>>, vector<1x64xf32>
    %39 = vector.broadcast %38 : vector<1x64xf32> to vector<256x64xf32>
    %40 = arith.addf %37, %39 : vector<256x64xf32>
    %cst_51 = arith.constant 0.000000e+00 : f32
    %41 = vector.broadcast %cst_51 : f32 to vector<256x64xf32>
    %42 = arith.maximumf %40, %41 : vector<256x64xf32>
    %43 = arith.truncf %42 : vector<256x64xf32> to vector<256x64xbf16>
    %44 = vector.shape_cast %43 : vector<256x64xbf16> to vector<1x16x16x64xbf16>
    %c0_52 = arith.constant 0 : index
    %c1_53 = arith.constant 1 : index
    %c1_54 = arith.constant 1 : index
    %c0_55 = arith.constant 0 : index
    %45 = vector.load %arg9[%c0_52, %c1_53, %c1_54, %c0_55] : memref<1x18x18x64xbf16, #tpu.memory_space<vmem>>, vector<1x16x16x64xbf16>
    tpu.vector_store %arg9[%c0_52, %c1_53, %c1_54, %c0_55], %44 {strides = array<i32>} : memref<1x18x18x64xbf16, #tpu.memory_space<vmem>>, vector<1x16x16x64xbf16>,
    %c0_56 = arith.constant 0 : index
    %c0_57 = arith.constant 0 : index
    %c0_58 = arith.constant 0 : index
    %c0_59 = arith.constant 0 : index
    %46 = vector.load %arg9[%c0_56, %c0_57, %c0_58, %c0_59] : memref<1x18x18x64xbf16, #tpu.memory_space<vmem>>, vector<1x18x16x64xbf16>
    %c0_60 = arith.constant 0 : index
    %c0_61 = arith.constant 0 : index
    %c1_62 = arith.constant 1 : index
    %c0_63 = arith.constant 0 : index
    %47 = vector.load %arg9[%c0_60, %c0_61, %c1_62, %c0_63] : memref<1x18x18x64xbf16, #tpu.memory_space<vmem>>, vector<1x18x16x64xbf16>
    %c0_64 = arith.constant 0 : index
    %c0_65 = arith.constant 0 : index
    %c2_66 = arith.constant 2 : index
    %c0_67 = arith.constant 0 : index
    %48 = vector.load %arg9[%c0_64, %c0_65, %c2_66, %c0_67] : memref<1x18x18x64xbf16, #tpu.memory_space<vmem>>, vector<1x18x16x64xbf16>
    %49 = tpu.concatenate %46, %47, %48 in 3 : vector<1x18x16x64xbf16>, vector<1x18x16x64xbf16>, vector<1x18x16x64xbf16> -> vector<1x18x16x192xbf16>
    %50 = vector.extract_strided_slice %49 {offsets = [0, 0, 0, 0], sizes = [1, 16, 16, 192], strides = [1, 1, 1, 1]} : vector<1x18x16x192xbf16> to vector<1x16x16x192xbf16>
    %51 = vector.shape_cast %50 : vector<1x16x16x192xbf16> to vector<256x192xbf16>
    %c0_68 = arith.constant 0 : index
    %c0_69 = arith.constant 0 : index
    %c0_70 = arith.constant 0 : index
    %52 = vector.load %arg6[%c0_68, %c0_69, %c0_70] : memref<3x192x64xbf16, #tpu.memory_space<vmem>>, vector<1x192x64xbf16>
    %53 = vector.shape_cast %52 : vector<1x192x64xbf16> to vector<192x64xbf16>
    %cst_71 = arith.constant dense<0.000000e+00> : vector<256x64xf32>
    %54 = tpu.matmul %51, %53, %cst_71 {dimension_numbers = #tpu.dot_dimension_numbers<[1], [0], [0], [1], [0, 0, 1, 1], [], []>} : vector<256x192xbf16>, vector<192x64xbf16>, vector<256x64xf32> -> vector<256x64xf32>
    %55 = vector.extract_strided_slice %49 {offsets = [0, 1, 0, 0], sizes = [1, 16, 16, 192], strides = [1, 1, 1, 1]} : vector<1x18x16x192xbf16> to vector<1x16x16x192xbf16>
    %56 = vector.shape_cast %55 : vector<1x16x16x192xbf16> to vector<256x192xbf16>
    %c1_72 = arith.constant 1 : index
    %c0_73 = arith.constant 0 : index
    %c0_74 = arith.constant 0 : index
    %57 = vector.load %arg6[%c1_72, %c0_73, %c0_74] : memref<3x192x64xbf16, #tpu.memory_space<vmem>>, vector<1x192x64xbf16>
    %58 = vector.shape_cast %57 : vector<1x192x64xbf16> to vector<192x64xbf16>
    %cst_75 = arith.constant dense<0.000000e+00> : vector<256x64xf32>
    %59 = tpu.matmul %56, %58, %cst_75 {dimension_numbers = #tpu.dot_dimension_numbers<[1], [0], [0], [1], [0, 0, 1, 1], [], []>} : vector<256x192xbf16>, vector<192x64xbf16>, vector<256x64xf32> -> vector<256x64xf32>
    %60 = arith.addf %54, %59 : vector<256x64xf32>
    %61 = vector.extract_strided_slice %49 {offsets = [0, 2, 0, 0], sizes = [1, 16, 16, 192], strides = [1, 1, 1, 1]} : vector<1x18x16x192xbf16> to vector<1x16x16x192xbf16>
    %62 = vector.shape_cast %61 : vector<1x16x16x192xbf16> to vector<256x192xbf16>
    %c2_76 = arith.constant 2 : index
    %c0_77 = arith.constant 0 : index
    %c0_78 = arith.constant 0 : index
    %63 = vector.load %arg6[%c2_76, %c0_77, %c0_78] : memref<3x192x64xbf16, #tpu.memory_space<vmem>>, vector<1x192x64xbf16>
    %64 = vector.shape_cast %63 : vector<1x192x64xbf16> to vector<192x64xbf16>
    %cst_79 = arith.constant dense<0.000000e+00> : vector<256x64xf32>
    %65 = tpu.matmul %62, %64, %cst_79 {dimension_numbers = #tpu.dot_dimension_numbers<[1], [0], [0], [1], [0, 0, 1, 1], [], []>} : vector<256x192xbf16>, vector<192x64xbf16>, vector<256x64xf32> -> vector<256x64xf32>
    %66 = arith.addf %60, %65 : vector<256x64xf32>
    %c0_80 = arith.constant 0 : index
    %c0_81 = arith.constant 0 : index
    %67 = vector.load %arg7[%c0_80, %c0_81] : memref<1x64xf32, #tpu.memory_space<vmem>>, vector<1x64xf32>
    %68 = vector.broadcast %67 : vector<1x64xf32> to vector<256x64xf32>
    %69 = arith.addf %66, %68 : vector<256x64xf32>
    %70 = vector.shape_cast %69 : vector<256x64xf32> to vector<1x16x16x64xf32>
    %71 = arith.addf %6, %70 : vector<1x16x16x64xf32>
    %c0_82 = arith.constant 0 : index
    %c0_83 = arith.constant 0 : index
    %c0_84 = arith.constant 0 : index
    %c0_85 = arith.constant 0 : index
    %72 = vector.load %arg8[%c0_82, %c0_83, %c0_84, %c0_85] : memref<1x16x16x64xf32, #tpu.memory_space<vmem>>, vector<1x16x16x64xf32>
    tpu.vector_store %arg8[%c0_82, %c0_83, %c0_84, %c0_85], %71 {strides = array<i32>} : memref<1x16x16x64xf32, #tpu.memory_space<vmem>>, vector<1x16x16x64xf32>,
    return
  }
  func.func @transform_0(%arg0: i32) -> (i32, i32, i32, i32) {
    %c0_i32 = arith.constant 0 : i32
    %c0_i32_0 = arith.constant 0 : i32
    %c0_i32_1 = arith.constant 0 : i32
    %c0_i32_2 = arith.constant 0 : i32
    return %arg0, %c0_i32, %c0_i32_0, %c0_i32_1 : i32, i32, i32, i32
  }
  func.func @transform_1(%arg0: i32) -> (i32, i32) {
    %c0_i32 = arith.constant 0 : i32
    %c0_i32_0 = arith.constant 0 : i32
    %c0_i32_1 = arith.constant 0 : i32
    return %c0_i32, %c0_i32_0 : i32, i32
  }
  func.func @transform_2(%arg0: i32) -> (i32, i32) {
    %c0_i32 = arith.constant 0 : i32
    %c0_i32_0 = arith.constant 0 : i32
    %c0_i32_1 = arith.constant 0 : i32
    return %c0_i32, %c0_i32_0 : i32, i32
  }
  func.func @transform_3(%arg0: i32) -> (i32, i32, i32) {
    %c0_i32 = arith.constant 0 : i32
    %c0_i32_0 = arith.constant 0 : i32
    %c0_i32_1 = arith.constant 0 : i32
    %c0_i32_2 = arith.constant 0 : i32
    return %c0_i32, %c0_i32_0, %c0_i32_1 : i32, i32, i32
  }
  func.func @transform_4(%arg0: i32) -> (i32, i32) {
    %c0_i32 = arith.constant 0 : i32
    %c0_i32_0 = arith.constant 0 : i32
    %c0_i32_1 = arith.constant 0 : i32
    return %c0_i32, %c0_i32_0 : i32, i32
  }
  func.func @transform_5(%arg0: i32) -> (i32, i32, i32) {
    %c0_i32 = arith.constant 0 : i32
    %c0_i32_0 = arith.constant 0 : i32
    %c0_i32_1 = arith.constant 0 : i32
    %c0_i32_2 = arith.constant 0 : i32
    return %c0_i32, %c0_i32_0, %c0_i32_1 : i32, i32, i32
  }
  func.func @transform_6(%arg0: i32) -> (i32, i32) {
    %c0_i32 = arith.constant 0 : i32
    %c0_i32_0 = arith.constant 0 : i32
    %c0_i32_1 = arith.constant 0 : i32
    return %c0_i32, %c0_i32_0 : i32, i32
  }
  func.func @transform_7(%arg0: i32) -> (i32, i32, i32, i32) {
    %c0_i32 = arith.constant 0 : i32
    %c0_i32_0 = arith.constant 0 : i32
    %c0_i32_1 = arith.constant 0 : i32
    %c0_i32_2 = arith.constant 0 : i32
    return %arg0, %c0_i32, %c0_i32_0, %c0_i32_1 : i32, i32, i32, i32
  }
}

</mosaic_0001>

<bundles_post_ra>
// kernel: tpu_custom_call.1
= control target key start
LH: loop header
LB: loop body
LE: loop exit
PB: predicated region body
PF: predicated region fallthrough
CT: control target
= control target key end

     0   :  { %12 = vsyncpa [#allocation4], 0  ;;  %s7861_s0 = inlined_call_operand.vmem [shape: f32[2,16,16,64], index: 0, kind: input, shape index: {}]   ;;  %s7862_s1 = inlined_call_operand.vmem [shape: f32[1,64], index: 1, kind: input, shape index: {}]   ;;  %s7863_s2 = inlined_call_operand.vmem [shape: f32[1,64], index: 2, kind: input, shape index: {}]   ;;  %s7864_s3 = inlined_call_operand.vmem [shape: bf16[3,192,64], index: 3, kind: input, shape index: {}]   ;;  %s7865_s4 = inlined_call_operand.vmem [shape: f32[1,64], index: 4, kind: input, shape index: {}]   ;;  %s7866_s5 = inlined_call_operand.vmem [shape: bf16[3,192,64], index: 5, kind: input, shape index: {}]   ;;  %s7867_s6 = inlined_call_operand.vmem [shape: f32[1,64], index: 6, kind: input, shape index: {}]   ;;  %s7868_s7 = inlined_call_operand.hbm [shape: f32[2,16,16,64], index: 7, kind: output, shape index: {}]  }
   0x1   :  { %14 = vsyncpa [#allocation4 + $0x1], 0  ;;  %s5671_s24 = smov 0   ;;  %s5673_s25 = smov 0  }
   0x2   :  { %s5675_s26 = smov 0   ;;  %s5677_s27 = smov 0  }
   0x3 LB: > { %s5692_s28 = sadd.s32 4294967295, %s5624_s27   ;;  %s4790_s29 = sadd.s32 4294967294, %s5624_s27   ;;  %s5624_s27 = sphi %s5677_s27, %s7884_s27   ;;  %s5620_s26 = sphi %s5675_s26, %s7883_s26   ;;  %s5616_s25 = sphi %s5673_s25, %s7882_s25   ;;  %s5612_s24 = sphi %s5671_s24, %s7881_s24  }
   0x4   : > { %s5696_s30 = sadd.s32 1, %s5624_s27   ;;  %s179_s8 = sadd.s32 1, %s5620_s26 }
   0x5   : > { %s176_s9 = ssub.s32 %s5624_s27, %s5696_s30  ;;  %p189_p0 = scmp.ne.s32.totalorder %s5620_s26, %s5616_s25 }
   0x6   : > { %p177_p1 = scmp.eq.s32.totalorder %s176_s9, 0  ;;  %p190_p2 = scmp.eq.s32.totalorder %s5692_s28, 1 }
   0x7   : > { %p195_p3 = scmp.ne.s32.totalorder %s5616_s25, %s5612_s24  ;;  %p196_p4 = scmp.eq.s32.totalorder %s4790_s29, 1 }
   0x8   : > { %s5707_s10 = scalar_select %p177_p1, %s5620_s26, %s179_s8  }
   0x9   : > { %p5709_p5 = por %p190_p2, %p189_p0  ;;  %p5713_p6 = por %p196_p4, %p195_p3 }
   0xa   : > { %p4793_p7 = scmp.ge.s32.totalorder %s5624_s27, 1  ;;  %p240_p8 = scmp.lt.s32.totalorder %s5624_s27, 3 }
   0xc   : > { %p241_p9 = pnand %p4793_p7, %p240_p8 }
   0xd   : > { %p272_p10 = scmp.lt.s32.totalorder (!%p241_p9), %s5692_s28, 1  ;;  %vm281_vm0 = vcmask (!%p241_p9), 516096   ;;  %vm289_vm1 = vsmask.f32 (!%p241_p9), 256  ;;  %v291_v1 = vld [vmem:[#allocation2 + $0xc] sm:$0x1] (!%p241_p9) }
   0xe   : > { %244 = sbr.rel (%p241_p9) target bundleno = 1181 (0x49d), region = 48  ;;  %vm5722_vm2 = vmand (!%p241_p9), %vm281_vm0, %vm289_vm1  ;;  %vm339_vm3 = vsmask.f32 (!%p241_p9), 7938  ;;  %v341_v2 = vld [vmem:[#allocation2 + $0x14] sm:$0x1] (!%p241_p9)  ;;  %vm278_vm5 = vcmask (!%p241_p9), 519168  }
   0xf   : > { %v292_v3 = vsel (!%p241_p9), %vm5722_vm2, 0, %v291_v1  ;;  %vm5731_vm4 = vmand (!%p241_p9), %vm281_vm0, %vm339_vm3  ;;  %v5740_v6 = vld [vmem:[%s7862_s1] ss:$0 sm:$0xff] (!%p241_p9)  ;;  %v294_v8 = vld [vmem:[#allocation2 + $0x18] sm:$0x1] (!%p241_p9)  ;;  %v5626_v10 = vmov (!%p241_p9), 0  }
  0x10   : > { %293 = vst [vmem:[#allocation2 + $0xc] sm:$0x1] (!%p241_p9), %v292_v3  ;;  %v342_v5 = vsel (!%p241_p9), %vm5731_vm4, 0, %v341_v2  ;;  %v5745_v7 = vld [vmem:[%s7863_s2] ss:$0 sm:$0xff] (!%p241_p9)  ;;  %1833 = vmatprep.subr.bf16.mxu0 (!%p241_p9), %v5626_v10  ;;  %2069 = vmatprep.subr.bf16.mxu1 (!%p241_p9), %v5626_v10  ;;  %v295_v11 = vsel (!%p241_p9), %vm5722_vm2, 0, %v294_v8  ;;  %vm5802_vm7 = vmand (!%p241_p9), %vm278_vm5, %vm339_vm3 }
  0x11   : > { %343 = vst [vmem:[#allocation2 + $0x14] sm:$0x1] (!%p241_p9), %v342_v5  ;;  %v344_v9 = vld [vmem:[#allocation2 + $0x20] sm:$0x1] (!%p241_p9)  ;;  %279 = vst.msk [vmem:[#allocation2] sm:$0xf] (!%p241_p9), %vm278_vm5, %v5626_v10 }
  0x12   : > { %280 = vst.msk [vmem:[#allocation2 + $0x4] sm:$0xf] (!%p241_p9), %vm278_vm5, %v5626_v10  ;;  %284 = vst.msk [vmem:[#allocation2 + $0xcc] sm:$0xf] (!%p241_p9), %vm278_vm5, %v5626_v10  ;;  %v345_v12 = vsel (!%p241_p9), %vm5731_vm4, 0, %v344_v9  ;;  %s5627_s22 = smov (!%p241_p9), 64  }
  0x13   : > { %282 = vst.msk [vmem:[#allocation2 + $0x8] sm:$0x1] (!%p241_p9), %vm281_vm0, %v5626_v10  ;;  %286 = vst.msk [vmem:[#allocation2 + $0xd4] sm:$0x1] (!%p241_p9), %vm281_vm0, %v5626_v10  ;;  %v303_v13 = vld [vmem:[#allocation2 + $0x3c] sm:$0x1] (!%p241_p9) }
  0x14   : > { %285 = vst.msk [vmem:[#allocation2 + $0xd0] sm:$0xf] (!%p241_p9), %vm278_vm5, %v5626_v10  ;;  %v353_v14 = vld [vmem:[#allocation2 + $0x44] sm:$0x1] (!%p241_p9)  ;;  %296 = vst [vmem:[#allocation2 + $0x18] sm:$0x1] (!%p241_p9), %v295_v11 }
  0x15   : > { %s273_s13 = scalar_select %p272_p10, %s5692_s28, 1  ;;  %346 = vst [vmem:[#allocation2 + $0x20] sm:$0x1] %v345_v12  ;;  %v304_v18 = vsel %vm5722_vm2, 0, %v303_v13  ;;  %v354_v19 = vsel %vm5731_vm4, 0, %v353_v14  ;;  %vm1554_vm10 = vcmask 1046528  }
  0x16   : > { %vm595_vm6 = vsmask.f32 4368  ;;  %305 = vst [vmem:[#allocation2 + $0x3c] sm:$0x1] %v304_v18  ;;  %355 = vst [vmem:[#allocation2 + $0x44] sm:$0x1] %v354_v19 }
  0x17   : > { %s5242_s16 = sshll.u32 %s273_s13, 8  ;;  %v309_v29 = vld [vmem:[#allocation2 + $0x54] sm:$0x1]  ;;  %v359_v30 = vld [vmem:[#allocation2 + $0x5c] sm:$0x1]  ;;  %vm5808_vm8 = vmor %vm289_vm1, %vm595_vm6  ;;  %vm1609_vm11 = vcmask 523264  }
  0x18   : > { %s5764_s21 = scalar_lea.vmem %s7861_s0, %s5242_s16  ;;  %v310_v35 = vsel %vm5722_vm2, 0, %v309_v29  ;;  %v360_v40 = vsel %vm5731_vm4, 0, %v359_v30  ;;  %v919_v60 = vld [vmem:[#allocation2 + $0xc] sm:$0xf]  ;;  %v923_v1 = vld [vmem:[#allocation2 + $0x14] sm:$0x1] }
  0x19   : > { %v389_v15 = vld [vmem:[%s5764_s21] sm:$0xff]  ;;  %v390_v16 = vld [vmem:[%s5764_s21 + $0x8] sm:$0xff]  ;;  %v391_v17 = vld [vmem:[%s5764_s21 + $0x10] sm:$0xff]  ;;  %311 = vst [vmem:[#allocation2 + $0x54] sm:$0x1] %v310_v35  ;;  %s269_s16 = sand.u32 1, %s5616_s25  }
  0x1a   : > { %v428_v20 = vmul.f32 %v5740_v6, %v389_v15  ;;  %v429_v21 = vmul.f32 %v5740_v6, %v390_v16  ;;  %v392_v22 = vld [vmem:[%s5764_s21 + $0x18] sm:$0xff]  ;;  %v430_v23 = vmul.f32 %v5740_v6, %v391_v17  ;;  %v397_v24 = vld [vmem:[%s5764_s21 + $0x40] sm:$0xff]  ;;  %v398_v25 = vld [vmem:[%s5764_s21 + $0x48] sm:$0xff]  ;;  %361 = vst [vmem:[#allocation2 + $0x5c] sm:$0x1] %v360_v40  ;;  %s5307_s20 = sshll.u32 %s5692_s28, 12 }
  0x1b   : > { %v431_v26 = vmul.f32 %v5740_v6, %v392_v22  ;;  %v436_v27 = vmul.f32 %v5740_v6, %v397_v24  ;;  %v437_v28 = vmul.f32 %v5740_v6, %v398_v25  ;;  %v401_v31 = vld [vmem:[%s5764_s21 + $0x60] sm:$0xff]  ;;  %v402_v36 = vld [vmem:[%s5764_s21 + $0x68] sm:$0xff]  ;;  %v926_v14 = vld [vmem:[#allocation2 + $0x18] sm:$0xf]  ;;  %vm1247_vm9 = vsmask.f32 7424  ;;  %s7809_s9 = scalar_lea.hbm %s7868_s7, %s5307_s20 }
  0x1c   : > { %v467_v32 = vadd.f32 %v5745_v7, %v428_v20  ;;  %v468_v33 = vadd.f32 %v5745_v7, %v429_v21  ;;  %v469_v34 = vadd.f32 %v5745_v7, %v430_v23  ;;  %v440_v44 = vmul.f32 %v5740_v6, %v401_v31  ;;  %v930_v15 = vld [vmem:[#allocation2 + $0x20] sm:$0x1]  ;;  %v297_v24 = vld [vmem:[#allocation2 + $0x24] sm:$0x1]  ;;  %v347_v25 = vld [vmem:[#allocation2 + $0x2c] sm:$0x1] }
  0x1d   : > { %v470_v37 = vadd.f32 %v5745_v7, %v431_v26  ;;  %v475_v38 = vadd.f32 %v5745_v7, %v436_v27  ;;  %v476_v39 = vadd.f32 %v5745_v7, %v437_v28  ;;  %v441_v48 = vmul.f32 %v5740_v6, %v402_v36  ;;  %v947_v30 = vld [vmem:[#allocation2 + $0x3c] sm:$0xf]  ;;  %v393_v31 = vld [vmem:[%s5764_s21 + $0x20] sm:$0xff]  ;;  %s7820_s28 = scalar_lea.sflag [#allocation4], %s269_s16  ;;  %s5628_s14 = smov [#allocation3]  }
  0x1e   : > { %v5243_v41 = vpack.c.bf16 %v467_v32, %v467_v32  ;;  %v5244_v42 = vpack.c.bf16 %v468_v33, %v468_v33  ;;  %v5245_v43 = vpack.c.bf16 %v469_v34, %v469_v34  ;;  %v951_v34 = vld [vmem:[#allocation2 + $0x44] sm:$0x1]  ;;  %v479_v35 = vadd.f32 %v5745_v7, %v440_v44  ;;  %s5566_s15 = sshll.u32 %s5628_s14, 4  ;;  %s5567_s15 = int_to_ptr.vmem [resolvable:$false] %s5566_s15 }
  0x1f   : > { %v5246_v45 = vpack.c.bf16 %v470_v37, %v470_v37  ;;  %v5251_v46 = vpack.c.bf16 %v475_v38, %v475_v38  ;;  %v5252_v47 = vpack.c.bf16 %v476_v39, %v476_v39  ;;  %v480_v36 = vadd.f32 %v5745_v7, %v441_v48  ;;  %v394_v37 = vld [vmem:[%s5764_s21 + $0x28] sm:$0xff]  ;;  %v405_v48 = vld [vmem:[%s5764_s21 + $0x80] sm:$0xff]  ;;  %s5568_s17 = scalar_lea.vmem %s5567_s15, 8192 }
  0x20   : > { %v598_v49 = vshrl.u32 %v5243_v41, 16  ;;  %v601_v50 = vshll.u32 %v5243_v41, 16  ;;  %v606_v51 = vshrl.u32 %v5244_v42, 16  ;;  %v609_v52 = vshll.u32 %v5244_v42, 16  ;;  %v315_v38 = vld [vmem:[#allocation2 + $0x6c] sm:$0x1] }
  0x21   : > { %v615_v53 = vshrl.u32 %v5245_v43, 16  ;;  %v618_v54 = vshll.u32 %v5245_v43, 16  ;;  %v623_v55 = vshrl.u32 %v5246_v45, 16  ;;  %v626_v56 = vshll.u32 %v5246_v45, 16  ;;  %v365_v43 = vld [vmem:[#allocation2 + $0x74] sm:$0x1] }
  0x22   : > { %v600_v57 = vrot.slane %v598_v49, 7  ;;  %v608_v58 = vrot.slane %v606_v51, 7  ;;  %v666_v61 = vshrl.u32 %v5251_v46, 16  ;;  %v669_v62 = vshll.u32 %v5251_v46, 16  ;;  %v406_v49 = vld [vmem:[%s5764_s21 + $0x88] sm:$0xff] }
  0x23   : > { %v617_v2 = vrot.slane %v615_v53, 7  ;;  %v625_v3 = vrot.slane %v623_v55, 7  ;;  %v674_v5 = vshrl.u32 %v5252_v47, 16  ;;  %v677_v8 = vshll.u32 %v5252_v47, 16  ;;  %v410_v55 = vld [vmem:[%s5764_s21 + $0xa8] sm:$0xff] }
  0x24   : > { %v603_v9 = vor.u32 %v601_v50, %v600_v57  ;;  %v604_v11 = vrot.slane %v600_v57, 4  ;;  %v611_v12 = vor.u32 %v609_v52, %v608_v58  ;;  %v613_v13 = vrot.slane %v608_v58, 4  ;;  %v409_v50 = vld [vmem:[%s5764_s21 + $0xa0] sm:$0xff] }
  0x25   : > { %v620_v16 = vor.u32 %v618_v54, %v617_v2  ;;  %v621_v17 = vrot.slane %v617_v2, 4  ;;  %v628_v18 = vor.u32 %v626_v56, %v625_v3  ;;  %v630_v19 = vrot.slane %v625_v3, 4  ;;  %v395_v56 = vld [vmem:[%s5764_s21 + $0x30] sm:$0xff] }
  0x26   : > { %v612_v20 = vsel %vm5808_vm8, %v604_v11, %v611_v12  ;;  %v920_v21 = vsel %vm5802_vm7, %v603_v9, %v919_v60  ;;  %v924_v22 = vsel %vm5722_vm2, %v613_v13, %v923_v1  ;;  %v668_v23 = vrot.slane %v666_v61, 7 }
  0x27   : > { %921 = vst [vmem:[#allocation2 + $0xc] sm:$0xf] %v920_v21  ;;  %922 = vst.msk [vmem:[#allocation2 + $0x10] sm:$0xf] %vm278_vm5, %v612_v20  ;;  %v629_v26 = vsel %vm5808_vm8, %v621_v17, %v628_v18  ;;  %v927_v27 = vsel %vm5802_vm7, %v620_v16, %v926_v14  ;;  %v931_v28 = vsel %vm5722_vm2, %v630_v19, %v930_v15  ;;  %v676_v29 = vrot.slane %v674_v5, 7 }
  0x28   : > { %925 = vst [vmem:[#allocation2 + $0x14] sm:$0x1] %v924_v22  ;;  %928 = vst [vmem:[#allocation2 + $0x18] sm:$0xf] %v927_v27  ;;  %v671_v32 = vor.u32 %v669_v62, %v668_v23  ;;  %v672_v33 = vrot.slane %v668_v23, 4  ;;  %v298_v41 = vsel %vm5722_vm2, 0, %v297_v24  ;;  %v5255_v45 = vpack.c.bf16 %v479_v35, %v479_v35 }
  0x29   : > { %929 = vst.msk [vmem:[#allocation2 + $0x1c] sm:$0xf] %vm278_vm5, %v629_v26  ;;  %932 = vst [vmem:[#allocation2 + $0x20] sm:$0x1] %v931_v28  ;;  %v679_v39 = vor.u32 %v677_v8, %v676_v29  ;;  %v681_v40 = vrot.slane %v676_v29, 4  ;;  %v348_v42 = vsel %vm5731_vm4, 0, %v347_v25  ;;  %v5256_v46 = vpack.c.bf16 %v480_v36, %v480_v36 }
  0x2a   : > { %v948_v44 = vsel %vm5802_vm7, %v671_v32, %v947_v30  ;;  %299 = vst [vmem:[#allocation2 + $0x24] sm:$0x1] %v298_v41  ;;  %349 = vst [vmem:[#allocation2 + $0x2c] sm:$0x1] %v348_v42  ;;  %v432_v47 = vmul.f32 %v5740_v6, %v393_v31  ;;  %v433_v53 = vmul.f32 %v5740_v6, %v394_v37  ;;  %v316_v54 = vsel %vm5722_vm2, 0, %v315_v38 }
  0x2b   : > { %v680_v51 = vsel %vm5808_vm8, %v672_v33, %v679_v39  ;;  %949 = vst [vmem:[#allocation2 + $0x3c] sm:$0xf] %v948_v44  ;;  %v952_v52 = vsel %vm5722_vm2, %v681_v40, %v951_v34  ;;  %v700_v57 = vshrl.u32 %v5255_v45, 16  ;;  %v703_v58 = vshll.u32 %v5255_v45, 16  ;;  %317 = vst [vmem:[#allocation2 + $0x6c] sm:$0x1] %v316_v54 }
  0x2c   : > { %950 = vst.msk [vmem:[#allocation2 + $0x40] sm:$0xf] %vm278_vm5, %v680_v51  ;;  %953 = vst [vmem:[#allocation2 + $0x44] sm:$0x1] %v952_v52  ;;  %v708_v60 = vshrl.u32 %v5256_v46, 16  ;;  %v711_v61 = vshll.u32 %v5256_v46, 16  ;;  %v471_v62 = vadd.f32 %v5745_v7, %v432_v47  ;;  %v472_v1 = vadd.f32 %v5745_v7, %v433_v53 }
  0x2d   : > { %v366_v2 = vsel %vm5731_vm4, 0, %v365_v43  ;;  %v444_v3 = vmul.f32 %v5740_v6, %v405_v48  ;;  %v321_v5 = vld [vmem:[#allocation2 + $0x84] sm:$0x1]  ;;  %v445_v11 = vmul.f32 %v5740_v6, %v406_v49  ;;  %v5857_v12 = vmul.f32 %v5740_v6, %v409_v50  ;;  %v961_v19 = vld [vmem:[#allocation2 + $0x54] sm:$0xf] }
  0x2e   : > { %v1033_v8 = vld [vmem:[#allocation2 + $0xc] sm:$0xf]  ;;  %v1034_v9 = vld [vmem:[#allocation2 + $0x10] sm:$0xf]  ;;  %367 = vst [vmem:[#allocation2 + $0x74] sm:$0x1] %v366_v2  ;;  %v5860_v13 = vmul.f32 %v5740_v6, %v410_v55  ;;  %v5863_v14 = vmul.f32 %v5740_v6, %v395_v56  ;;  %v5247_v20 = vpack.c.bf16 %v471_v62, %v471_v62  ;;  %v5867_v21 = vpack.c.bf16 %v472_v1, %v472_v1 }
  0x2f   : > { %v5865_v15 = vcombine.low %v1033_v8, %v1034_v9  ;;  %v5352_v16 = vld [vmem:[#allocation2 + $0x14] ss:$0 sps:$4 sm:$0x11]   ;;  %v1035_v17 = vld [vmem:[#allocation2 + $0x18] sm:$0xf]  ;;  %v702_v18 = vrot.slane %v700_v57, 7  ;;  %v483_v24 = vadd.f32 %v5745_v7, %v444_v3  ;;  %v484_v25 = vadd.f32 %v5745_v7, %v445_v11 }
  0x30   : > { %v1036_v22 = vld [vmem:[#allocation2 + $0x1c] sm:$0xf]  ;;  %v710_v23 = vrot.slane %v708_v60, 7  ;;  %v322_v26 = vsel %vm5722_vm2, 0, %v321_v5  ;;  %v1268_v29 = vshll.u32 %v5352_v16, 16  ;;  %v632_v51 = vshrl.u32 %v5247_v20, 16 }
  0x31   : > { %v1261_v27 = vshrl.u32 %v5865_v15, 16  ;;  %v1263_v28 = vshll.u32 %v5865_v15, 16  ;;  %v5875_v30 = vcombine.low %v1035_v17, %v1036_v22  ;;  %v5354_v31 = vld [vmem:[#allocation2 + $0x20] ss:$0 sps:$4 sm:$0x11]   ;;  %v705_v33 = vor.u32 %v703_v58, %v702_v18 }
  0x32   : > { %323 = vst [vmem:[#allocation2 + $0x84] sm:$0x1] %v322_v26  ;;  %v1041_v32 = vld [vmem:[#allocation2 + $0x3c] sm:$0xf]  ;;  %v706_v34 = vrot.slane %v702_v18, 4  ;;  %v713_v35 = vor.u32 %v711_v61, %v710_v23  ;;  %v715_v36 = vrot.slane %v710_v23, 4  ;;  %v5259_v17 = vpack.c.bf16 %v483_v24, %v483_v24 }
  0x33   : > { %v965_v37 = vld [vmem:[#allocation2 + $0x5c] sm:$0x1]  ;;  %v1265_v38 = vrot.slane %v1263_v28, 1  ;;  %v1270_v39 = vrot.slane %v1268_v29, 1  ;;  %v1273_v40 = vshrl.u32 %v5875_v30, 16  ;;  %v1275_v41 = vshll.u32 %v5875_v30, 16 }
  0x34   : > { %v1042_v42 = vld [vmem:[#allocation2 + $0x40] sm:$0xf]  ;;  %v1280_v43 = vshll.u32 %v5354_v31, 16  ;;  %v5356_v45 = vld [vmem:[#allocation2 + $0x44] ss:$0 sps:$4 sm:$0x11]   ;;  %v714_v46 = vsel %vm5808_vm8, %v706_v34, %v713_v35  ;;  %v962_v47 = vsel %vm5802_vm7, %v705_v33, %v961_v19  ;;  %v966_v50 = vsel %vm5722_vm2, %v715_v36, %v965_v37 }
  0x35   : > { %v5879_v44 = vcombine.low %v1041_v32, %v1042_v42  ;;  %v1266_v48 = vor.u32 %v1265_v38, %v1261_v27  ;;  %v1277_v49 = vrot.slane %v1275_v41, 1  ;;  %963 = vst [vmem:[#allocation2 + $0x54] sm:$0xf] %v962_v47  ;;  %964 = vst.msk [vmem:[#allocation2 + $0x58] sm:$0xf] %vm278_vm5, %v714_v46  ;;  %v1316_v55 = vshll.u32 %v5356_v45, 16 }
  0x36   : > { %v1282_v52 = vrot.slane %v1280_v43, 1  ;;  %967 = vst [vmem:[#allocation2 + $0x5c] sm:$0x1] %v966_v50  ;;  %v634_v58 = vrot.slane %v632_v51, 7  ;;  %v635_v60 = vshll.u32 %v5247_v20, 16  ;;  %v640_v2 = vshrl.u32 %v5867_v21, 16 }
  0x37   : > { %v1309_v53 = vshrl.u32 %v5879_v44, 16  ;;  %v1311_v54 = vshll.u32 %v5879_v44, 16  ;;  %v1271_v56 = vsel %vm1247_vm9, %v1266_v48, %v1270_v39  ;;  %v1278_v57 = vor.u32 %v1277_v49, %v1273_v40  ;;  %v371_v61 = vld [vmem:[#allocation2 + $0x8c] sm:$0x1]  ;;  %v933_v5 = vld [vmem:[#allocation2 + $0x24] sm:$0xf] }
  0x38   : > { %1466 = vrot.lane.b32.xlu0 %v1271_v56, %s5627_s22  ;;  %v1318_v1 = vrot.slane %v1316_v55, 1  ;;  %v643_v3 = vshll.u32 %v5867_v21, 16  ;;  %v637_v9 = vor.u32 %v635_v60, %v634_v58  ;;  %v638_v11 = vrot.slane %v634_v58, 4  ;;  %v937_v16 = vld [vmem:[#allocation2 + $0x2c] sm:$0x1]  ;;  %v5377_v23 = vld [vmem:[%s7864_s3 + $0x60] sm:$0xff]  }
  0x39   : > { %v1313_v62 = vrot.slane %v1311_v54, 1  ;;  %v1283_v8 = vsel %vm1247_vm9, %v1278_v57, %v1282_v52  ;;  %v642_v19 = vrot.slane %v640_v2, 7  ;;  %v5260_v20 = vpack.c.bf16 %v484_v25, %v484_v25  ;;  %v5378_v21 = vld [vmem:[%s7864_s3 + $0x68] sm:$0xff]   ;;  %1834 = vmatpush1.bf16.msra.mxu0 %v5377_v23  ;;  %v300_v45 = vld [vmem:[#allocation2 + $0x30] sm:$0x1]  ;;  %v5382_v23 = vld [vmem:[%s7864_s3 + $0x78] sm:$0xff]  }
  0x3a   : > { %v372_v22 = vsel %vm5731_vm4, 0, %v371_v61  ;;  %v934_v26 = vsel %vm5802_vm7, %v637_v9, %v933_v5  ;;  %v734_v27 = vshrl.u32 %v5259_v17, 16  ;;  %v737_v28 = vshll.u32 %v5259_v17, 16  ;;  %1835 = vmatprep.subr.bf16.mxu0 %v5626_v10  ;;  %v975_v43 = vld [vmem:[#allocation2 + $0x6c] sm:$0xf]  ;;  %v5381_v51 = vld [vmem:[%s7864_s3 + $0x70] sm:$0xff]  }
  0x3b   : > { %v1314_v18 = vor.u32 %v1313_v62, %v1309_v53  ;;  %373 = vst [vmem:[#allocation2 + $0x8c] sm:$0x1] %v372_v22  ;;  %v487_v24 = vadd.f32 %v5745_v7, %v5857_v12  ;;  %v645_v32 = vor.u32 %v643_v3, %v642_v19  ;;  %v647_v33 = vrot.slane %v642_v19, 4  ;;  %935 = vst [vmem:[#allocation2 + $0x24] sm:$0xf] %v934_v26  ;;  %v396_v62 = vld [vmem:[%s5764_s21 + $0x38] sm:$0xff] }
  0x3c   : > { %1468 = vrot.lane.b32.xlu0 %v1283_v8, %s5627_s22  ;;  %v1045_v29 = vld [vmem:[#allocation2 + $0x54] sm:$0xf]  ;;  %v1046_v31 = vld [vmem:[#allocation2 + $0x58] sm:$0xf]  ;;  %v742_v34 = vshrl.u32 %v5260_v20, 16  ;;  %v736_v37 = vrot.slane %v734_v27, 7  ;;  %v488_v38 = vadd.f32 %v5745_v7, %v5860_v13  ;;  %v435_v27 = vmul.f32 %v5740_v6, %v396_v62 }
  0x3d   : > { %v1319_v25 = vsel %vm1247_vm9, %v1314_v18, %v1318_v1  ;;  %v5909_v35 = vcombine.low %v1045_v29, %v1046_v31  ;;  %v5358_v36 = vld [vmem:[#allocation2 + $0x5c] ss:$0 sps:$4 sm:$0x11]   ;;  %v5263_v39 = vpack.c.bf16 %v487_v24, %v487_v24  ;;  %v646_v12 = vsel %vm5808_vm8, %v638_v11, %v645_v32  ;;  %v979_v49 = vld [vmem:[#allocation2 + $0x74] sm:$0x1]  ;;  %1836 = vmatpush1.bf16.msra.mxu0 %v5378_v21  ;;  %v413_v11 = vld [vmem:[%s5764_s21 + $0xc0] sm:$0xff] }
  0x3e   : > { %v938_v40 = vsel %vm5722_vm2, %v647_v33, %v937_v16  ;;  %v744_v41 = vrot.slane %v742_v34, 7  ;;  %v745_v42 = vshll.u32 %v5260_v20, 16  ;;  %v1340_v48 = vshll.u32 %v5358_v36, 16  ;;  %936 = vst.msk [vmem:[#allocation2 + $0x28] sm:$0xf] %vm278_vm5, %v646_v12  ;;  %1837 = vmatprep.subr.bf16.mxu0 %v5626_v10 }
  0x3f   : > { %v1333_v46 = vshrl.u32 %v5909_v35, 16  ;;  %v1335_v47 = vshll.u32 %v5909_v35, 16  ;;  %939 = vst [vmem:[#allocation2 + $0x2c] sm:$0x1] %v938_v40  ;;  %v739_v13 = vor.u32 %v737_v28, %v736_v37  ;;  %v350_v50 = vld [vmem:[#allocation2 + $0x38] sm:$0x1]  ;;  %v5264_v55 = vpack.c.bf16 %v488_v38, %v488_v38 }
  0x40   : > { %1474 = vrot.lane.b32.xlu0 %v1319_v25, %s5627_s22  ;;  %v740_v52 = vrot.slane %v736_v37, 4  ;;  %v747_v53 = vor.u32 %v745_v42, %v744_v41  ;;  %v749_v54 = vrot.slane %v744_v41, 4  ;;  %v327_v56 = vld [vmem:[#allocation2 + $0x9c] sm:$0x1]  ;;  %v1342_v58 = vrot.slane %v1340_v48, 1  ;;  %v414_v40 = vld [vmem:[%s5764_s21 + $0xc8] sm:$0xff] }
  0x41   : > { %v1337_v57 = vrot.slane %v1335_v47, 1  ;;  %v976_v60 = vsel %vm5802_vm7, %v739_v13, %v975_v43  ;;  %v768_v61 = vshrl.u32 %v5263_v39, 16  ;;  %v771_v3 = vshll.u32 %v5263_v39, 16  ;;  %v989_v8 = vld [vmem:[#allocation2 + $0x84] sm:$0xf]  ;;  %1838 = vmatpush1.bf16.msra.mxu0 %v5381_v51 }
  0x42   : > { %v748_v1 = vsel %vm5808_vm8, %v740_v52, %v747_v53  ;;  %977 = vst [vmem:[#allocation2 + $0x6c] sm:$0xf] %v976_v60  ;;  %v980_v2 = vsel %vm5722_vm2, %v749_v54, %v979_v49  ;;  %v776_v5 = vshrl.u32 %v5264_v55, 16  ;;  %v377_v9 = vld [vmem:[#allocation2 + $0xa4] sm:$0x1]  ;;  %v779_v19 = vshll.u32 %v5264_v55, 16  ;;  %1839 = vmatprep.subr.bf16.mxu0 %v5626_v10 }
  0x43   : > { %v1338_v16 = vor.u32 %v1337_v57, %v1333_v46  ;;  %v1037_v17 = vld [vmem:[#allocation2 + $0x24] sm:$0xf]  ;;  %978 = vst.msk [vmem:[#allocation2 + $0x70] sm:$0xf] %vm278_vm5, %v748_v1  ;;  %981 = vst [vmem:[#allocation2 + $0x74] sm:$0x1] %v980_v2  ;;  %v473_v28 = vadd.f32 %v5745_v7, %v5863_v14  ;;  %v474_v36 = vadd.f32 %v5745_v7, %v435_v27 }
  0x44   : > { %v770_v18 = vrot.slane %v768_v61, 7  ;;  %v993_v20 = vld [vmem:[#allocation2 + $0x8c] sm:$0x1]  ;;  %v301_v22 = vsel %vm5722_vm2, 0, %v300_v45  ;;  %v778_v21 = vrot.slane %v776_v5, 7  ;;  %v351_v26 = vsel %vm5731_vm4, 0, %v350_v50 }
  0x45   : > { %302 = vst [vmem:[#allocation2 + $0x30] sm:$0x1] %v301_v22  ;;  %v1343_v24 = vsel %vm1247_vm9, %v1338_v16, %v1342_v58  ;;  %352 = vst [vmem:[#allocation2 + $0x38] sm:$0x1] %v351_v26  ;;  %v328_v31 = vsel %vm5722_vm2, 0, %v327_v56  ;;  %v5249_v14 = vpack.c.bf16 %v473_v28, %v473_v28  ;;  %v378_v12 = vsel %vm5731_vm4, 0, %v377_v9  ;;  %1840 = vmatpush1.bf16.msra.mxu0 %v5382_v23 }
  0x46   : > { %v773_v25 = vor.u32 %v771_v3, %v770_v18  ;;  %v774_v29 = vrot.slane %v770_v18, 4  ;;  %1478 = vrot.lane.b32.xlu0 %v1343_v24, %s5627_s22  ;;  %v1038_v32 = vld [vmem:[#allocation2 + $0x28] sm:$0xf]  ;;  %v781_v33 = vor.u32 %v779_v19, %v778_v21  ;;  %v783_v34 = vrot.slane %v778_v21, 4  ;;  %329 = vst [vmem:[#allocation2 + $0x9c] sm:$0x1] %v328_v31  ;;  %1841 = vmatprep.subr.bf16.mxu0 %v5626_v10 }
  0x47   : > { %v5951_v37 = vcombine.low %v1037_v17, %v1038_v32  ;;  %v5360_v38 = vld [vmem:[#allocation2 + $0x2c] ss:$0 sps:$4 sm:$0x11]   ;;  %v452_v41 = vmul.f32 %v5740_v6, %v413_v11  ;;  %v5250_v45 = vpack.c.bf16 %v474_v36, %v474_v36  ;;  %v649_v46 = vshrl.u32 %v5249_v14, 16  ;;  %379 = vst [vmem:[#allocation2 + $0xa4] sm:$0x1] %v378_v12 }
  0x48   : > { %v990_v39 = vsel %vm5802_vm7, %v773_v25, %v989_v8  ;;  %v782_v42 = vsel %vm5808_vm8, %v774_v29, %v781_v33  ;;  %v994_v43 = vsel %vm5722_vm2, %v783_v34, %v993_v20  ;;  %v5383_v47 = vld [vmem:[%s7864_s3 + $0x80] sm:$0xff]   ;;  %v1292_v49 = vshll.u32 %v5360_v38, 16  ;;  %v5384_v9 = vld [vmem:[%s7864_s3 + $0x88] sm:$0xff]   ;;  %v333_v20 = vld [vmem:[#allocation2 + $0xb4] sm:$0x1] }
  0x49   : > { %991 = vst [vmem:[#allocation2 + $0x84] sm:$0xf] %v990_v39  ;;  %v1285_v48 = vshrl.u32 %v5951_v37, 16  ;;  %v1287_v13 = vshll.u32 %v5951_v37, 16  ;;  %v1049_v50 = vld [vmem:[#allocation2 + $0x6c] sm:$0xf]  ;;  %v453_v55 = vmul.f32 %v5740_v6, %v414_v40  ;;  %v491_v56 = vadd.f32 %v5745_v7, %v452_v41  ;;  %1842 = vmatpush1.bf16.msra.mxu0 %v5383_v47 }
  0x4a   : > { %992 = vst.msk [vmem:[#allocation2 + $0x88] sm:$0xf] %vm278_vm5, %v782_v42  ;;  %995 = vst [vmem:[#allocation2 + $0x8c] sm:$0x1] %v994_v43  ;;  %v652_v51 = vshll.u32 %v5249_v14, 16  ;;  %v651_v53 = vrot.slane %v649_v46, 7  ;;  %1843 = vmatprep.subr.bf16.mxu0 %v5626_v10 }
  0x4b   : > { %v1050_v52 = vld [vmem:[#allocation2 + $0x70] sm:$0xf]  ;;  %v657_v54 = vshrl.u32 %v5250_v45, 16  ;;  %v1289_v57 = vrot.slane %v1287_v13, 1  ;;  %v1294_v58 = vrot.slane %v1292_v49, 1  ;;  %v660_v62 = vshll.u32 %v5250_v45, 16 }
  0x4c   : > { %v5972_v60 = vcombine.low %v1049_v50, %v1050_v52  ;;  %v5362_v61 = vld [vmem:[#allocation2 + $0x74] ss:$0 sps:$4 sm:$0x11]   ;;  %v654_v1 = vor.u32 %v652_v51, %v651_v53  ;;  %v655_v2 = vrot.slane %v651_v53, 4  ;;  %v940_v5 = vld [vmem:[#allocation2 + $0x30] sm:$0xf]  ;;  %v492_v8 = vadd.f32 %v5745_v7, %v453_v55 }
  0x4d   : > { %v659_v3 = vrot.slane %v657_v54, 7  ;;  %v1290_v11 = vor.u32 %v1289_v57, %v1285_v48  ;;  %v1364_v18 = vshll.u32 %v5362_v61, 16  ;;  %v944_v19 = vld [vmem:[#allocation2 + $0x38] sm:$0x1]  ;;  %v383_v22 = vld [vmem:[#allocation2 + $0xbc] sm:$0x1]  ;;  %v5267_v27 = vpack.c.bf16 %v491_v56, %v491_v56  ;;  %1844 = vmatpush1.bf16.msra.mxu0 %v5384_v9 }
  0x4e   : > { %v1357_v16 = vshrl.u32 %v5972_v60, 16  ;;  %v1359_v17 = vshll.u32 %v5972_v60, 16  ;;  %v941_v26 = vsel %vm5802_vm7, %v654_v1, %v940_v5  ;;  %v5268_v31 = vpack.c.bf16 %v492_v8, %v492_v8  ;;  %v417_v32 = vld [vmem:[%s5764_s21 + $0xe0] sm:$0xff]  ;;  %v5387_v33 = vld [vmem:[%s7864_s3 + $0x90] sm:$0xff]   ;;  %v1003_v47 = vld [vmem:[#allocation2 + $0x9c] sm:$0xf]  ;;  %1845 = vmatprep.subr.bf16.mxu0 %v5626_v10 }
  0x4f   : > { %v662_v23 = vor.u32 %v660_v62, %v659_v3  ;;  %v664_v21 = vrot.slane %v659_v3, 4  ;;  %v1295_v28 = vsel %vm1247_vm9, %v1290_v11, %v1294_v58  ;;  %v1366_v25 = vrot.slane %v1364_v18, 1  ;;  %942 = vst [vmem:[#allocation2 + $0x30] sm:$0xf] %v941_v26  ;;  %v1031_v12 = vld [vmem:[#allocation2] sm:$0xf] }
  0x50   : > { %v1361_v24 = vrot.slane %v1359_v17, 1  ;;  %v1053_v29 = vld [vmem:[#allocation2 + $0x84] sm:$0xf]  ;;  %1470 = vrot.lane.b32.xlu1 %v1295_v28, %s5627_s22  ;;  %v802_v38 = vshrl.u32 %v5267_v27, 16  ;;  %v805_v39 = vshll.u32 %v5267_v27, 16  ;;  %v810_v45 = vshrl.u32 %v5268_v31, 16 }
  0x51   : > { %v1054_v34 = vld [vmem:[#allocation2 + $0x88] sm:$0xf]  ;;  %v663_v36 = vsel %vm5808_vm8, %v655_v2, %v662_v23  ;;  %v945_v14 = vsel %vm5722_vm2, %v664_v21, %v944_v19  ;;  %v5993_v40 = vld [vmem:[#allocation2 + $0x4] sm:$0xf]  ;;  %v813_v46 = vshll.u32 %v5268_v31, 16  ;;  %v334_v49 = vsel %vm5722_vm2, 0, %v333_v20  ;;  %1846 = vmatpush1.bf16.msra.mxu0 %v5387_v33 }
  0x52   : > { %v1362_v41 = vor.u32 %v1361_v24, %v1357_v16  ;;  %v5995_v42 = vcombine.low %v1053_v29, %v1054_v34  ;;  %v5364_v43 = vld [vmem:[#allocation2 + $0x8c] ss:$0 sps:$4 sm:$0x11]   ;;  %943 = vst.msk [vmem:[#allocation2 + $0x34] sm:$0xf] %vm278_vm5, %v663_v36  ;;  %v804_v13 = vrot.slane %v802_v38, 7  ;;  %v456_v51 = vmul.f32 %v5740_v6, %v417_v32  ;;  %1847 = vmatprep.subr.bf16.mxu0 %v5626_v10 }
  0x53   : > { %946 = vst [vmem:[#allocation2 + $0x38] sm:$0x1] %v945_v14  ;;  %v418_v48 = vld [vmem:[%s5764_s21 + $0xe8] sm:$0xff]  ;;  %v384_v50 = vsel %vm5731_vm4, 0, %v383_v22  ;;  %v5390_v53 = vld [vmem:[%s7864_s3] sm:$0xff]   ;;  %v1388_v57 = vshll.u32 %v5364_v43, 16  ;;  %v6020_v11 = vcombine.low %v1031_v12, %v5993_v40 }
  0x54   : > { %v6005_v52 = vld [vmem:[#allocation2 + $0x8] ss:$0 sps:$4 sm:$0x11]   ;;  %v1367_v54 = vsel %vm1247_vm9, %v1362_v41, %v1366_v25  ;;  %v1381_v55 = vshrl.u32 %v5995_v42, 16  ;;  %v1383_v56 = vshll.u32 %v5995_v42, 16  ;;  %v5388_v61 = vld [vmem:[%s7864_s3 + $0x98] sm:$0xff]   ;;  %v807_v62 = vor.u32 %v805_v39, %v804_v13  ;;  %2070 = vmatpush1.bf16.msra.mxu1 %v5390_v53 }
  0x55   : > { %v1007_v58 = vld [vmem:[#allocation2 + $0xa4] sm:$0x1]  ;;  %335 = vst [vmem:[#allocation2 + $0xb4] sm:$0x1] %v334_v49  ;;  %385 = vst [vmem:[#allocation2 + $0xbc] sm:$0x1] %v384_v50  ;;  %1482 = vrot.lane.b32.xlu0 %v1367_v54, %s5627_s22  ;;  %v457_v3 = vmul.f32 %v5740_v6, %v418_v48  ;;  %v495_v9 = vadd.f32 %v5745_v7, %v456_v51  ;;  %2071 = vmatprep.subr.bf16.mxu1 %v5626_v10 }
  0x56   : > { %v808_v1 = vrot.slane %v804_v13, 4  ;;  %v812_v2 = vrot.slane %v810_v45, 7  ;;  %v1385_v5 = vrot.slane %v1383_v56, 1  ;;  %v1390_v8 = vrot.slane %v1388_v57, 1  ;;  %v1039_v16 = vld [vmem:[#allocation2 + $0x30] sm:$0xf]  ;;  %1848 = vmatpush1.bf16.msra.mxu0 %v5388_v61 }
  0x57   : > { %v1004_v19 = vsel %vm5802_vm7, %v807_v62, %v1003_v47  ;;  %v496_v20 = vadd.f32 %v5745_v7, %v457_v3  ;;  %v5271_v23 = vpack.c.bf16 %v495_v9, %v495_v9  ;;  %v1249_v21 = vshrl.u32 %v6020_v11, 16  ;;  %v306_v27 = vld [vmem:[#allocation2 + $0x48] sm:$0x1]  ;;  %v399_v28 = vld [vmem:[%s5764_s21 + $0x50] sm:$0xff]  ;;  %v400_v24 = vld [vmem:[%s5764_s21 + $0x58] sm:$0xff]  ;;  %1849 = vmatprep.subr.bf16.mxu0 %v5626_v10 }
  0x58   : > { %v815_v17 = vor.u32 %v813_v46, %v812_v2  ;;  %v817_v18 = vrot.slane %v812_v2, 4  ;;  %v1386_v22 = vor.u32 %v1385_v5, %v1381_v55  ;;  %1005 = vst [vmem:[#allocation2 + $0x9c] sm:$0xf] %v1004_v19  ;;  %v1251_v26 = vshll.u32 %v6020_v11, 16  ;;  %v5389_v33 = vld [vmem:[%s7864_s3 + $0xa0] sm:$0xff]   ;;  %v5394_v41 = vld [vmem:[%s7864_s3 + $0x8] sm:$0xff]  }
  0x59   : > { %v1040_v25 = vld [vmem:[#allocation2 + $0x34] sm:$0xf]  ;;  %v5272_v7 = vpack.c.bf16 %v496_v20, %v496_v20  ;;  %v1256_v32 = vshll.u32 %v6005_v52, 16  ;;  %v836_v38 = vshrl.u32 %v5271_v23, 16  ;;  %v839_v39 = vshll.u32 %v5271_v23, 16  ;;  %v5391_v13 = vld [vmem:[%s7864_s3 + $0xa8] sm:$0xff]   ;;  %2072 = vmatpush1.bf16.msra.mxu1 %v5394_v41 }
  0x5a   : > { %v816_v29 = vsel %vm5808_vm8, %v808_v1, %v815_v17  ;;  %v1008_v31 = vsel %vm5722_vm2, %v817_v18, %v1007_v58  ;;  %v1391_v34 = vsel %vm1247_vm9, %v1386_v22, %v1390_v8  ;;  %v6040_v36 = vcombine.low %v1039_v16, %v1040_v25  ;;  %v5366_v14 = vld [vmem:[#allocation2 + $0x38] ss:$0 sps:$4 sm:$0x11]   ;;  %v356_v12 = vld [vmem:[#allocation2 + $0x50] sm:$0x1]  ;;  %1850 = vmatpush1.bf16.msra.mxu0 %v5389_v33 }
  0x5b   : > { %1006 = vst.msk [vmem:[#allocation2 + $0xa0] sm:$0xf] %vm278_vm5, %v816_v29  ;;  %1009 = vst [vmem:[#allocation2 + $0xa4] sm:$0x1] %v1008_v31  ;;  %1486 = vrot.lane.b32.xlu0 %v1391_v34, %s5627_s22  ;;  %v844_v43 = vshrl.u32 %v5272_v7, 16  ;;  %v847_v45 = vshll.u32 %v5272_v7, 16  ;;  %v438_v47 = vmul.f32 %v5740_v6, %v399_v28  ;;  %v439_v48 = vmul.f32 %v5740_v6, %v400_v24 }
  0x5c   : > { %v1017_v46 = vld [vmem:[#allocation2 + $0xb4] sm:$0xf]  ;;  %v1297_v49 = vshrl.u32 %v6040_v36, 16  ;;  %v1299_v50 = vshll.u32 %v6040_v36, 16  ;;  %v1304_v51 = vshll.u32 %v5366_v14, 16  ;;  %v838_v53 = vrot.slane %v836_v38, 7  ;;  %2073 = vmatprep.subr.bf16.mxu1 %v5626_v10  ;;  %1851 = vmatprep.subr.bf16.mxu0 %v5626_v10 }
  0x5d   : > { %v1021_v54 = vld [vmem:[#allocation2 + $0xbc] sm:$0x1]  ;;  %v312_v55 = vld [vmem:[#allocation2 + $0x60] sm:$0x1]  ;;  %v846_v56 = vrot.slane %v844_v43, 7  ;;  %v1253_v57 = vrot.slane %v1251_v26, 1 }
  0x5e   : > { %v1258_v58 = vrot.slane %v1256_v32, 1  ;;  %v307_v6 = vsel %vm5722_vm2, 0, %v306_v27  ;;  %v1301_v61 = vrot.slane %v1299_v50, 1  ;;  %v1306_v62 = vrot.slane %v1304_v51, 1  ;;  %v362_v3 = vld [vmem:[#allocation2 + $0x68] sm:$0x1]  ;;  %1852 = vmatpush1.bf16.msra.mxu0 %v5391_v13 }
  0x5f   : > { %v841_v1 = vor.u32 %v839_v39, %v838_v53  ;;  %v842_v2 = vrot.slane %v838_v53, 4  ;;  %308 = vst [vmem:[#allocation2 + $0x48] sm:$0x1] %v307_v6  ;;  %v403_v5 = vld [vmem:[%s5764_s21 + $0x70] sm:$0xff]  ;;  %v404_v8 = vld [vmem:[%s5764_s21 + $0x78] sm:$0xff]  ;;  %v849_v17 = vor.u32 %v847_v45, %v846_v56  ;;  %v851_v18 = vrot.slane %v846_v56, 4  ;;  %1853 = vmatprep.subr.bf16.mxu0 %v5626_v10 }
  0x60   : > { %v318_v9 = vld [vmem:[#allocation2 + $0x78] sm:$0x1]  ;;  %v1057_v16 = vld [vmem:[#allocation2 + $0x9c] sm:$0xf]  ;;  %v1254_v19 = vor.u32 %v1253_v57, %v1249_v21  ;;  %v357_v20 = vsel %vm5731_vm4, 0, %v356_v12  ;;  %v5395_v22 = vld [vmem:[%s7864_s3 + $0xb0] sm:$0xff]   ;;  %v1302_v23 = vor.u32 %v1301_v61, %v1297_v49 }
  0x61   : > { %v1018_v26 = vsel %vm5802_vm7, %v841_v1, %v1017_v46  ;;  %358 = vst [vmem:[#allocation2 + $0x50] sm:$0x1] %v357_v20  ;;  %v6071_v27 = vld [vmem:[%s7863_s2] ss:$0 sm:$0xff]  ;;  %v850_v25 = vsel %vm5808_vm8, %v842_v2, %v849_v17  ;;  %v1022_v29 = vsel %vm5722_vm2, %v851_v18, %v1021_v54  ;;  %v313_v7 = vsel %vm5722_vm2, 0, %v312_v55  ;;  %v5396_v32 = vld [vmem:[%s7864_s3 + $0x10] sm:$0xff]  }
  0x62   : > { %v477_v28 = vadd.f32 %v6071_v27, %v438_v47  ;;  %v478_v21 = vadd.f32 %v6071_v27, %v439_v48  ;;  %v1058_v24 = vld [vmem:[#allocation2 + $0xa0] sm:$0xf]  ;;  %1019 = vst [vmem:[#allocation2 + $0xb4] sm:$0xf] %v1018_v26  ;;  %v6080_v31 = vsel %vm1247_vm9, %v1254_v19, %v1258_v58  ;;  %v1307_v33 = vsel %vm1247_vm9, %v1302_v23, %v1306_v62  ;;  %v407_v41 = vld [vmem:[%s5764_s21 + $0x90] sm:$0xff]  ;;  %v5397_v57 = vld [vmem:[%s7864_s3 + $0xb8] sm:$0xff]  }
  0x63   : > { %v6088_v34 = vcombine.low %v1057_v16, %v1058_v24  ;;  %v5368_v14 = vld [vmem:[#allocation2 + $0xa4] ss:$0 sps:$4 sm:$0x11]   ;;  %1020 = vst.msk [vmem:[#allocation2 + $0xb8] sm:$0xf] %vm278_vm5, %v850_v25  ;;  %1472 = vrot.lane.b32.xlu1 %v1307_v33, %s5627_s22  ;;  %v363_v43 = vsel %vm5731_vm4, 0, %v362_v3  ;;  %2074 = vmatpush1.bf16.msra.mxu1 %v5396_v32 }
  0x64   : > { %1023 = vst [vmem:[#allocation2 + $0xbc] sm:$0x1] %v1022_v29  ;;  %v5253_v38 = vpack.c.bf16 %v477_v28, %v477_v28  ;;  %v5254_v39 = vpack.c.bf16 %v478_v21, %v478_v21  ;;  %314 = vst [vmem:[#allocation2 + $0x60] sm:$0x1] %v313_v7  ;;  %v368_v12 = vld [vmem:[#allocation2 + $0x80] sm:$0x1]  ;;  %2075 = vmatprep.subr.bf16.mxu1 %v5626_v10  ;;  %1854 = vmatpush1.bf16.msra.mxu0 %v5395_v22 }
  0x65   : > { %v6099_v45 = vld [vmem:[%s7862_s1] ss:$0 sm:$0xff]  ;;  %v319_v48 = vsel %vm5722_vm2, 0, %v318_v9  ;;  %v1405_v13 = vshrl.u32 %v6088_v34, 16  ;;  %v1407_v49 = vshll.u32 %v6088_v34, 16  ;;  %v1412_v50 = vshll.u32 %v5368_v14, 16  ;;  %1855 = vmatprep.subr.bf16.mxu0 %v5626_v10 }
  0x66   : > { %v442_v46 = vmul.f32 %v6099_v45, %v403_v5  ;;  %v443_v47 = vmul.f32 %v6099_v45, %v404_v8  ;;  %v683_v51 = vshrl.u32 %v5253_v38, 16  ;;  %364 = vst [vmem:[#allocation2 + $0x68] sm:$0x1] %v363_v43  ;;  %320 = vst [vmem:[#allocation2 + $0x78] sm:$0x1] %v319_v48  ;;  %v686_v53 = vshll.u32 %v5253_v38, 16 }
  0x67   : > { %v691_v54 = vshrl.u32 %v5254_v39, 16  ;;  %v694_v55 = vshll.u32 %v5254_v39, 16  ;;  %v5398_v58 = vld [vmem:[%s7864_s3 + $0x18] sm:$0xff]   ;;  %v1409_v6 = vrot.slane %v1407_v49, 1  ;;  %v1414_v61 = vrot.slane %v1412_v50, 1  ;;  %v5400_v26 = vld [vmem:[%s7864_s3 + $0x20] sm:$0xff]  }
  0x68   : > { %v481_v56 = vadd.f32 %v6071_v27, %v442_v46  ;;  %v685_v62 = vrot.slane %v683_v51, 7  ;;  %v954_v1 = vld [vmem:[#allocation2 + $0x48] sm:$0xf]  ;;  %v482_v2 = vadd.f32 %v6071_v27, %v443_v47  ;;  %v408_v3 = vld [vmem:[%s5764_s21 + $0x98] sm:$0xff]  ;;  %v958_v8 = vld [vmem:[#allocation2 + $0x50] sm:$0x1]  ;;  %v446_v17 = vmul.f32 %v6099_v45, %v407_v41  ;;  %2076 = vmatpush1.bf16.msra.mxu1 %v5398_v58  ;;  %1856 = vmatpush1.bf16.msra.mxu0 %v5397_v57 }
  0x69   : > { %v693_v5 = vrot.slane %v691_v54, 7  ;;  %v369_v16 = vsel %vm5731_vm4, 0, %v368_v12  ;;  %v1410_v18 = vor.u32 %v1409_v6, %v1405_v13  ;;  %v1061_v19 = vld [vmem:[#allocation2 + $0xb4] sm:$0xf]  ;;  %2077 = vmatprep.subr.bf16.mxu1 %v5626_v10  ;;  %v447_v29 = vmul.f32 %v6099_v45, %v408_v3  ;;  %v324_v39 = vld [vmem:[#allocation2 + $0x90] sm:$0x1]  ;;  %2330 = vmatprep.subr.bf16.mxu0 %v5626_v10 }
  0x6a   : > { %v5257_v9 = vpack.c.bf16 %v481_v56, %v481_v56  ;;  %v688_v20 = vor.u32 %v686_v53, %v685_v62  ;;  %v689_v22 = vrot.slane %v685_v62, 4  ;;  %v5258_v23 = vpack.c.bf16 %v482_v2, %v482_v2  ;;  %370 = vst [vmem:[#allocation2 + $0x80] sm:$0x1] %v369_v16  ;;  %v1062_v28 = vld [vmem:[#allocation2 + $0xb8] sm:$0xf]  ;;  %v411_v57 = vld [vmem:[%s5764_s21 + $0xb0] sm:$0xff] }
  0x6b   : > { %v696_v21 = vor.u32 %v694_v55, %v693_v5  ;;  %v698_v24 = vrot.slane %v693_v5, 4  ;;  %v1415_v7 = vsel %vm1247_vm9, %v1410_v18, %v1414_v61  ;;  %v6127_v32 = vcombine.low %v1061_v19, %v1062_v28  ;;  %v5370_v33 = vld [vmem:[#allocation2 + $0xbc] ss:$0 sps:$4 sm:$0x11]   ;;  %v968_v47 = vld [vmem:[#allocation2 + $0x60] sm:$0xf] }
  0x6c   : > { %v717_v25 = vshrl.u32 %v5257_v9, 16  ;;  %v955_v14 = vsel %vm5802_vm7, %v688_v20, %v954_v1  ;;  %v720_v38 = vshll.u32 %v5257_v9, 16  ;;  %1490 = vrot.lane.b32.xlu0 %v1415_v7, %s5627_s22  ;;  %v725_v46 = vshrl.u32 %v5258_v23, 16  ;;  %v374_v48 = vld [vmem:[#allocation2 + $0x98] sm:$0x1]  ;;  %2078 = vmatpush1.bf16.msra.mxu1 %v5400_v26  ;;  %v415_v18 = vld [vmem:[%s5764_s21 + $0xd0] sm:$0xff] }
  0x6d   : > { %v697_v12 = vsel %vm5808_vm8, %v689_v22, %v696_v21  ;;  %956 = vst [vmem:[#allocation2 + $0x48] sm:$0xf] %v955_v14  ;;  %v959_v41 = vsel %vm5722_vm2, %v698_v24, %v958_v8  ;;  %v1429_v13 = vshrl.u32 %v6127_v32, 16  ;;  %v1431_v49 = vshll.u32 %v6127_v32, 16  ;;  %2079 = vmatprep.subr.bf16.mxu1 %v5626_v10  ;;  %v972_v61 = vld [vmem:[#allocation2 + $0x68] sm:$0x1] }
  0x6e   : > { %v719_v43 = vrot.slane %v717_v25, 7  ;;  %v1436_v50 = vshll.u32 %v5370_v33, 16  ;;  %957 = vst.msk [vmem:[#allocation2 + $0x4c] sm:$0xf] %vm278_vm5, %v697_v12  ;;  %960 = vst [vmem:[#allocation2 + $0x50] sm:$0x1] %v959_v41  ;;  %v485_v56 = vadd.f32 %v6071_v27, %v446_v17  ;;  %v486_v62 = vadd.f32 %v6071_v27, %v447_v29 }
  0x6f   : > { %v728_v51 = vshll.u32 %v5258_v23, 16  ;;  %v727_v55 = vrot.slane %v725_v46, 7  ;;  %v1433_v58 = vrot.slane %v1431_v49, 1  ;;  %v325_v1 = vsel %vm5722_vm2, 0, %v324_v39  ;;  %v412_v2 = vld [vmem:[%s5764_s21 + $0xb8] sm:$0xff]  ;;  %v5403_v26 = vld [vmem:[%s7864_s3 + $0x28] sm:$0xff]  }
  0x70   : > { %v722_v53 = vor.u32 %v720_v38, %v719_v43  ;;  %v723_v54 = vrot.slane %v719_v43, 4  ;;  %v1438_v6 = vrot.slane %v1436_v50, 1  ;;  %v5261_v9 = vpack.c.bf16 %v485_v56, %v485_v56  ;;  %326 = vst [vmem:[#allocation2 + $0x90] sm:$0x1] %v325_v1  ;;  %v330_v16 = vld [vmem:[#allocation2 + $0xa8] sm:$0x1]  ;;  %2080 = vmatpush1.bf16.msra.mxu1 %v5403_v26 }
  0x71   : > { %v730_v3 = vor.u32 %v728_v51, %v727_v55  ;;  %v732_v5 = vrot.slane %v727_v55, 4  ;;  %v1434_v17 = vor.u32 %v1433_v58, %v1429_v13  ;;  %v5262_v19 = vpack.c.bf16 %v486_v62, %v486_v62  ;;  %v380_v23 = vld [vmem:[#allocation2 + $0xb0] sm:$0x1]  ;;  %v982_v38 = vld [vmem:[#allocation2 + $0x78] sm:$0xf]  ;;  %2081 = vmatprep.subr.bf16.mxu1 %v5626_v10 }
  0x72   : > { %v969_v8 = vsel %vm5802_vm7, %v722_v53, %v968_v47  ;;  %v375_v20 = vsel %vm5731_vm4, 0, %v374_v48  ;;  %v450_v22 = vmul.f32 %v6099_v45, %v411_v57  ;;  %v751_v24 = vshrl.u32 %v5261_v9, 16  ;;  %v416_v12 = vld [vmem:[%s5764_s21 + $0xd8] sm:$0xff]  ;;  %v5404_v41 = vld [vmem:[%s7864_s3 + $0x30] sm:$0xff]  }
  0x73   : > { %970 = vst [vmem:[#allocation2 + $0x60] sm:$0xf] %v969_v8  ;;  %v731_v28 = vsel %vm5808_vm8, %v723_v54, %v730_v3  ;;  %v973_v21 = vsel %vm5722_vm2, %v732_v5, %v972_v61  ;;  %v754_v25 = vshll.u32 %v5261_v9, 16  ;;  %376 = vst [vmem:[#allocation2 + $0x98] sm:$0x1] %v375_v20  ;;  %v1439_v29 = vsel %vm1247_vm9, %v1434_v17, %v1438_v6  ;;  %v5406_v3 = vld [vmem:[%s7864_s3 + $0x38] sm:$0xff]  }
  0x74   : > { %v1043_v7 = vld [vmem:[#allocation2 + $0x48] sm:$0xf]  ;;  %971 = vst.msk [vmem:[#allocation2 + $0x64] sm:$0xf] %vm278_vm5, %v731_v28  ;;  %974 = vst [vmem:[#allocation2 + $0x68] sm:$0x1] %v973_v21  ;;  %v451_v39 = vmul.f32 %v6099_v45, %v412_v2  ;;  %1494 = vrot.lane.b32.xlu0 %v1439_v29, %s5627_s22  ;;  %v489_v47 = vadd.f32 %v6071_v27, %v450_v22  ;;  %v454_v13 = vmul.f32 %v6099_v45, %v415_v18 }
  0x75   : > { %v759_v33 = vshrl.u32 %v5262_v19, 16  ;;  %v762_v14 = vshll.u32 %v5262_v19, 16  ;;  %v6168_v43 = vld [vmem:[#allocation2 + $0x4c] sm:$0xf]  ;;  %v753_v46 = vrot.slane %v751_v24, 7  ;;  %v331_v48 = vsel %vm5722_vm2, 0, %v330_v16  ;;  %2082 = vmatpush1.bf16.msra.mxu1 %v5404_v41 }
  0x76   : > { %v6176_v49 = vcombine.low %v1043_v7, %v6168_v43  ;;  %v6178_v50 = vld [vmem:[#allocation2 + $0x50] ss:$0 sps:$4 sm:$0x11]   ;;  %v490_v53 = vadd.f32 %v6071_v27, %v451_v39  ;;  %332 = vst [vmem:[#allocation2 + $0xa8] sm:$0x1] %v331_v48  ;;  %v381_v54 = vsel %vm5731_vm4, 0, %v380_v23  ;;  %v5265_v57 = vpack.c.bf16 %v489_v47, %v489_v47  ;;  %2083 = vmatprep.subr.bf16.mxu1 %v5626_v10 }
  0x77   : > { %v761_v51 = vrot.slane %v759_v33, 7  ;;  %v756_v55 = vor.u32 %v754_v25, %v753_v46  ;;  %v757_v56 = vrot.slane %v753_v46, 4  ;;  %382 = vst [vmem:[#allocation2 + $0xb0] sm:$0x1] %v381_v54  ;;  %v455_v58 = vmul.f32 %v6099_v45, %v416_v12  ;;  %v986_v2 = vld [vmem:[#allocation2 + $0x80] sm:$0x1] }
  0x78   : > { %v1321_v6 = vshrl.u32 %v6176_v49, 16  ;;  %v1323_v61 = vshll.u32 %v6176_v49, 16  ;;  %v1328_v62 = vshll.u32 %v6178_v50, 16  ;;  %1464 = vrot.lane.b32.xlu0 %v6080_v31, %s5627_s22  ;;  %v5266_v16 = vpack.c.bf16 %v490_v53, %v490_v53  ;;  %v996_v23 = vld [vmem:[#allocation2 + $0x90] sm:$0xf]  ;;  %v5407_v31 = vld [vmem:[%s7864_s3 + $0x40] sm:$0xff]  }
  0x79   : > { %v764_v1 = vor.u32 %v762_v14, %v761_v51  ;;  %v766_v8 = vrot.slane %v761_v51, 4  ;;  %v983_v9 = vsel %vm5802_vm7, %v756_v55, %v982_v38  ;;  %v785_v18 = vshrl.u32 %v5265_v57, 16  ;;  %2084 = vmatpush1.bf16.msra.mxu1 %v5406_v3  ;;  %v1086_v47 = vld [vmem:[#allocation2 + $0xc] sm:$0xe]  ;;  %v419_v55 = vld [vmem:[%s5764_s21 + $0xf0] sm:$0xff] }
  0x7a   : > { %v1047_v5 = vld [vmem:[#allocation2 + $0x60] sm:$0xf]  ;;  %v1325_v17 = vrot.slane %v1323_v61, 1  ;;  %v1330_v19 = vrot.slane %v1328_v62, 1  ;;  %984 = vst [vmem:[#allocation2 + $0x78] sm:$0xf] %v983_v9  ;;  %v493_v25 = vadd.f32 %v6071_v27, %v454_v13  ;;  %v494_v38 = vadd.f32 %v6071_v27, %v455_v58  ;;  %2085 = vmatprep.subr.bf16.mxu1 %v5626_v10 }
  0x7b   : > { %v765_v20 = vsel %vm5808_vm8, %v757_v56, %v764_v1  ;;  %v788_v22 = vshll.u32 %v5265_v57, 16  ;;  %v6200_v26 = vld [vmem:[#allocation2 + $0x64] sm:$0xf]  ;;  %v987_v28 = vsel %vm5722_vm2, %v766_v8, %v986_v2  ;;  %v787_v21 = vrot.slane %v785_v18, 7  ;;  %v1000_v54 = vld [vmem:[#allocation2 + $0x98] sm:$0x1] }
  0x7c   : > { %985 = vst.msk [vmem:[#allocation2 + $0x7c] sm:$0xf] %vm278_vm5, %v765_v20  ;;  %v793_v24 = vshrl.u32 %v5266_v16, 16  ;;  %v1326_v29 = vor.u32 %v1325_v17, %v1321_v6  ;;  %v6207_v7 = vcombine.low %v1047_v5, %v6200_v26  ;;  %v6209_v33 = vld [vmem:[#allocation2 + $0x68] ss:$0 sps:$4 sm:$0x11]   ;;  %v5269_v46 = vpack.c.bf16 %v493_v25, %v493_v25 }
  0x7d   : > { %988 = vst [vmem:[#allocation2 + $0x80] sm:$0x1] %v987_v28  ;;  %v796_v14 = vshll.u32 %v5266_v16, 16  ;;  %v790_v39 = vor.u32 %v788_v22, %v787_v21  ;;  %v791_v12 = vrot.slane %v787_v21, 4  ;;  %v1352_v53 = vshll.u32 %v6209_v33, 16  ;;  %v420_v56 = vld [vmem:[%s5764_s21 + $0xf8] sm:$0xff]  ;;  %2086 = vmatpush1.bf16.msra.mxu1 %v5407_v31 }
  0x7e   : > { %v795_v41 = vrot.slane %v793_v24, 7  ;;  %v1331_v48 = vsel %vm1247_vm9, %v1326_v29, %v1330_v19  ;;  %v1345_v13 = vshrl.u32 %v6207_v7, 16  ;;  %v1347_v51 = vshll.u32 %v6207_v7, 16  ;;  %v5408_v62 = vld [vmem:[%s7864_s3 + $0x48] sm:$0xff]   ;;  %2087 = vmatprep.subr.bf16.mxu1 %v5626_v10  ;;  %v5507_v31 = vld [vmem:[#allocation2 + $0x10] sm:$0xf] }
  0x7f   : > { %1476 = vrot.lane.b32.xlu1 %v1331_v48, %s5627_s22  ;;  %v997_v6 = vsel %vm5802_vm7, %v790_v39, %v996_v23  ;;  %v5270_v61 = vpack.c.bf16 %v494_v38, %v494_v38  ;;  %v1354_v2 = vrot.slane %v1352_v53, 1  ;;  %v819_v3 = vshrl.u32 %v5269_v46, 16  ;;  %v1010_v19 = vld [vmem:[#allocation2 + $0xa8] sm:$0xf]  ;;  %v336_v21 = vld [vmem:[#allocation2 + $0xc0] sm:$0x1] }
  0x80   : > { %v798_v57 = vor.u32 %v796_v14, %v795_v41  ;;  %v800_v58 = vrot.slane %v795_v41, 4  ;;  %v1349_v1 = vrot.slane %v1347_v51, 1  ;;  %998 = vst [vmem:[#allocation2 + $0x90] sm:$0xf] %v997_v6  ;;  %v822_v5 = vshll.u32 %v5269_v46, 16 }
  0x81   : > { %v1051_v8 = vld [vmem:[#allocation2 + $0x78] sm:$0xf]  ;;  %v827_v18 = vshrl.u32 %v5270_v61, 16  ;;  %v830_v17 = vshll.u32 %v5270_v61, 16  ;;  %v821_v23 = vrot.slane %v819_v3, 7  ;;  %v4868_v28 = vcombine.low %v1086_v47, %v5507_v31  ;;  %2088 = vmatpush1.bf16.msra.mxu1 %v5408_v62  ;;  %v5410_v47 = vld [vmem:[%s7864_s3 + $0x50] sm:$0xff]  }
  0x82   : > { %v799_v9 = vsel %vm5808_vm8, %v791_v12, %v798_v57  ;;  %v1001_v16 = vsel %vm5722_vm2, %v800_v58, %v1000_v54  ;;  %v1350_v20 = vor.u32 %v1349_v1, %v1345_v13  ;;  %v1014_v14 = vld [vmem:[#allocation2 + $0xb0] sm:$0x1]  ;;  %v386_v38 = vld [vmem:[#allocation2 + $0xc8] sm:$0x1]  ;;  %v458_v39 = vmul.f32 %v6099_v45, %v419_v55  ;;  %2089 = vmatprep.subr.bf16.mxu1 %v5626_v10 }
  0x83   : > { %v6230_v22 = vld [vmem:[#allocation2 + $0x7c] sm:$0xf]  ;;  %999 = vst.msk [vmem:[#allocation2 + $0x94] sm:$0xf] %vm278_vm5, %v799_v9  ;;  %1002 = vst [vmem:[#allocation2 + $0x98] sm:$0x1] %v1001_v16  ;;  %v459_v12 = vmul.f32 %v6099_v45, %v420_v56  ;;  %v824_v46 = vor.u32 %v822_v5, %v821_v23 }
  0x84   : > { %v6234_v24 = vcombine.low %v1051_v8, %v6230_v22  ;;  %v6236_v25 = vld [vmem:[#allocation2 + $0x80] ss:$0 sps:$4 sm:$0x11]   ;;  %v829_v29 = vrot.slane %v827_v18, 7  ;;  %v1355_v41 = vsel %vm1247_vm9, %v1350_v20, %v1354_v2  ;;  %v825_v48 = vrot.slane %v821_v23, 4  ;;  %v5411_v16 = vld [vmem:[%s7864_s3 + $0x58] sm:$0xff]  }
  0x85   : > { %v1558_v13 = vrot.slane %v4868_v28, 1  ;;  %1480 = vrot.lane.b32.xlu1 %v1355_v41, %s5627_s22  ;;  %v1376_v54 = vshll.u32 %v6236_v25, 16  ;;  %v1011_v56 = vsel %vm5802_vm7, %v824_v46, %v1010_v19  ;;  %v5508_v57 = vld [vmem:[#allocation2 + $0x14] ss:$0 sps:$4 sm:$0x11]   ;;  %v337_v2 = vsel %vm5722_vm2, 0, %v336_v21  ;;  %2090 = vmatpush1.bf16.msra.mxu1 %v5410_v47 }
  0x86   : > { %v1369_v51 = vshrl.u32 %v6234_v24, 16  ;;  %v1371_v53 = vshll.u32 %v6234_v24, 16  ;;  %v832_v55 = vor.u32 %v830_v17, %v829_v29  ;;  %v834_v45 = vrot.slane %v829_v29, 4  ;;  %1012 = vst [vmem:[#allocation2 + $0xa8] sm:$0xf] %v1011_v56  ;;  %2091 = vmatprep.subr.bf16.mxu1 %v5626_v10 }
  0x87   : > { %v1559_v58 = vrot.slane %v5508_v57, 1  ;;  %v1378_v61 = vrot.slane %v1376_v54, 1  ;;  %v1055_v62 = vld [vmem:[#allocation2 + $0x90] sm:$0xf]  ;;  %338 = vst [vmem:[#allocation2 + $0xc0] sm:$0x1] %v337_v2  ;;  %v497_v9 = vadd.f32 %v6071_v27, %v458_v39  ;;  %v498_v19 = vadd.f32 %v6071_v27, %v459_v12 }
  0x88   : > { %v1373_v6 = vrot.slane %v1371_v53, 1  ;;  %v833_v1 = vsel %vm5808_vm8, %v825_v48, %v832_v55  ;;  %v1015_v3 = vsel %vm5722_vm2, %v834_v45, %v1014_v14  ;;  %v387_v8 = vsel %vm5731_vm4, 0, %v386_v38  ;;  %v1085_v41 = vld [vmem:[#allocation2] sm:$0xe] }
  0x89   : > { %1013 = vst.msk [vmem:[#allocation2 + $0xac] sm:$0xf] %vm278_vm5, %v833_v1  ;;  %v6259_v5 = vsel %vm1554_vm10, %v1558_v13, %v1559_v58  ;;  %1016 = vst [vmem:[#allocation2 + $0xb0] sm:$0x1] %v1015_v3  ;;  %v5273_v23 = vpack.c.bf16 %v497_v9, %v497_v9  ;;  %v5274_v28 = vpack.c.bf16 %v498_v19, %v498_v19  ;;  %2092 = vmatpush1.bf16.msra.mxu1 %v5411_v16 }
  0x8a   : > { %v1374_v18 = vor.u32 %v1373_v6, %v1369_v51  ;;  %v6267_v17 = vld [vmem:[#allocation2 + $0x94] sm:$0xf]  ;;  %4921 = vmatprep.mubr.msk.bf16.mxu0 %vm1609_vm11, %v6259_v5  ;;  %388 = vst [vmem:[#allocation2 + $0xc8] sm:$0x1] %v387_v8  ;;  %3921 = vmatprep.subr.bf16.mxu1 %v5626_v10  ;;  %v4867_v1 = vcombine.low %v1085_v41, %v5993_v40 }
  0x8b   : > { %v6274_v4 = vcombine.low %v1055_v62, %v6267_v17  ;;  %v6276_v20 = vld [vmem:[#allocation2 + $0x98] ss:$0 sps:$4 sm:$0x11]   ;;  %v853_v27 = vshrl.u32 %v5273_v23, 16  ;;  %v856_v38 = vshll.u32 %v5273_v23, 16  ;;  %v861_v39 = vshrl.u32 %v5274_v28, 16 }
  0x8c   : > { %v1379_v31 = vsel %vm1247_vm9, %v1374_v18, %v1378_v61  ;;  %v1400_v14 = vshll.u32 %v6276_v20, 16  ;;  %v864_v12 = vshll.u32 %v5274_v28, 16  ;;  %v1556_v28 = vrot.slane %v6005_v52, 1 }
  0x8d   : > { %1484 = vrot.lane.b32.xlu1 %v1379_v31, %s5627_s22  ;;  %v1393_v21 = vshrl.u32 %v6274_v4, 16  ;;  %v1395_v29 = vshll.u32 %v6274_v4, 16  ;;  %v1059_v13 = vld [vmem:[#allocation2 + $0xa8] sm:$0xf]  ;;  %v855_v47 = vrot.slane %v853_v27, 7  ;;  %v863_v53 = vrot.slane %v861_v39, 7 }
  0x8e   : > { %v1402_v48 = vrot.slane %v1400_v14, 1  ;;  %v1024_v54 = vld [vmem:[#allocation2 + $0xc0] sm:$0xf]  ;;  %v1555_v31 = vrot.slane %v4867_v1, 1 }
  0x8f   : > { %v1397_v46 = vrot.slane %v1395_v29, 1  ;;  %v858_v57 = vor.u32 %v856_v38, %v855_v47  ;;  %v859_v58 = vrot.slane %v855_v47, 4  ;;  %v866_v6 = vor.u32 %v864_v12, %v863_v53  ;;  %v1087_v47 = vld [vmem:[#allocation2 + $0x18] sm:$0xe]  ;;  %v5399_v1 = vld [vmem:[%s7864_s3 + $0xc0] sm:$0xff]  }
  0x90   : > { %v6284_v51 = vld [vmem:[#allocation2 + $0xac] sm:$0xf]  ;;  %v6289_v56 = vld [vmem:[#allocation2 + $0xb0] ss:$0 sps:$4 sm:$0x11]   ;;  %v868_v61 = vrot.slane %v863_v53, 4  ;;  %v1557_v29 = vsel %vm1554_vm10, %v1555_v31, %v1556_v28 }
  0x91   : > { %v1398_v55 = vor.u32 %v1397_v46, %v1393_v21  ;;  %v6287_v45 = vcombine.low %v1059_v13, %v6284_v51  ;;  %v1028_v62 = vld [vmem:[#allocation2 + $0xc8] sm:$0x1]  ;;  %v1424_v9 = vshll.u32 %v6289_v56, 16  ;;  %v867_v16 = vsel %vm5808_vm8, %v859_v58, %v866_v6  ;;  %4949 = vmatprep.mubr.msk.bf16.mxu1 %vm1609_vm11, %v1557_v29  ;;  %v1088_v58 = vld [vmem:[#allocation2 + $0x24] sm:$0xe] }
  0x92   : > { %v1025_v18 = vsel %vm5802_vm7, %v858_v57, %v1024_v54  ;;  %v1029_v19 = vsel %vm5722_vm2, %v868_v61, %v1028_v62  ;;  %1027 = vst.msk [vmem:[#allocation2 + $0xc4] sm:$0xf] %vm278_vm5, %v867_v16  ;;  %v5510_v61 = vld [vmem:[#allocation2 + $0x20] ss:$0 sps:$4 sm:$0x11]  }
  0x93   : > { %v1403_v2 = vsel %vm1247_vm9, %v1398_v55, %v1402_v48  ;;  %v1417_v3 = vshrl.u32 %v6287_v45, 16  ;;  %v1419_v8 = vshll.u32 %v6287_v45, 16  ;;  %v1426_v23 = vrot.slane %v1424_v9, 1  ;;  %1026 = vst [vmem:[#allocation2 + $0xc0] sm:$0xf] %v1025_v18  ;;  %v5405_v18 = vld [vmem:[%s7864_s3 + $0xc8] sm:$0xff]  }
  0x94   : > { %1488 = vrot.lane.b32.xlu1 %v1403_v2, %s5627_s22  ;;  %1030 = vst [vmem:[#allocation2 + $0xc8] sm:$0x1] %v1029_v19  ;;  %v5509_v55 = vld [vmem:[#allocation2 + $0x1c] sm:$0xf]  ;;  %v1562_v62 = vrot.slane %v5510_v61, 1 }
  0x95   : > { %v1421_v40 = vrot.slane %v1419_v8, 1  ;;  %v4869_v57 = vcombine.low %v1087_v47, %v5509_v55  ;;  %v5511_v2 = vld [vmem:[#allocation2 + $0x28] sm:$0xf]  ;;  %v1089_v29 = vld [vmem:[#allocation2 + $0x30] sm:$0xe] }
  0x96   : > { %v5415_v47 = vld [vmem:[%s7864_s3 + $0xf0] sm:$0xff]  }
  0x97   : > { %v1422_v21 = vor.u32 %v1421_v40, %v1417_v3  ;;  %v1561_v6 = vrot.slane %v4869_v57, 1  ;;  %v4870_v3 = vcombine.low %v1088_v58, %v5511_v2  ;;  %v5512_v40 = vld [vmem:[#allocation2 + $0x2c] ss:$0 sps:$4 sm:$0x11]   ;;  %v6376_v58 = vld [vmem:[#allocation2 + $0xd0] sm:$0xf] }
  0x98   : > { %v1065_v57 = vld [vmem:[#allocation2 + $0xcc] sm:$0xf]  ;;  %v1090_v2 = vld [vmem:[#allocation2 + $0x3c] sm:$0xe] }
  0x99   : > { %v1427_v14 = vsel %vm1247_vm9, %v1422_v21, %v1426_v23  ;;  %v6309_v38 = vld [vmem:[#allocation2 + $0xc4] sm:$0xf]  ;;  %v6325_v9 = vsel %vm1554_vm10, %v1561_v6, %v1562_v62  ;;  %v1564_v19 = vrot.slane %v4870_v3, 1  ;;  %v1565_v23 = vrot.slane %v5512_v40, 1  ;;  %v5416_v6 = vld [vmem:[%s7864_s3 + $0xf8] sm:$0xff]  }
  0x9a   : > { %1492 = vrot.lane.b32.xlu1 %v1427_v14, %s5627_s22  ;;  %v1063_v27 = vld [vmem:[#allocation2 + $0xc0] sm:$0xf]  ;;  %v5412_v14 = vld [vmem:[%s7864_s3 + $0xd8] sm:$0xff]   ;;  %v6384_v61 = vcombine.low %v1065_v57, %v6376_v58 }
  0x9b   : > { %v6312_v39 = vcombine.low %v1063_v27, %v6309_v38  ;;  %v6314_v12 = vld [vmem:[#allocation2 + $0xc8] ss:$0 sps:$4 sm:$0x11]   ;;  %v6346_v21 = vsel %vm1554_vm10, %v1564_v19, %v1565_v23  ;;  %v5513_v27 = vld [vmem:[#allocation2 + $0x34] sm:$0xf]  ;;  %v5417_v3 = vld [vmem:[%s7864_s3 + $0x100] sm:$0xff]  }
  0x9c   : > { %v1448_v46 = vshll.u32 %v6314_v12, 16 }
  0x9d   : > { %v1441_v41 = vshrl.u32 %v6312_v39, 16  ;;  %v1443_v52 = vshll.u32 %v6312_v39, 16 }
  0x9e   : > { %v1450_v13 = vrot.slane %v1448_v46, 1 }
  0x9f   : > { %v1445_v48 = vrot.slane %v1443_v52, 1  ;;  %v5414_v52 = vld [vmem:[%s7864_s3 + $0xe8] sm:$0xff]  }
  0xa1   : > { %v1446_v53 = vor.u32 %v1445_v48, %v1441_v41  ;;  %v4871_v41 = vcombine.low %v1089_v29, %v5513_v27  ;;  %v5514_v48 = vld [vmem:[#allocation2 + $0x38] ss:$0 sps:$4 sm:$0x11]  }
  0xa3   : > { %v1451_v54 = vsel %vm1247_vm9, %v1446_v53, %v1450_v13  ;;  %v1567_v46 = vrot.slane %v4871_v41, 1  ;;  %v1568_v13 = vrot.slane %v5514_v48, 1  ;;  %v5516_v41 = vld [vmem:[#allocation2 + $0x44] ss:$0 sps:$4 sm:$0x11]   ;;  %v5419_v48 = vld [vmem:[%s7864_s3 + $0x110] sm:$0xff]  }
  0xa4   : > { %1496 = vrot.lane.b32.xlu1 %v1451_v54, %s5627_s22 }
  0xa5   : > { %v6368_v54 = vsel %vm1554_vm10, %v1567_v46, %v1568_v13  ;;  %v1091_v46 = vld [vmem:[#allocation2 + $0x48] sm:$0xe] }
  0xa6   : > { %v4873_v57 = vcombine.low %v1091_v46, %v6168_v43  ;;  %v1574_v43 = vrot.slane %v6178_v50, 1  ;;  %v5517_v50 = vld [vmem:[#allocation2 + $0x58] sm:$0xf] }
  0xaa   : > { %v1467_v8 = vpop.permute.xlu0 %1466 }
  0xab   : > { %v6329_v16 = vsel %vm1609_vm11, %v5865_v15, %v1467_v8  ;;  %v5409_v15 = vld [vmem:[%s7864_s3 + $0xd0] sm:$0xff]   ;;  %v1453_v8 = vshrl.u32 %v6384_v61, 16 }
  0xac   : > { %1866 = vmatmul.mubr.bf16.vlgmr.msra.gmra.mrb[0].mxu0 %v6329_v16 }
  0xad   : > { %2331 = vmatpush1.bf16.msra.mxu0 %v5399_v1  ;;  %4922 = vmatprep.mubr.msk.bf16.mxu0 %vm1609_vm11, %v6325_v9  ;;  %v1455_v1 = vshll.u32 %v6384_v61, 16 }
  0xae   : > { %2332 = vmatprep.subr.bf16.mxu0 %v5626_v10  ;;  %v1469_v31 = vpop.permute.xlu0 %1468 }
  0xaf   : > { %v6343_v28 = vsel %vm1609_vm11, %v5875_v30, %v1469_v31  ;;  %v5413_v30 = vld [vmem:[%s7864_s3 + $0xe0] sm:$0xff]  }
  0xb0   : > { %v5515_v31 = vld [vmem:[#allocation2 + $0x40] sm:$0xf] }
  0xb1   : > { %2333 = vmatpush1.bf16.msra.mxu0 %v5405_v18  ;;  %v1457_v18 = vrot.slane %v1455_v1, 1  ;;  %v4872_v29 = vcombine.low %v1090_v2, %v5515_v31  ;;  %v5420_v1 = vld [vmem:[%s7864_s3 + $0x118] sm:$0xff]  }
  0xb2   : > { %2334 = vmatprep.subr.bf16.mxu0 %v5626_v10  ;;  %v1475_v62 = vpop.permute.xlu0 %1474 }
  0xb3   : > { %v1458_v40 = vor.u32 %v1457_v18, %v1453_v8  ;;  %v1570_v27 = vrot.slane %v4872_v29, 1  ;;  %v5518_v29 = vld [vmem:[#allocation2 + $0x5c] ss:$0 sps:$4 sm:$0x11]  }
  0xb4   : > { %1874 = vmatmul.mubr.bf16.gmra.mrb[4].mxu0 %v6343_v28 }
  0xb5   : > { %4923 = vmatprep.mubr.msk.bf16.mxu0 %vm1609_vm11, %v6346_v21  ;;  %2335 = vmatpush1.bf16.msra.mxu0 %v5409_v15 }
  0xb6   : > { %2336 = vmatprep.subr.bf16.mxu0 %v5626_v10 }
  0xb8   : > { %v1479_v15 = vpop.permute.xlu0 %1478 }
  0xb9   : > { %2337 = vmatpush1.bf16.msra.mxu0 %v5412_v14  ;;  %v5418_v14 = vld [vmem:[%s7864_s3 + $0x108] sm:$0xff]  }
  0xba   : > { %2338 = vmatprep.subr.bf16.mxu0 %v5626_v10 }
  0xbd   : > { %2339 = vmatpush1.bf16.msra.mxu0 %v5413_v30 }
  0xbe   : > { %2340 = vmatprep.subr.bf16.mxu0 %v5626_v10 }
  0xc1   : > { %2341 = vmatpush1.bf16.msra.mxu0 %v5414_v52  ;;  %v1571_v52 = vrot.slane %v5516_v41, 1 }
  0xc2   : > { %v1471_v53 = vpop.permute.xlu1 %1470  ;;  %2342 = vmatprep.subr.bf16.mxu0 %v5626_v10 }
  0xc3   : > { %v6373_v55 = vsel %vm1609_vm11, %v5951_v37, %v1471_v53  ;;  %v6387_v37 = vld [vmem:[#allocation2 + $0xd4] ss:$0 sps:$4 sm:$0x11]   ;;  %v6409_v53 = vsel %vm1554_vm10, %v1570_v27, %v1571_v52 }
  0xc4   : > { %1882 = vmatmul.mubr.bf16.gmra.mrb[8].mxu0 %v6373_v55  ;;  %v1460_v19 = vshll.u32 %v6387_v37, 16 }
  0xc5   : > { %4924 = vmatprep.mubr.msk.bf16.mxu0 %vm1609_vm11, %v6368_v54  ;;  %2343 = vmatpush1.bf16.msra.mxu0 %v5415_v47 }
  0xc6   : > { %2344 = vmatprep.subr.bf16.mxu0 %v5626_v10  ;;  %v1462_v23 = vrot.slane %v1460_v19, 1  ;;  %v1092_v19 = vld [vmem:[#allocation2 + $0x54] sm:$0xe] }
  0xc7   : > { %v6405_v13 = vpop.permute.xlu0 %1482 }
  0xc8   : > { %v1463_v30 = vsel %vm1247_vm9, %v1458_v40, %v1462_v23  ;;  %v4874_v23 = vcombine.low %v1092_v19, %v5517_v50 }
  0xc9   : > { %2345 = vmatpush1.bf16.msra.mxu0 %v5416_v6  ;;  %1498 = vrot.lane.b32.xlu1 %v1463_v30, %s5627_s22  ;;  %v1093_v30 = vld [vmem:[#allocation2 + $0x60] sm:$0xe] }
  0xca   : > { %2346 = vmatprep.subr.bf16.mxu0 %v5626_v10  ;;  %v4875_v52 = vcombine.low %v1093_v30, %v6200_v26  ;;  %v6462_v26 = vsel %vm1609_vm11, %v5909_v35, %v1479_v15  ;;  %v1095_v35 = vld [vmem:[#allocation2 + $0x78] sm:$0xe] }
  0xcb   : > { %v4877_v19 = vcombine.low %v1095_v35, %v6230_v22 }
  0xcd   : > { %2347 = vmatpush1.bf16.msra.mxu0 %v5417_v3  ;;  %v6423_v2 = vpop.permute.xlu0 %1486  ;;  %v1573_v3 = vrot.slane %v4873_v57, 1  ;;  %v1585_v50 = vrot.slane %v4877_v19, 1 }
  0xce   : > { %2348 = vmatprep.subr.bf16.mxu0 %v5626_v10 }
  0xcf   : > { %v6432_v8 = vsel %vm1554_vm10, %v1573_v3, %v1574_v43 }
  0xd1   : > { %2349 = vmatpush1.bf16.msra.mxu0 %v5418_v14  ;;  %v1577_v14 = vrot.slane %v5518_v29, 1 }
  0xd2   : > { %2350 = vmatprep.subr.bf16.mxu0 %v5626_v10 }
  0xd5   : > { %v1473_v47 = vpop.permute.xlu1 %1472  ;;  %2351 = vmatpush1.bf16.msra.mxu0 %v5419_v48  ;;  %v1094_v48 = vld [vmem:[#allocation2 + $0x6c] sm:$0xe] }
  0xd6   : > { %v6414_v6 = vsel %vm1609_vm11, %v6040_v36, %v1473_v47  ;;  %2352 = vmatprep.subr.bf16.mxu0 %v5626_v10  ;;  %v6429_v36 = vsel %vm1609_vm11, %v5879_v44, %v1475_v62  ;;  %v1576_v62 = vrot.slane %v4874_v23, 1  ;;  %v5519_v47 = vld [vmem:[#allocation2 + $0x70] sm:$0xf]  ;;  %v1586_v23 = vrot.slane %v6236_v25, 1 }
  0xd7   : > { %1890 = vmatmul.mubr.bf16.gmra.mrb[12].mxu0 %v6414_v6  ;;  %v4876_v57 = vcombine.low %v1094_v48, %v5519_v47  ;;  %v6520_v48 = vsel %vm1609_vm11, %v5995_v42, %v6423_v2  ;;  %v5523_v47 = vld [vmem:[#allocation2 + $0xa0] sm:$0xf]  ;;  %v1099_v42 = vld [vmem:[#allocation2 + $0xa8] sm:$0xe] }
  0xd8   : > { %4925 = vmatprep.mubr.msk.bf16.mxu0 %vm1609_vm11, %v6409_v53  ;;  %v6446_v41 = vsel %vm1554_vm10, %v1576_v62, %v1577_v14  ;;  %v6494_v22 = vsel %vm1554_vm10, %v1585_v50, %v1586_v23  ;;  %v5522_v14 = vld [vmem:[#allocation2 + $0x8c] ss:$0 sps:$4 sm:$0x11]   ;;  %v4881_v35 = vcombine.low %v1099_v42, %v6284_v51  ;;  %v1598_v50 = vrot.slane %v6289_v56, 1 }
  0xd9   : > { %2353 = vmatpush1.bf16.msra.mxu0 %v5420_v1  ;;  %v5520_v1 = vld [vmem:[#allocation2 + $0x74] ss:$0 sps:$4 sm:$0x11]   ;;  %v1589_v30 = vrot.slane %v5522_v14, 1 }
  0xda   : > { %4157 = vmatprep.subr.bf16.mxu0 %v5626_v10  ;;  %v1583_v3 = vrot.slane %v5520_v1, 1  ;;  %v1597_v19 = vrot.slane %v4881_v35, 1 }
  0xdc   : > { %v6552_v51 = vsel %vm1554_vm10, %v1597_v19, %v1598_v50 }
  0xde   : > { %v6434_v18 = vpop.permute.xlu0 %1490 }
  0xdf   : > { %1898 = vmatmul.mubr.bf16.gmra.mrb[16].mxu0 %v6429_v36  ;;  %v6549_v23 = vsel %vm1609_vm11, %v6088_v34, %v6434_v18  ;;  %v1101_v34 = vld [vmem:[#allocation2 + $0xc0] sm:$0xe] }
  0xe0   : > { %4926 = vmatprep.mubr.msk.bf16.mxu0 %vm1609_vm11, %v6432_v8 }
  0xe6   : > { %v6439_v40 = vpop.permute.xlu0 %1494 }
  0xea   : > { %v1465_v31 = vpop.permute.xlu0 %1464 }
  0xeb   : > { %v1611_v44 = vsel %vm1609_vm11, %v6020_v11, %v1465_v31  ;;  %v1579_v11 = vrot.slane %v4875_v52, 1  ;;  %v6491_v31 = vsel %vm1609_vm11, %v5972_v60, %v6405_v13  ;;  %v1097_v60 = vld [vmem:[#allocation2 + $0x90] sm:$0xe] }
  0xec   : > { %2102 = vmatmul.mubr.bf16.vlgmr.msra.gmra.mrb[0].mxu1 %v1611_v44  ;;  %v5521_v44 = vld [vmem:[#allocation2 + $0x88] sm:$0xf]  ;;  %v4879_v52 = vcombine.low %v1097_v60, %v6267_v17 }
  0xed   : > { %4950 = vmatprep.mubr.msk.bf16.mxu1 %vm1609_vm11, %v6259_v5  ;;  %v1580_v5 = vrot.slane %v6209_v33, 1 }
  0xf1   : > { %v1477_v27 = vpop.permute.xlu1 %1476 }
  0xf2   : > { %v6451_v46 = vsel %vm1609_vm11, %v6176_v49, %v1477_v27  ;;  %v6465_v49 = vsel %vm1554_vm10, %v1579_v11, %v1580_v5  ;;  %v1591_v11 = vrot.slane %v4879_v52, 1  ;;  %v1592_v5 = vrot.slane %v6276_v20, 1 }
  0xf3   : > { %1906 = vmatmul.mubr.bf16.gmra.mrb[20].mxu0 %v6451_v46  ;;  %v1604_v52 = vrot.slane %v6314_v12, 1 }
  0xf4   : > { %4927 = vmatprep.mubr.msk.bf16.mxu0 %vm1609_vm11, %v6446_v41  ;;  %2110 = vmatmul.mubr.bf16.gmra.mrb[4].mxu1 %v6329_v16  ;;  %v1582_v16 = vrot.slane %v4876_v57, 1  ;;  %v6523_v17 = vsel %vm1554_vm10, %v1591_v11, %v1592_v5 }
  0xf5   : > { %4951 = vmatprep.mubr.msk.bf16.mxu1 %vm1609_vm11, %v6325_v9 }
  0xf6   : > { %v6478_v43 = vsel %vm1554_vm10, %v1582_v16, %v1583_v3  ;;  %v5524_v16 = vld [vmem:[#allocation2 + $0xa4] ss:$0 sps:$4 sm:$0x11]  }
  0xf7   : > { %v1481_v33 = vpop.permute.xlu1 %1480  ;;  %v1595_v1 = vrot.slane %v5524_v16, 1 }
  0xf8   : > { %v6475_v15 = vsel %vm1609_vm11, %v6207_v7, %v1481_v33  ;;  %v1096_v7 = vld [vmem:[#allocation2 + $0x84] sm:$0xe] }
  0xf9   : > { %v4878_v62 = vcombine.low %v1096_v7, %v5521_v44  ;;  %v5525_v7 = vld [vmem:[#allocation2 + $0xb8] sm:$0xf] }
  0xfb   : > { %1914 = vmatmul.mubr.bf16.gmra.mrb[24].mxu0 %v6462_v26  ;;  %v1588_v29 = vrot.slane %v4878_v62, 1 }
  0xfc   : > { %4928 = vmatprep.mubr.msk.bf16.mxu0 %vm1609_vm11, %v6465_v49  ;;  %2118 = vmatmul.mubr.bf16.gmra.mrb[8].mxu1 %v6343_v28 }
  0xfd   : > { %4952 = vmatprep.mubr.msk.bf16.mxu1 %vm1609_vm11, %v6346_v21  ;;  %v6507_v27 = vsel %vm1554_vm10, %v1588_v29, %v1589_v30  ;;  %v4883_v30 = vcombine.low %v1101_v34, %v6309_v38 }
  0xff   : > { %v1485_v25 = vpop.permute.xlu1 %1484  ;;  %v1603_v60 = vrot.slane %v4883_v30, 1 }
 0x100   : > { %v6504_v13 = vsel %vm1609_vm11, %v6234_v24, %v1485_v25  ;;  %v1098_v24 = vld [vmem:[#allocation2 + $0x9c] sm:$0xe]  ;;  %v5526_v25 = vld [vmem:[#allocation2 + $0xbc] ss:$0 sps:$4 sm:$0x11]  }
 0x101   : > { %v4880_v57 = vcombine.low %v1098_v24, %v5523_v47  ;;  %v1601_v29 = vrot.slane %v5526_v25, 1  ;;  %v6581_v38 = vsel %vm1554_vm10, %v1603_v60, %v1604_v52  ;;  %v5429_v25 = vld [vmem:[%s7866_s5 + $0x68] sm:$0xff]  }
 0x103   : > { %1922 = vmatmul.mubr.bf16.gmra.mrb[28].mxu0 %v6475_v15  ;;  %v1594_v33 = vrot.slane %v4880_v57, 1  ;;  %v5425_v57 = vld [vmem:[%s7866_s5 + $0x60] sm:$0xff]  }
 0x104   : > { %4929 = vmatprep.mubr.msk.bf16.mxu0 %vm1609_vm11, %v6478_v43  ;;  %2126 = vmatmul.mubr.bf16.gmra.mrb[12].mxu1 %v6373_v55 }
 0x105   : > { %4953 = vmatprep.mubr.msk.bf16.mxu1 %vm1609_vm11, %v6368_v54  ;;  %v6536_v3 = vsel %vm1554_vm10, %v1594_v33, %v1595_v1  ;;  %3922 = vmatpush1.bf16.msra.mxu1 %v5425_v57 }
 0x106   : > { %v1489_v20 = vpop.permute.xlu1 %1488  ;;  %3923 = vmatprep.subr.bf16.mxu1 %v5626_v10 }
 0x107   : > { %v6533_v2 = vsel %vm1609_vm11, %v6274_v4, %v1489_v20  ;;  %v1100_v4 = vld [vmem:[#allocation2 + $0xb4] sm:$0xe] }
 0x108   : > { %v4882_v44 = vcombine.low %v1100_v4, %v5525_v7 }
 0x109   : > { %3924 = vmatpush1.bf16.msra.mxu1 %v5429_v25 }
 0x10a   : > { %v1600_v62 = vrot.slane %v4882_v44, 1  ;;  %3925 = vmatprep.subr.bf16.mxu1 %v5626_v10 }
 0x10b   : > { %1930 = vmatmul.mubr.bf16.gmra.mrb[32].mxu0 %v6491_v31 }
 0x10c   : > { %4930 = vmatprep.mubr.msk.bf16.mxu0 %vm1609_vm11, %v6494_v22  ;;  %2134 = vmatmul.mubr.bf16.gmra.mrb[16].mxu1 %v6414_v6  ;;  %v1493_v56 = vpop.permute.xlu1 %1492  ;;  %v6565_v14 = vsel %vm1554_vm10, %v1600_v62, %v1601_v29 }
 0x10d   : > { %4954 = vmatprep.mubr.msk.bf16.mxu1 %vm1609_vm11, %v6409_v53  ;;  %v6562_v18 = vsel %vm1609_vm11, %v6287_v45, %v1493_v56  ;;  %v6578_v45 = vsel %vm1609_vm11, %v6127_v32, %v6439_v40 }
 0x113   : > { %1938 = vmatmul.mubr.bf16.gmra.mrb[36].mxu0 %v6504_v13 }
 0x114   : > { %4931 = vmatprep.mubr.msk.bf16.mxu0 %vm1609_vm11, %v6507_v27  ;;  %2142 = vmatmul.mubr.bf16.gmra.mrb[20].mxu1 %v6429_v36 }
 0x115   : > { %4955 = vmatprep.mubr.msk.bf16.mxu1 %vm1609_vm11, %v6432_v8 }
 0x116   : > { %v1497_v11 = vpop.permute.xlu1 %1496 }
 0x117   : > { %v6591_v12 = vsel %vm1609_vm11, %v6312_v39, %v1497_v11 }
 0x11b   : > { %1946 = vmatmul.mubr.bf16.gmra.mrb[40].mxu0 %v6520_v48 }
 0x11c   : > { %4932 = vmatprep.mubr.msk.bf16.mxu0 %vm1609_vm11, %v6523_v17  ;;  %2150 = vmatmul.mubr.bf16.gmra.mrb[24].mxu1 %v6451_v46 }
 0x11d   : > { %4956 = vmatprep.mubr.msk.bf16.mxu1 %vm1609_vm11, %v6446_v41 }
 0x123   : > { %1954 = vmatmul.mubr.bf16.gmra.mrb[44].mxu0 %v6533_v2 }
 0x124   : > { %4933 = vmatprep.mubr.msk.bf16.mxu0 %vm1609_vm11, %v6536_v3  ;;  %2158 = vmatmul.mubr.bf16.gmra.mrb[28].mxu1 %v6462_v26 }
 0x125   : > { %4957 = vmatprep.mubr.msk.bf16.mxu1 %vm1609_vm11, %v6465_v49 }
 0x12b   : > { %1962 = vmatmul.mubr.bf16.gmra.mrb[48].mxu0 %v6549_v23 }
 0x12c   : > { %4934 = vmatprep.mubr.msk.bf16.mxu0 %vm1609_vm11, %v6552_v51  ;;  %2166 = vmatmul.mubr.bf16.gmra.mrb[32].mxu1 %v6475_v15 }
 0x12d   : > { %4958 = vmatprep.mubr.msk.bf16.mxu1 %vm1609_vm11, %v6478_v43 }
 0x133   : > { %1970 = vmatmul.mubr.bf16.gmra.mrb[52].mxu0 %v6562_v18 }
 0x134   : > { %4935 = vmatprep.mubr.msk.bf16.mxu0 %vm1609_vm11, %v6565_v14  ;;  %2174 = vmatmul.mubr.bf16.gmra.mrb[36].mxu1 %v6491_v31 }
 0x135   : > { %4959 = vmatprep.mubr.msk.bf16.mxu1 %vm1609_vm11, %v6494_v22 }
 0x13b   : > { %1978 = vmatmul.mubr.bf16.gmra.mrb[56].mxu0 %v6578_v45 }
 0x13c   : > { %4936 = vmatprep.mubr.msk.bf16.mxu0 %vm1609_vm11, %v6581_v38  ;;  %2182 = vmatmul.mubr.bf16.gmra.mrb[40].mxu1 %v6504_v13 }
 0x13d   : > { %4960 = vmatprep.mubr.msk.bf16.mxu1 %vm1609_vm11, %v6507_v27 }
 0x143   : > { %1986 = vmatmul.mubr.bf16.gmra.mrb[60].mxu0 %v6591_v12 }
 0x144   : > { %5001 = vmatprep.mubr.msk.bf16.mxu0 %vm1609_vm11, %v6325_v9  ;;  %2190 = vmatmul.mubr.bf16.gmra.mrb[44].mxu1 %v6520_v48 }
 0x145   : > { %4961 = vmatprep.mubr.msk.bf16.mxu1 %vm1609_vm11, %v6523_v17 }
 0x14b   : > { %2363 = vmatmul.mubr.bf16.vlgmr.msra.gmra.mrb[64].mxu0 %v6343_v28 }
 0x14c   : > { %5002 = vmatprep.mubr.msk.bf16.mxu0 %vm1609_vm11, %v6346_v21  ;;  %2198 = vmatmul.mubr.bf16.gmra.mrb[48].mxu1 %v6533_v2 }
 0x14d   : > { %4962 = vmatprep.mubr.msk.bf16.mxu1 %vm1609_vm11, %v6536_v3 }
 0x153   : > { %2371 = vmatmul.mubr.bf16.gmra.mrb[68].mxu0 %v6373_v55 }
 0x154   : > { %5003 = vmatprep.mubr.msk.bf16.mxu0 %vm1609_vm11, %v6368_v54  ;;  %2206 = vmatmul.mubr.bf16.gmra.mrb[52].mxu1 %v6549_v23 }
 0x155   : > { %4963 = vmatprep.mubr.msk.bf16.mxu1 %vm1609_vm11, %v6552_v51 }
 0x15b   : > { %2379 = vmatmul.mubr.bf16.gmra.mrb[72].mxu0 %v6414_v6 }
 0x15c   : > { %5004 = vmatprep.mubr.msk.bf16.mxu0 %vm1609_vm11, %v6409_v53  ;;  %2214 = vmatmul.mubr.bf16.gmra.mrb[56].mxu1 %v6562_v18 }
 0x15d   : > { %4964 = vmatprep.mubr.msk.bf16.mxu1 %vm1609_vm11, %v6565_v14 }
 0x163   : > { %2387 = vmatmul.mubr.bf16.gmra.mrb[76].mxu0 %v6429_v36 }
 0x164   : > { %5005 = vmatprep.mubr.msk.bf16.mxu0 %vm1609_vm11, %v6432_v8  ;;  %2222 = vmatmul.mubr.bf16.gmra.mrb[60].mxu1 %v6578_v45 }
 0x16b   : > { %2395 = vmatmul.mubr.bf16.gmra.mrb[80].mxu0 %v6451_v46 }
 0x16c   : > { %5006 = vmatprep.mubr.msk.bf16.mxu0 %vm1609_vm11, %v6446_v41 }
 0x173   : > { %2403 = vmatmul.mubr.bf16.gmra.mrb[84].mxu0 %v6462_v26 }
 0x174   : > { %5007 = vmatprep.mubr.msk.bf16.mxu0 %vm1609_vm11, %v6465_v49  ;;  %v1102_v49 = vld [vmem:[#allocation2 + $0xcc] sm:$0xe] }
 0x17b   : > { %2411 = vmatmul.mubr.bf16.gmra.mrb[88].mxu0 %v6475_v15 }
 0x17c   : > { %5008 = vmatprep.mubr.msk.bf16.mxu0 %vm1609_vm11, %v6478_v43  ;;  %v4884_v43 = vcombine.low %v1102_v49, %v6376_v58  ;;  %v1499_v58 = vpop.permute.xlu1 %1498 }
 0x17d   : > { %v1662_v47 = vsel %vm1609_vm11, %v6384_v61, %v1499_v58 }
 0x17f   : > { %v1867_v32 = vpop.f32.mrb[0].mxu0 }
 0x180   : > { %v1869_v39 = vpop.f32.mrb[1].mxu0 }
 0x181   : > { %v1870_v9 = vpop.f32.mrb[2].mxu0 }
 0x182   : > { %v1872_v28 = vpop.f32.mrb[3].mxu0 }
 0x183   : > { %2419 = vmatmul.mubr.bf16.gmra.mrb[92].mxu0 %v6491_v31 }
 0x184   : > { %5009 = vmatprep.mubr.msk.bf16.mxu0 %vm1609_vm11, %v6494_v22 }
 0x187   : > { %v1875_v21 = vpop.f32.mrb[4].mxu0 }
 0x188   : > { %v1877_v54 = vpop.f32.mrb[5].mxu0 }
 0x189   : > { %v1878_v55 = vpop.f32.mrb[6].mxu0 }
 0x18a   : > { %v1880_v53 = vpop.f32.mrb[7].mxu0 }
 0x18b   : > { %2427 = vmatmul.mubr.bf16.gmra.mrb[96].mxu0 %v6504_v13  ;;  %v1606_v13 = vrot.slane %v4884_v43, 1 }
 0x18c   : > { %5010 = vmatprep.mubr.msk.bf16.mxu0 %vm1609_vm11, %v6507_v27  ;;  %v1607_v27 = vrot.slane %v6387_v37, 1 }
 0x193   : > { %2435 = vmatmul.mubr.bf16.gmra.mrb[100].mxu0 %v6520_v48  ;;  %v1608_v48 = vsel %vm1554_vm10, %v1606_v13, %v1607_v27 }
 0x194   : > { %5011 = vmatprep.mubr.msk.bf16.mxu0 %vm1609_vm11, %v6523_v17 }
 0x197   : > { %v1883_v6 = vpop.f32.mrb[8].mxu0 }
 0x198   : > { %v1885_v36 = vpop.f32.mrb[9].mxu0 }
 0x199   : > { %v1886_v8 = vpop.f32.mrb[10].mxu0 }
 0x19a   : > { %v1888_v40 = vpop.f32.mrb[11].mxu0 }
 0x19b   : > { %2443 = vmatmul.mubr.bf16.gmra.mrb[104].mxu0 %v6533_v2 }
 0x19c   : > { %5012 = vmatprep.mubr.msk.bf16.mxu0 %vm1609_vm11, %v6536_v3 }
 0x1a3   : > { %2451 = vmatmul.mubr.bf16.gmra.mrb[108].mxu0 %v6549_v23 }
 0x1a4   : > { %5013 = vmatprep.mubr.msk.bf16.mxu0 %vm1609_vm11, %v6552_v51 }
 0x1aa   : > { %v1891_v41 = vpop.f32.mrb[12].mxu0 }
 0x1ab   : > { %2459 = vmatmul.mubr.bf16.gmra.mrb[112].mxu0 %v6562_v18  ;;  %v1893_v46 = vpop.f32.mrb[13].mxu0 }
 0x1ac   : > { %5014 = vmatprep.mubr.msk.bf16.mxu0 %vm1609_vm11, %v6565_v14  ;;  %v1894_v26 = vpop.f32.mrb[14].mxu0 }
 0x1ad   : > { %v1896_v15 = vpop.f32.mrb[15].mxu0 }
 0x1b2   : > { %v1899_v31 = vpop.f32.mrb[16].mxu0 }
 0x1b3   : > { %2467 = vmatmul.mubr.bf16.gmra.mrb[116].mxu0 %v6578_v45  ;;  %v1901_v22 = vpop.f32.mrb[17].mxu0 }
 0x1b4   : > { %5015 = vmatprep.mubr.msk.bf16.mxu0 %vm1609_vm11, %v6581_v38  ;;  %v6653_v5 = vpop.f32.mrb[18].mxu0 }
 0x1b5   : > { %v1904_v24 = vpop.f32.mrb[19].mxu0 }
 0x1bb   : > { %2475 = vmatmul.mubr.bf16.gmra.mrb[120].mxu0 %v6591_v12 }
 0x1bc   : > { %5016 = vmatprep.mubr.msk.bf16.mxu0 %vm1609_vm11, %v1608_v48 }
 0x1bf   : > { %v2103_v17 = vpop.f32.mrb[0].mxu1 }
 0x1c0   : > { %v6663_v20 = vadd.f32 %v2103_v17, %v1867_v32  ;;  %v2105_v37 = vpop.f32.mrb[1].mxu1 }
 0x1c1   : > { %v2106_v33 = vpop.f32.mrb[2].mxu1 }
 0x1c2   : > { %v6665_v16 = vadd.f32 %v2106_v33, %v1870_v9  ;;  %v2108_v1 = vpop.f32.mrb[3].mxu1  ;;  %v5432_v9 = vld [vmem:[%s7866_s5 + $0x70] sm:$0xff]  }
 0x1c3   : > { %2483 = vmatmul.mubr.bf16.gmra.mrb[124].mxu0 %v1662_v47  ;;  %3926 = vmatpush1.bf16.msra.mxu1 %v5432_v9  ;;  %v5438_v1 = vld [vmem:[%s7866_s5 + $0x80] sm:$0xff]  }
 0x1c4   : > { %3927 = vmatprep.subr.bf16.mxu1 %v5626_v10 }
 0x1c6   : > { %v1907_v42 = vpop.f32.mrb[20].mxu0 }
 0x1c7   : > { %v1909_v2 = vpop.f32.mrb[21].mxu0  ;;  %v2111_v3 = vpop.f32.mrb[4].mxu1 }
 0x1c8   : > { %v1910_v35 = vpop.f32.mrb[22].mxu0  ;;  %v6668_v61 = vadd.f32 %v2111_v3, %v1875_v21  ;;  %v2113_v19 = vpop.f32.mrb[5].mxu1 }
 0x1c9   : > { %v1912_v50 = vpop.f32.mrb[23].mxu0  ;;  %v2114_v4 = vpop.f32.mrb[6].mxu1 }
 0x1ca   : > { %v6670_v23 = vadd.f32 %v2114_v4, %v1878_v55  ;;  %v2116_v51 = vpop.f32.mrb[7].mxu1 }
 0x1ce   : > { %v1915_v7 = vpop.f32.mrb[24].mxu0 }
 0x1cf   : > { %v1917_v44 = vpop.f32.mrb[25].mxu0  ;;  %v2119_v56 = vpop.f32.mrb[8].mxu1 }
 0x1d0   : > { %v1918_v62 = vpop.f32.mrb[26].mxu0  ;;  %v6675_v29 = vadd.f32 %v2119_v56, %v1883_v6  ;;  %v2121_v34 = vpop.f32.mrb[9].mxu1 }
 0x1d1   : > { %v1920_v18 = vpop.f32.mrb[27].mxu0  ;;  %v2122_v14 = vpop.f32.mrb[10].mxu1 }
 0x1d2   : > { %v6677_v30 = vadd.f32 %v2122_v14, %v1886_v8  ;;  %v2124_v60 = vpop.f32.mrb[11].mxu1  ;;  %v5435_v8 = vld [vmem:[%s7866_s5 + $0x78] sm:$0xff]  }
 0x1d3   : > { %3928 = vmatpush1.bf16.msra.mxu1 %v5435_v8 }
 0x1d4   : > { %3929 = vmatprep.subr.bf16.mxu1 %v5626_v10 }
 0x1d6   : > { %v1923_v52 = vpop.f32.mrb[28].mxu0 }
 0x1d7   : > { %v1925_v45 = vpop.f32.mrb[29].mxu0  ;;  %v2127_v38 = vpop.f32.mrb[12].mxu1  ;;  %3930 = vmatpush1.bf16.msra.mxu1 %v5438_v1 }
 0x1d8   : > { %v1926_v11 = vpop.f32.mrb[30].mxu0  ;;  %v6680_v12 = vadd.f32 %v2127_v38, %v1891_v41  ;;  %v2129_v32 = vpop.f32.mrb[13].mxu1  ;;  %3931 = vmatprep.subr.bf16.mxu1 %v5626_v10 }
 0x1d9   : > { %v1928_v39 = vpop.f32.mrb[31].mxu0  ;;  %v2130_v28 = vpop.f32.mrb[14].mxu1 }
 0x1da   : > { %v6685_v21 = vadd.f32 %v2130_v28, %v1894_v26  ;;  %v2132_v54 = vpop.f32.mrb[15].mxu1 }
 0x1de   : > { %v1931_v55 = vpop.f32.mrb[32].mxu0 }
 0x1df   : > { %v1933_v53 = vpop.f32.mrb[33].mxu0  ;;  %v2135_v6 = vpop.f32.mrb[16].mxu1 }
 0x1e0   : > { %v1934_v36 = vpop.f32.mrb[34].mxu0  ;;  %v6691_v40 = vadd.f32 %v2135_v6, %v1899_v31  ;;  %v2137_v41 = vpop.f32.mrb[17].mxu1 }
 0x1e1   : > { %v1936_v46 = vpop.f32.mrb[35].mxu0  ;;  %v2138_v49 = vpop.f32.mrb[18].mxu1 }
 0x1e2   : > { %v6694_v26 = vadd.f32 %v2138_v49, %v6653_v5  ;;  %v2140_v15 = vpop.f32.mrb[19].mxu1 }
 0x1e6   : > { %v1939_v43 = vpop.f32.mrb[36].mxu0 }
 0x1e7   : > { %v1941_v22 = vpop.f32.mrb[37].mxu0  ;;  %v2143_v13 = vpop.f32.mrb[20].mxu1 }
 0x1e8   : > { %v1942_v27 = vpop.f32.mrb[38].mxu0  ;;  %v6697_v24 = vadd.f32 %v2143_v13, %v1907_v42  ;;  %v2145_v48 = vpop.f32.mrb[21].mxu1 }
 0x1e9   : > { %v1944_v58 = vpop.f32.mrb[39].mxu0  ;;  %v2146_v31 = vpop.f32.mrb[22].mxu1 }
 0x1ea   : > { %v6699_v17 = vadd.f32 %v2146_v31, %v1910_v35  ;;  %v2148_v47 = vpop.f32.mrb[23].mxu1 }
 0x1ee   : > { %v1947_v57 = vpop.f32.mrb[40].mxu0 }
 0x1ef   : > { %v1949_v37 = vpop.f32.mrb[41].mxu0  ;;  %v2151_v33 = vpop.f32.mrb[24].mxu1 }
 0x1f0   : > { %v1950_v5 = vpop.f32.mrb[42].mxu0  ;;  %v6704_v2 = vadd.f32 %v2151_v33, %v1915_v7  ;;  %v2153_v3 = vpop.f32.mrb[25].mxu1  ;;  %v5443_v7 = vld [vmem:[%s7866_s5 + $0x88] sm:$0xff]   ;;  %v5449_v33 = vld [vmem:[%s7866_s5 + $0x98] sm:$0xff]  }
 0x1f1   : > { %v1952_v19 = vpop.f32.mrb[43].mxu0  ;;  %v2154_v42 = vpop.f32.mrb[26].mxu1  ;;  %3932 = vmatpush1.bf16.msra.mxu1 %v5443_v7 }
 0x1f2   : > { %v6706_v50 = vadd.f32 %v2154_v42, %v1918_v62  ;;  %v2156_v4 = vpop.f32.mrb[27].mxu1  ;;  %3933 = vmatprep.subr.bf16.mxu1 %v5626_v10 }
 0x1f6   : > { %v1955_v35 = vpop.f32.mrb[44].mxu0 }
 0x1f7   : > { %v1957_v51 = vpop.f32.mrb[45].mxu0  ;;  %v2159_v44 = vpop.f32.mrb[28].mxu1 }
 0x1f8   : > { %v1958_v56 = vpop.f32.mrb[46].mxu0  ;;  %v6709_v25 = vadd.f32 %v2159_v44, %v1923_v52  ;;  %v2161_v34 = vpop.f32.mrb[29].mxu1  ;;  %v5446_v52 = vld [vmem:[%s7866_s5 + $0x90] sm:$0xff]  }
 0x1f9   : > { %v1960_v18 = vpop.f32.mrb[47].mxu0  ;;  %v2162_v14 = vpop.f32.mrb[30].mxu1  ;;  %3934 = vmatpush1.bf16.msra.mxu1 %v5446_v52  ;;  %v6760_v52 = vld [vmem:[%s7865_s4] ss:$0 sm:$0xff] }
 0x1fa   : > { %v6714_v60 = vadd.f32 %v2162_v14, %v1926_v11  ;;  %v2164_v62 = vpop.f32.mrb[31].mxu1  ;;  %3935 = vmatprep.subr.bf16.mxu1 %v5626_v10  ;;  %v5454_v14 = vld [vmem:[%s7866_s5 + $0xa0] sm:$0xff]  }
 0x1fd   : > { %3936 = vmatpush1.bf16.msra.mxu1 %v5449_v33 }
 0x1fe   : > { %v1963_v45 = vpop.f32.mrb[48].mxu0  ;;  %3937 = vmatprep.subr.bf16.mxu1 %v5626_v10 }
 0x1ff   : > { %v1965_v38 = vpop.f32.mrb[49].mxu0  ;;  %v2167_v32 = vpop.f32.mrb[32].mxu1 }
 0x200   : > { %v1966_v39 = vpop.f32.mrb[50].mxu0  ;;  %v6720_v9 = vadd.f32 %v2167_v32, %v1931_v55  ;;  %v2169_v28 = vpop.f32.mrb[33].mxu1 }
 0x201   : > { %v1968_v54 = vpop.f32.mrb[51].mxu0  ;;  %v2170_v53 = vpop.f32.mrb[34].mxu1  ;;  %3938 = vmatpush1.bf16.msra.mxu1 %v5454_v14 }
 0x202   : > { %v6722_v11 = vadd.f32 %v2170_v53, %v1934_v36  ;;  %v2172_v6 = vpop.f32.mrb[35].mxu1  ;;  %3939 = vmatprep.subr.bf16.mxu1 %v5626_v10 }
 0x206   : > { %v6725_v8 = vpop.f32.mrb[52].mxu0 }
 0x207   : > { %v1973_v41 = vpop.f32.mrb[53].mxu0  ;;  %v2175_v46 = vpop.f32.mrb[36].mxu1 }
 0x208   : > { %v6727_v49 = vpop.f32.mrb[54].mxu0  ;;  %v6729_v15 = vadd.f32 %v2175_v46, %v1939_v43  ;;  %v2177_v22 = vpop.f32.mrb[37].mxu1 }
 0x209   : > { %v1976_v55 = vpop.f32.mrb[55].mxu0  ;;  %v2178_v13 = vpop.f32.mrb[38].mxu1 }
 0x20a   : > { %v6731_v48 = vadd.f32 %v2178_v13, %v1942_v27  ;;  %v2180_v58 = vpop.f32.mrb[39].mxu1 }
 0x20e   : > { %v6733_v31 = vpop.f32.mrb[56].mxu0 }
 0x20f   : > { %v1981_v36 = vpop.f32.mrb[57].mxu0  ;;  %v2183_v47 = vpop.f32.mrb[40].mxu1 }
 0x210   : > { %v6735_v37 = vpop.f32.mrb[58].mxu0  ;;  %v6740_v1 = vadd.f32 %v2183_v47, %v1947_v57  ;;  %v2185_v43 = vpop.f32.mrb[41].mxu1 }
 0x211   : > { %v1984_v3 = vpop.f32.mrb[59].mxu0  ;;  %v2186_v19 = vpop.f32.mrb[42].mxu1 }
 0x212   : > { %v6742_v42 = vadd.f32 %v2186_v19, %v1950_v5  ;;  %v2188_v27 = vpop.f32.mrb[43].mxu1 }
 0x216   : > { %v6745_v4 = vpop.f32.mrb[60].mxu0 }
 0x217   : > { %v1989_v51 = vpop.f32.mrb[61].mxu0  ;;  %v2191_v44 = vpop.f32.mrb[44].mxu1 }
 0x218   : > { %v6747_v34 = vpop.f32.mrb[62].mxu0  ;;  %v6749_v18 = vadd.f32 %v2191_v44, %v1955_v35  ;;  %v2193_v7 = vpop.f32.mrb[45].mxu1 }
 0x219   : > { %v1992_v57 = vpop.f32.mrb[63].mxu0  ;;  %v2194_v62 = vpop.f32.mrb[46].mxu1 }
 0x21a   : > { %v6754_v5 = vadd.f32 %v2194_v62, %v1958_v56  ;;  %v2196_v38 = vpop.f32.mrb[47].mxu1  ;;  %v5457_v56 = vld [vmem:[%s7866_s5 + $0xa8] sm:$0xff]  }
 0x21b   : > { %3940 = vmatpush1.bf16.msra.mxu1 %v5457_v56 }
 0x21c   : > { %3941 = vmatprep.subr.bf16.mxu1 %v5626_v10 }
 0x21e   : > { %v2364_v32 = vpop.f32.mrb[64].mxu0 }
 0x21f   : > { %v2491_v35 = vadd.f32 %v2364_v32, %v6663_v20  ;;  %v2366_v28 = vpop.f32.mrb[65].mxu0  ;;  %v2199_v54 = vpop.f32.mrb[48].mxu1  ;;  %v5460_v32 = vld [vmem:[%s7866_s5 + $0xb0] sm:$0xff]  }
 0x220   : > { %v2367_v53 = vpop.f32.mrb[66].mxu0  ;;  %v6766_v6 = vadd.f32 %v2199_v54, %v1963_v45  ;;  %v2201_v46 = vpop.f32.mrb[49].mxu1  ;;  %3942 = vmatpush1.bf16.msra.mxu1 %v5460_v32 }
 0x221   : > { %v2530_v41 = vadd.f32 %v6760_v52, %v2491_v35  ;;  %v2492_v22 = vadd.f32 %v2367_v53, %v6665_v16  ;;  %v2369_v55 = vpop.f32.mrb[67].mxu0  ;;  %v2202_v13 = vpop.f32.mrb[50].mxu1  ;;  %v3010_v35 = vld [vmem:[#allocation2 + $0xc] sm:$0xf]  ;;  %3943 = vmatprep.subr.bf16.mxu1 %v5626_v10 }
 0x222   : > { %v6770_v36 = vadd.f32 %v2202_v13, %v1966_v39  ;;  %v2204_v47 = vpop.f32.mrb[51].mxu1  ;;  %v3014_v55 = vld [vmem:[#allocation2 + $0x14] sm:$0x1] }
 0x223   : > { %v2562_v58 = vmax.f32 %v2530_v41, 0.0  ;;  %v2531_v20 = vadd.f32 %v6760_v52, %v2492_v22  ;;  %v5465_v22 = vld [vmem:[%s7866_s5 + $0xb8] sm:$0xff]  }
 0x224   : > { %3944 = vmatpush1.bf16.msra.mxu1 %v5465_v22  ;;  %v3017_v22 = vld [vmem:[#allocation2 + $0x18] sm:$0xf] }
 0x225   : > { %v5275_v33 = vpack.c.bf16 %v2562_v58, %v2562_v58  ;;  %v2563_v43 = vmax.f32 %v2531_v20, 0.0  ;;  %4418 = vmatprep.subr.bf16.mxu1 %v5626_v10 }
 0x226   : > { %v2372_v45 = vpop.f32.mrb[68].mxu0 }
 0x227   : > { %v2691_v3 = vshrl.u32 %v5275_v33, 16  ;;  %v5276_v19 = vpack.c.bf16 %v2563_v43, %v2563_v43  ;;  %v2493_v27 = vadd.f32 %v2372_v45, %v6668_v61  ;;  %v2374_v51 = vpop.f32.mrb[69].mxu0  ;;  %v2207_v16 = vpop.f32.mrb[52].mxu1  ;;  %v2694_v57 = vshll.u32 %v5275_v33, 16 }
 0x228   : > { %v2375_v44 = vpop.f32.mrb[70].mxu0  ;;  %v6776_v39 = vadd.f32 %v2207_v16, %v6725_v8  ;;  %v2209_v62 = vpop.f32.mrb[53].mxu1  ;;  %v3122_v16 = vld [vmem:[#allocation2] sm:$0xf] }
 0x229   : > { %v2693_v7 = vrot.slane %v2691_v3, 7  ;;  %v2699_v14 = vshrl.u32 %v5276_v19, 16  ;;  %v2377_v38 = vpop.f32.mrb[71].mxu0  ;;  %v2532_v28 = vadd.f32 %v6760_v52, %v2493_v27  ;;  %v2210_v54 = vpop.f32.mrb[54].mxu1  ;;  %v2494_v61 = vadd.f32 %v2375_v44, %v6670_v23  ;;  %v3123_v44 = vld [vmem:[#allocation2 + $0x4] sm:$0xf] }
 0x22a   : > { %v2702_v41 = vshll.u32 %v5276_v19, 16  ;;  %v6784_v46 = vadd.f32 %v2210_v54, %v6727_v49  ;;  %v2212_v8 = vpop.f32.mrb[55].mxu1  ;;  %v6800_v38 = vcombine.low %v3122_v16, %v3123_v44 }
 0x22b   : > { %v2696_v53 = vor.u32 %v2694_v57, %v2693_v7  ;;  %v2701_v56 = vrot.slane %v2699_v14, 7  ;;  %v2564_v13 = vmax.f32 %v2532_v28, 0.0  ;;  %v2533_v58 = vadd.f32 %v6760_v52, %v2494_v61  ;;  %v5468_v61 = vld [vmem:[%s7866_s5] sm:$0xff]  }
 0x22c   : > { %v2697_v20 = vrot.slane %v2693_v7, 4  ;;  %4158 = vmatpush1.bf16.msra.mxu0 %v5468_v61  ;;  %v3024_v61 = vld [vmem:[#allocation2 + $0x24] sm:$0xf] }
 0x22d   : > { %v3011_v23 = vsel %vm5802_vm7, %v2696_v53, %v3010_v35  ;;  %v2704_v47 = vor.u32 %v2702_v41, %v2701_v56  ;;  %v2706_v33 = vrot.slane %v2701_v56, 4  ;;  %v5277_v49 = vpack.c.bf16 %v2564_v13, %v2564_v13  ;;  %4159 = vmatprep.subr.bf16.mxu0 %v5626_v10 }
 0x22e   : > { %3012 = vst [vmem:[#allocation2 + $0xc] sm:$0xf] %v3011_v23  ;;  %v2565_v43 = vmax.f32 %v2533_v58, 0.0  ;;  %v2380_v45 = vpop.f32.mrb[72].mxu0 }
 0x22f   : > { %v2705_v3 = vsel %vm5808_vm8, %v2697_v20, %v2704_v47  ;;  %v3015_v19 = vsel %vm5722_vm2, %v2706_v33, %v3014_v55  ;;  %v2495_v27 = vadd.f32 %v2380_v45, %v6675_v29  ;;  %v2382_v51 = vpop.f32.mrb[73].mxu0  ;;  %v2708_v7 = vshrl.u32 %v5277_v49, 16  ;;  %v2215_v14 = vpop.f32.mrb[56].mxu1 }
 0x230   : > { %3013 = vst.msk [vmem:[#allocation2 + $0x10] sm:$0xf] %vm278_vm5, %v2705_v3  ;;  %3016 = vst [vmem:[#allocation2 + $0x14] sm:$0x1] %v3015_v19  ;;  %v5278_v57 = vpack.c.bf16 %v2565_v43, %v2565_v43  ;;  %v2383_v62 = vpop.f32.mrb[74].mxu0  ;;  %v6803_v32 = vadd.f32 %v2215_v14, %v6733_v31  ;;  %v2217_v35 = vpop.f32.mrb[57].mxu1 }
 0x231   : > { %v2534_v29 = vadd.f32 %v6760_v52, %v2495_v27  ;;  %v2496_v28 = vadd.f32 %v2383_v62, %v6677_v30  ;;  %v2385_v54 = vpop.f32.mrb[75].mxu0  ;;  %v2710_v53 = vrot.slane %v2708_v7, 7  ;;  %v2711_v56 = vshll.u32 %v5277_v49, 16  ;;  %v2218_v8 = vpop.f32.mrb[58].mxu1  ;;  %v3021_v49 = vld [vmem:[#allocation2 + $0x20] sm:$0x1] }
 0x232   : > { %v2716_v41 = vshrl.u32 %v5278_v57, 16  ;;  %v6811_v13 = vadd.f32 %v2218_v8, %v6735_v37  ;;  %v2220_v58 = vpop.f32.mrb[59].mxu1  ;;  %v2719_v23 = vshll.u32 %v5278_v57, 16  ;;  %v3341_v47 = vshll.u32 %v6800_v38, 16 }
 0x233   : > { %v2566_v55 = vmax.f32 %v2534_v29, 0.0  ;;  %v2535_v31 = vadd.f32 %v6760_v52, %v2496_v28  ;;  %v2713_v20 = vor.u32 %v2711_v56, %v2710_v53  ;;  %v2714_v33 = vrot.slane %v2710_v53, 4 }
 0x234   : > { %v2718_v30 = vrot.slane %v2716_v41, 7 }
 0x235   : > { %v5279_v43 = vpack.c.bf16 %v2566_v55, %v2566_v55  ;;  %v2567_v45 = vmax.f32 %v2535_v31, 0.0  ;;  %v3018_v37 = vsel %vm5802_vm7, %v2713_v20, %v3017_v22  ;;  %v3124_v16 = vld [vmem:[#allocation2 + $0xc] sm:$0xf] }
 0x236   : > { %v2721_v19 = vor.u32 %v2719_v23, %v2718_v30  ;;  %v2723_v27 = vrot.slane %v2718_v30, 4  ;;  %v2388_v51 = vpop.f32.mrb[76].mxu0  ;;  %v3177_v44 = vld [vmem:[#allocation2 + $0xc] sm:$0xe]  ;;  %3019 = vst [vmem:[#allocation2 + $0x18] sm:$0xf] %v3018_v37 }
 0x237   : > { %v2725_v7 = vshrl.u32 %v5279_v43, 16  ;;  %v2728_v57 = vshll.u32 %v5279_v43, 16  ;;  %v5280_v14 = vpack.c.bf16 %v2567_v45, %v2567_v45  ;;  %v2497_v62 = vadd.f32 %v2388_v51, %v6680_v12  ;;  %v2390_v29 = vpop.f32.mrb[77].mxu0  ;;  %v3125_v35 = vld [vmem:[#allocation2 + $0x10] sm:$0xf]  ;;  %v2223_v53 = vpop.f32.mrb[60].mxu1 }
 0x238   : > { %v2722_v28 = vsel %vm5808_vm8, %v2714_v33, %v2721_v19  ;;  %v3022_v54 = vsel %vm5722_vm2, %v2723_v27, %v3021_v49  ;;  %v2391_v56 = vpop.f32.mrb[78].mxu0  ;;  %v6824_v41 = vcombine.low %v3124_v16, %v3125_v35  ;;  %v5087_v8 = vcombine.low %v3177_v44, %v3125_v35  ;;  %v2225_v58 = vpop.f32.mrb[61].mxu1  ;;  %v5427_v49 = vld [vmem:[#allocation2 + $0x14] ss:$0 sps:$4 sm:$0x11]  }
 0x239   : > { %3020 = vst.msk [vmem:[#allocation2 + $0x1c] sm:$0xf] %vm278_vm5, %v2722_v28  ;;  %3023 = vst [vmem:[#allocation2 + $0x20] sm:$0x1] %v3022_v54  ;;  %v2727_v22 = vrot.slane %v2725_v7, 7  ;;  %v2733_v55 = vshrl.u32 %v5280_v14, 16  ;;  %v6828_v31 = vadd.f32 %v2223_v53, %v6745_v4  ;;  %v2536_v30 = vadd.f32 %v6760_v52, %v2497_v62 }
 0x23a   : > { %v2736_v12 = vshll.u32 %v5280_v14, 16  ;;  %v2393_v20 = vpop.f32.mrb[79].mxu0  ;;  %v2226_v23 = vpop.f32.mrb[62].mxu1  ;;  %v2498_v33 = vadd.f32 %v2391_v56, %v6685_v21  ;;  %v3647_v43 = vrot.slane %v5087_v8, 1  ;;  %v3351_v45 = vshrl.u32 %v6824_v41, 16 }
 0x23b   : > { %v2730_v37 = vor.u32 %v2728_v57, %v2727_v22  ;;  %v2731_v19 = vrot.slane %v2727_v22, 4  ;;  %v2735_v27 = vrot.slane %v2733_v55, 7  ;;  %v6834_v51 = vadd.f32 %v2226_v23, %v6747_v34  ;;  %v2228_v16 = vpop.f32.mrb[63].mxu1  ;;  %v3028_v4 = vld [vmem:[#allocation2 + $0x2c] sm:$0x1] }
 0x23c   : > { %v2568_v44 = vmax.f32 %v2536_v30, 0.0  ;;  %v2537_v7 = vadd.f32 %v6760_v52, %v2498_v33  ;;  %v3648_v14 = vrot.slane %v5427_v49, 1  ;;  %v3353_v62 = vshll.u32 %v6824_v41, 16  ;;  %v6843_v8 = vld [vmem:[#allocation2 + $0x8] ss:$0 sps:$4 sm:$0x11]  }
 0x23d   : > { %v3025_v21 = vsel %vm5802_vm7, %v2730_v37, %v3024_v61  ;;  %v2738_v29 = vor.u32 %v2736_v12, %v2735_v27  ;;  %v2740_v35 = vrot.slane %v2735_v27, 4  ;;  %v3358_v28 = vshll.u32 %v5427_v49, 16  ;;  %v3126_v58 = vld [vmem:[#allocation2 + $0x18] sm:$0xf] }
 0x23e   : > { %3026 = vst [vmem:[#allocation2 + $0x24] sm:$0xf] %v3025_v21  ;;  %v5281_v57 = vpack.c.bf16 %v2568_v44, %v2568_v44  ;;  %v2569_v54 = vmax.f32 %v2537_v7, 0.0  ;;  %v6841_v34 = vsel %vm1554_vm10, %v3647_v43, %v3648_v14  ;;  %v2396_v53 = vpop.f32.mrb[80].mxu0  ;;  %v3355_v56 = vrot.slane %v3353_v62, 1 }
 0x23f   : > { %v2739_v22 = vsel %vm5808_vm8, %v2731_v19, %v2738_v29  ;;  %v3029_v55 = vsel %vm5722_vm2, %v2740_v35, %v3028_v4  ;;  %5140 = vmatprep.mubr.msk.bf16.mxu1 %vm1609_vm11, %v6841_v34  ;;  %v2499_v61 = vadd.f32 %v2396_v53, %v6691_v40  ;;  %v2398_v12 = vpop.f32.mrb[81].mxu0  ;;  %v6854_v20 = vrot.slane %v3341_v47, 1  ;;  %v5474_v40 = vld [vmem:[%s7866_s5 + $0x8] sm:$0xff]   ;;  %v3031_v62 = vld [vmem:[#allocation2 + $0x30] sm:$0xf] }
 0x240   : > { %3027 = vst.msk [vmem:[#allocation2 + $0x28] sm:$0xf] %vm278_vm5, %v2739_v22  ;;  %3030 = vst [vmem:[#allocation2 + $0x2c] sm:$0x1] %v3029_v55  ;;  %v2742_v30 = vshrl.u32 %v5281_v57, 16  ;;  %v5282_v23 = vpack.c.bf16 %v2569_v54, %v2569_v54  ;;  %v2399_v33 = vpop.f32.mrb[82].mxu0  ;;  %v3356_v49 = vor.u32 %v3355_v56, %v3351_v45  ;;  %4160 = vmatpush1.bf16.msra.mxu0 %v5474_v40 }
 0x241   : > { %v3360_v43 = vrot.slane %v3358_v28, 1  ;;  %v6857_v37 = vld [vmem:[#allocation2 + $0x1c] sm:$0xf]  ;;  %v2538_v19 = vadd.f32 %v6760_v52, %v2499_v61  ;;  %v2500_v27 = vadd.f32 %v2399_v33, %v6694_v26  ;;  %v2401_v47 = vpop.f32.mrb[83].mxu0  ;;  %v2745_v7 = vshll.u32 %v5281_v57, 16  ;;  %4161 = vmatprep.subr.bf16.mxu0 %v5626_v10 }
 0x242   : > { %v6865_v16 = vcombine.low %v3126_v58, %v6857_v37  ;;  %v6867_v4 = vld [vmem:[#allocation2 + $0x20] ss:$0 sps:$4 sm:$0x11]   ;;  %v2744_v44 = vrot.slane %v2742_v30, 7  ;;  %v2750_v45 = vshrl.u32 %v5282_v23, 16  ;;  %v2753_v53 = vshll.u32 %v5282_v23, 16 }
 0x243   : > { %v3361_v14 = vsel %vm1247_vm9, %v3356_v49, %v3360_v43  ;;  %v2570_v21 = vmax.f32 %v2538_v19, 0.0  ;;  %v2539_v29 = vadd.f32 %v6760_v52, %v2500_v27  ;;  %v3370_v57 = vshll.u32 %v6867_v4, 16  ;;  %v3035_v56 = vld [vmem:[#allocation2 + $0x38] sm:$0x1] }
 0x244   : > { %3556 = vrot.lane.b32.xlu0 %v3361_v14, %s5627_s22  ;;  %v3365_v26 = vshll.u32 %v6865_v16, 16  ;;  %v2747_v28 = vor.u32 %v2745_v7, %v2744_v44  ;;  %v2752_v54 = vrot.slane %v2750_v45, 7  ;;  %v3363_v61 = vshrl.u32 %v6865_v16, 16 }
 0x245   : > { %v5283_v22 = vpack.c.bf16 %v2570_v21, %v2570_v21  ;;  %v2571_v55 = vmax.f32 %v2539_v29, 0.0  ;;  %v2748_v58 = vrot.slane %v2744_v44, 4  ;;  %v3128_v40 = vld [vmem:[#allocation2 + $0x24] sm:$0xf]  ;;  %v3372_v7 = vrot.slane %v3370_v57, 1 }
 0x246   : > { %v3367_v12 = vrot.slane %v3365_v26, 1  ;;  %v3032_v30 = vsel %vm5802_vm7, %v2747_v28, %v3031_v62  ;;  %v2755_v33 = vor.u32 %v2753_v53, %v2752_v54  ;;  %v2757_v49 = vrot.slane %v2752_v54, 4  ;;  %v2404_v43 = vpop.f32.mrb[84].mxu0 }
 0x247   : > { %3033 = vst [vmem:[#allocation2 + $0x30] sm:$0xf] %v3032_v30  ;;  %v2759_v19 = vshrl.u32 %v5283_v22, 16  ;;  %v5284_v27 = vpack.c.bf16 %v2571_v55, %v2571_v55  ;;  %v2501_v23 = vadd.f32 %v2404_v43, %v6697_v24  ;;  %v2406_v47 = vpop.f32.mrb[85].mxu0  ;;  %v6880_v45 = vld [vmem:[#allocation2 + $0x28] sm:$0xf] }
 0x248   : > { %v2756_v14 = vsel %vm5808_vm8, %v2748_v58, %v2755_v33  ;;  %v3036_v44 = vsel %vm5722_vm2, %v2757_v49, %v3035_v56  ;;  %v2407_v62 = vpop.f32.mrb[86].mxu0  ;;  %v3368_v21 = vor.u32 %v3367_v12, %v3363_v61  ;;  %v6887_v29 = vcombine.low %v3128_v40, %v6880_v45  ;;  %v6889_v26 = vld [vmem:[#allocation2 + $0x2c] ss:$0 sps:$4 sm:$0x11]   ;;  %v5476_v56 = vld [vmem:[%s7866_s5 + $0x10] sm:$0xff]  }
 0x249   : > { %3034 = vst.msk [vmem:[#allocation2 + $0x34] sm:$0xf] %vm278_vm5, %v2756_v14  ;;  %3037 = vst [vmem:[#allocation2 + $0x38] sm:$0x1] %v3036_v44  ;;  %v2761_v24 = vrot.slane %v2759_v19, 7  ;;  %v2762_v28 = vshll.u32 %v5283_v22, 16  ;;  %v2540_v53 = vadd.f32 %v6760_v52, %v2501_v23  ;;  %v2502_v12 = vadd.f32 %v2407_v62, %v6699_v17  ;;  %4162 = vmatpush1.bf16.msra.mxu0 %v5476_v56 }
 0x24a   : > { %v2767_v54 = vshrl.u32 %v5284_v27, 16  ;;  %v2409_v57 = vpop.f32.mrb[87].mxu0  ;;  %v3038_v55 = vld [vmem:[#allocation2 + $0x3c] sm:$0xf]  ;;  %v2770_v61 = vshll.u32 %v5284_v27, 16  ;;  %v3373_v58 = vsel %vm1247_vm9, %v3368_v21, %v3372_v7  ;;  %v3377_v30 = vshll.u32 %v6887_v29, 16  ;;  %4163 = vmatprep.subr.bf16.mxu0 %v5626_v10 }
 0x24b   : > { %v2764_v33 = vor.u32 %v2762_v28, %v2761_v24  ;;  %v2572_v43 = vmax.f32 %v2540_v53, 0.0  ;;  %3558 = vrot.lane.b32.xlu1 %v3373_v58, %s5627_s22  ;;  %v3375_v22 = vshrl.u32 %v6887_v29, 16  ;;  %v2765_v40 = vrot.slane %v2761_v24, 4  ;;  %v3042_v19 = vld [vmem:[#allocation2 + $0x44] sm:$0x1] }
 0x24c   : > { %v2769_v49 = vrot.slane %v2767_v54, 7  ;;  %v2541_v23 = vadd.f32 %v6760_v52, %v2502_v12  ;;  %v3379_v47 = vrot.slane %v3377_v30, 1  ;;  %v3382_v27 = vshll.u32 %v6889_v26, 16  ;;  %v3178_v62 = vld [vmem:[#allocation2 + $0x18] sm:$0xe] }
 0x24d   : > { %v3039_v17 = vsel %vm5802_vm7, %v2764_v33, %v3038_v55  ;;  %v5285_v44 = vpack.c.bf16 %v2572_v43, %v2572_v43  ;;  %v5088_v53 = vcombine.low %v3178_v62, %v6857_v37  ;;  %v3179_v30 = vld [vmem:[#allocation2 + $0x24] sm:$0xe] }
 0x24e   : > { %v2772_v7 = vor.u32 %v2770_v61, %v2769_v49  ;;  %v2774_v14 = vrot.slane %v2769_v49, 4  ;;  %3040 = vst [vmem:[#allocation2 + $0x3c] sm:$0xf] %v3039_v17  ;;  %v2573_v21 = vmax.f32 %v2541_v23, 0.0  ;;  %v2412_v28 = vpop.f32.mrb[88].mxu0  ;;  %v3380_v54 = vor.u32 %v3379_v47, %v3375_v22 }
 0x24f   : > { %v3384_v24 = vrot.slane %v3382_v27, 1  ;;  %v2776_v12 = vshrl.u32 %v5285_v44, 16  ;;  %v2779_v58 = vshll.u32 %v5285_v44, 16  ;;  %v2414_v55 = vpop.f32.mrb[89].mxu0  ;;  %v3130_v61 = vld [vmem:[#allocation2 + $0x30] sm:$0xf]  ;;  %v2503_v49 = vadd.f32 %v2412_v28, %v6704_v2 }
 0x250   : > { %v2773_v57 = vsel %vm5808_vm8, %v2765_v40, %v2772_v7  ;;  %v3043_v56 = vsel %vm5722_vm2, %v2774_v14, %v3042_v19  ;;  %v5286_v33 = vpack.c.bf16 %v2573_v21, %v2573_v21  ;;  %v2415_v43 = vpop.f32.mrb[90].mxu0  ;;  %v6914_v22 = vld [vmem:[#allocation2 + $0x34] sm:$0xf]  ;;  %v3650_v40 = vrot.slane %v5088_v53, 1  ;;  %v3045_v2 = vld [vmem:[#allocation2 + $0x48] sm:$0xf] }
 0x251   : > { %3041 = vst.msk [vmem:[#allocation2 + $0x40] sm:$0xf] %vm278_vm5, %v2773_v57  ;;  %3044 = vst [vmem:[#allocation2 + $0x44] sm:$0x1] %v3043_v56  ;;  %v3385_v37 = vsel %vm1247_vm9, %v3380_v54, %v3384_v24  ;;  %v2778_v23 = vrot.slane %v2776_v12, 7  ;;  %v2504_v19 = vadd.f32 %v2415_v43, %v6706_v50  ;;  %v2417_v47 = vpop.f32.mrb[91].mxu0  ;;  %v6919_v27 = vcombine.low %v3130_v61, %v6914_v22 }
 0x252   : > { %3560 = vrot.lane.b32.xlu0 %v3385_v37, %s5627_s22  ;;  %v6921_v17 = vld [vmem:[#allocation2 + $0x38] ss:$0 sps:$4 sm:$0x11]   ;;  %v3651_v7 = vrot.slane %v6867_v4, 1  ;;  %v2784_v14 = vshrl.u32 %v5286_v33, 16  ;;  %v2787_v44 = vshll.u32 %v5286_v33, 16  ;;  %v2542_v62 = vadd.f32 %v6760_v52, %v2503_v49 }
 0x253   : > { %v5089_v21 = vcombine.low %v3179_v30, %v6880_v45  ;;  %v5478_v50 = vld [vmem:[%s7866_s5 + $0x18] sm:$0xff]   ;;  %v2781_v28 = vor.u32 %v2779_v58, %v2778_v23  ;;  %v2782_v54 = vrot.slane %v2778_v23, 4  ;;  %v2543_v24 = vadd.f32 %v6760_v52, %v2504_v19  ;;  %v3049_v55 = vld [vmem:[#allocation2 + $0x50] sm:$0x1]  ;;  %v6939_v19 = vld [vmem:[#allocation2 + $0x30] sm:$0xe] }
 0x254   : > { %v3387_v53 = vshrl.u32 %v6919_v27, 16  ;;  %v2786_v57 = vrot.slane %v2784_v14, 7  ;;  %v2574_v56 = vmax.f32 %v2542_v62, 0.0  ;;  %v3389_v4 = vshll.u32 %v6919_v27, 16  ;;  %4164 = vmatpush1.bf16.msra.mxu0 %v5478_v50 }
 0x255   : > { %v3394_v12 = vshll.u32 %v6921_v17, 16  ;;  %v3046_v45 = vsel %vm5802_vm7, %v2781_v28, %v3045_v2  ;;  %v2575_v61 = vmax.f32 %v2543_v24, 0.0  ;;  %v6936_v30 = vsel %vm1554_vm10, %v3650_v40, %v3651_v7  ;;  %4165 = vmatprep.subr.bf16.mxu0 %v5626_v10 }
 0x256   : > { %v3653_v58 = vrot.slane %v5089_v21, 1  ;;  %3047 = vst [vmem:[#allocation2 + $0x48] sm:$0xf] %v3046_v45  ;;  %v2789_v33 = vor.u32 %v2787_v44, %v2786_v57  ;;  %v2791_v49 = vrot.slane %v2786_v57, 4  ;;  %v5287_v43 = vpack.c.bf16 %v2574_v56, %v2574_v56  ;;  %v2420_v37 = vpop.f32.mrb[92].mxu0 }
 0x257   : > { %v3391_v23 = vrot.slane %v3389_v4, 1  ;;  %v5288_v47 = vpack.c.bf16 %v2575_v61, %v2575_v61  ;;  %v2505_v14 = vadd.f32 %v2420_v37, %v6709_v25  ;;  %v2422_v2 = vpop.f32.mrb[93].mxu0  ;;  %v3396_v62 = vrot.slane %v3394_v12, 1  ;;  %v3132_v45 = vld [vmem:[#allocation2 + $0x3c] sm:$0xf] }
 0x258   : > { %v6942_v50 = vld [vmem:[#allocation2 + $0x40] sm:$0xf]  ;;  %v5090_v40 = vcombine.low %v6939_v19, %v6914_v22  ;;  %v2790_v7 = vsel %vm5808_vm8, %v2782_v54, %v2789_v33  ;;  %v3050_v44 = vsel %vm5722_vm2, %v2791_v49, %v3049_v55  ;;  %v2793_v21 = vshrl.u32 %v5287_v43, 16  ;;  %v2423_v24 = vpop.f32.mrb[94].mxu0  ;;  %v3052_v49 = vld [vmem:[#allocation2 + $0x54] sm:$0xf] }
 0x259   : > { %v2796_v28 = vshll.u32 %v5287_v43, 16  ;;  %v6950_v57 = vld [vmem:[#allocation2 + $0x44] ss:$0 sps:$4 sm:$0x11]   ;;  %3048 = vst.msk [vmem:[#allocation2 + $0x4c] sm:$0xf] %vm278_vm5, %v2790_v7  ;;  %v2544_v4 = vadd.f32 %v6760_v52, %v2505_v14  ;;  %v2506_v22 = vadd.f32 %v2423_v24, %v6714_v60  ;;  %v3392_v61 = vor.u32 %v3391_v23, %v3387_v53 }
 0x25a   : > { %3051 = vst [vmem:[#allocation2 + $0x50] sm:$0x1] %v3050_v44  ;;  %v2801_v25 = vshrl.u32 %v5288_v47, 16  ;;  %v2804_v56 = vshll.u32 %v5288_v47, 16  ;;  %v2425_v12 = vpop.f32.mrb[95].mxu0  ;;  %v2795_v54 = vrot.slane %v2793_v21, 7  ;;  %v6956_v55 = vcombine.low %v3132_v45, %v6942_v50 }
 0x25b   : > { %v3406_v33 = vshll.u32 %v6950_v57, 16  ;;  %v2576_v37 = vmax.f32 %v2544_v4, 0.0  ;;  %v2545_v19 = vadd.f32 %v6760_v52, %v2506_v22  ;;  %v3654_v47 = vrot.slane %v6889_v26, 1  ;;  %v3056_v7 = vld [vmem:[#allocation2 + $0x5c] sm:$0x1] }
 0x25c   : > { %v2803_v43 = vrot.slane %v2801_v25, 7  ;;  %v2798_v2 = vor.u32 %v2796_v28, %v2795_v54  ;;  %v2799_v14 = vrot.slane %v2795_v54, 4  ;;  %v3397_v60 = vsel %vm1247_vm9, %v3392_v61, %v3396_v62  ;;  %v6970_v12 = vld [vmem:[#allocation2 + $0x3c] sm:$0xe] }
 0x25d   : > { %v3399_v44 = vshrl.u32 %v6956_v55, 16  ;;  %v5289_v21 = vpack.c.bf16 %v2576_v37, %v2576_v37  ;;  %v2577_v24 = vmax.f32 %v2545_v19, 0.0  ;;  %3562 = vrot.lane.b32.xlu1 %v3397_v60, %s5627_s22  ;;  %v3401_v22 = vshll.u32 %v6956_v55, 16 }
 0x25e   : > { %v2806_v53 = vor.u32 %v2804_v56, %v2803_v43  ;;  %v2808_v23 = vrot.slane %v2803_v43, 4  ;;  %v3053_v25 = vsel %vm5802_vm7, %v2798_v2, %v3052_v49  ;;  %v2428_v4 = vpop.f32.mrb[96].mxu0  ;;  %v3408_v26 = vrot.slane %v3406_v33, 1  ;;  %v3134_v49 = vld [vmem:[#allocation2 + $0x48] sm:$0xf] }
 0x25f   : > { %v6968_v28 = vsel %vm1554_vm10, %v3653_v58, %v3654_v47  ;;  %3054 = vst [vmem:[#allocation2 + $0x54] sm:$0xf] %v3053_v25  ;;  %v2810_v45 = vshrl.u32 %v5289_v21, 16  ;;  %v2813_v54 = vshll.u32 %v5289_v21, 16  ;;  %v2430_v61 = vpop.f32.mrb[97].mxu0  ;;  %v5290_v33 = vpack.c.bf16 %v2577_v24, %v2577_v24 }
 0x260   : > { %v2807_v62 = vsel %vm5808_vm8, %v2799_v14, %v2806_v53  ;;  %v3057_v56 = vsel %vm5722_vm2, %v2808_v23, %v3056_v7  ;;  %v2507_v58 = vadd.f32 %v2428_v4, %v6720_v9  ;;  %v2431_v43 = vpop.f32.mrb[98].mxu0  ;;  %v3403_v37 = vrot.slane %v3401_v22, 1  ;;  %v6978_v19 = vld [vmem:[#allocation2 + $0x4c] sm:$0xf]  ;;  %v3059_v21 = vld [vmem:[#allocation2 + $0x60] sm:$0xf] }
 0x261   : > { %3055 = vst.msk [vmem:[#allocation2 + $0x58] sm:$0xf] %vm278_vm5, %v2807_v62  ;;  %3058 = vst [vmem:[#allocation2 + $0x5c] sm:$0x1] %v3057_v56  ;;  %v5091_v47 = vcombine.low %v6970_v12, %v6942_v50  ;;  %v2812_v2 = vrot.slane %v2810_v45, 7  ;;  %v2508_v14 = vadd.f32 %v2431_v43, %v6722_v11  ;;  %v2433_v7 = vpop.f32.mrb[99].mxu0  ;;  %v6984_v60 = vcombine.low %v3134_v49, %v6978_v19 }
 0x262   : > { %v6986_v53 = vld [vmem:[#allocation2 + $0x50] ss:$0 sps:$4 sm:$0x11]   ;;  %v3656_v23 = vrot.slane %v5090_v40, 1  ;;  %v2818_v24 = vshrl.u32 %v5290_v33, 16  ;;  %v2821_v9 = vshll.u32 %v5290_v33, 16  ;;  %v2546_v25 = vadd.f32 %v6760_v52, %v2507_v58 }
 0x263   : > { %v3404_v4 = vor.u32 %v3403_v37, %v3399_v44  ;;  %v5480_v22 = vld [vmem:[%s7866_s5 + $0x20] sm:$0xff]   ;;  %v2815_v62 = vor.u32 %v2813_v54, %v2812_v2  ;;  %v2816_v56 = vrot.slane %v2812_v2, 4  ;;  %v2547_v11 = vadd.f32 %v6760_v52, %v2508_v14  ;;  %v3063_v33 = vld [vmem:[#allocation2 + $0x68] sm:$0x1] }
 0x264   : > { %v3411_v45 = vshrl.u32 %v6984_v60, 16  ;;  %v2820_v61 = vrot.slane %v2818_v24, 7  ;;  %v2578_v49 = vmax.f32 %v2546_v25, 0.0  ;;  %v3413_v43 = vshll.u32 %v6984_v60, 16  ;;  %4166 = vmatpush1.bf16.msra.mxu0 %v5480_v22 }
 0x265   : > { %v3409_v40 = vsel %vm1247_vm9, %v3404_v4, %v3408_v26  ;;  %v3060_v44 = vsel %vm5802_vm7, %v2815_v62, %v3059_v21  ;;  %v2579_v58 = vmax.f32 %v2547_v11, 0.0  ;;  %v3418_v54 = vshll.u32 %v6986_v53, 16  ;;  %4167 = vmatprep.subr.bf16.mxu0 %v5626_v10 }
 0x266   : > { %3564 = vrot.lane.b32.xlu0 %v3409_v40, %s5627_s22  ;;  %v3657_v37 = vrot.slane %v6921_v17, 1  ;;  %3061 = vst [vmem:[#allocation2 + $0x60] sm:$0xf] %v3060_v44  ;;  %v2823_v2 = vor.u32 %v2821_v9, %v2820_v61  ;;  %v2825_v14 = vrot.slane %v2820_v61, 4  ;;  %v5291_v26 = vpack.c.bf16 %v2578_v49, %v2578_v49  ;;  %v2436_v7 = vpop.f32.mrb[100].mxu0 }
 0x267   : > { %v3415_v24 = vrot.slane %v3413_v43, 1  ;;  %v5292_v25 = vpack.c.bf16 %v2579_v58, %v2579_v58  ;;  %v2509_v4 = vadd.f32 %v2436_v7, %v6729_v15  ;;  %v2438_v21 = vpop.f32.mrb[101].mxu0  ;;  %v3420_v22 = vrot.slane %v3418_v54, 1  ;;  %v3066_v7 = vld [vmem:[#allocation2 + $0x6c] sm:$0xf] }
 0x268   : > { %v7003_v62 = vld [vmem:[#allocation2 + $0x58] sm:$0xf]  ;;  %v7006_v11 = vsel %vm1554_vm10, %v3656_v23, %v3657_v37  ;;  %v2824_v17 = vsel %vm5808_vm8, %v2816_v56, %v2823_v2  ;;  %v3064_v9 = vsel %vm5722_vm2, %v2825_v14, %v3063_v33  ;;  %v2827_v61 = vshrl.u32 %v5291_v26, 16  ;;  %v2439_v40 = vpop.f32.mrb[102].mxu0  ;;  %v3136_v37 = vld [vmem:[#allocation2 + $0x54] sm:$0xf] }
 0x269   : > { %v2830_v49 = vshll.u32 %v5291_v26, 16  ;;  %v7012_v43 = vld [vmem:[#allocation2 + $0x5c] ss:$0 sps:$4 sm:$0x11]   ;;  %3062 = vst.msk [vmem:[#allocation2 + $0x64] sm:$0xf] %vm278_vm5, %v2824_v17  ;;  %v2548_v58 = vadd.f32 %v6760_v52, %v2509_v4  ;;  %v2510_v23 = vadd.f32 %v2439_v40, %v6731_v48  ;;  %v3416_v2 = vor.u32 %v3415_v24, %v3411_v45 }
 0x26a   : > { %3065 = vst [vmem:[#allocation2 + $0x68] sm:$0x1] %v3064_v9  ;;  %v2835_v15 = vshrl.u32 %v5292_v25, 16  ;;  %v2838_v44 = vshll.u32 %v5292_v25, 16  ;;  %v2441_v54 = vpop.f32.mrb[103].mxu0  ;;  %v2829_v56 = vrot.slane %v2827_v61, 7  ;;  %v7018_v33 = vcombine.low %v3136_v37, %v7003_v62 }
 0x26b   : > { %v3430_v14 = vshll.u32 %v7012_v43, 16  ;;  %v5482_v26 = vld [vmem:[%s7866_s5 + $0x28] sm:$0xff]   ;;  %v2580_v25 = vmax.f32 %v2548_v58, 0.0  ;;  %v2549_v4 = vadd.f32 %v6760_v52, %v2510_v23  ;;  %v3659_v48 = vrot.slane %v5091_v47, 1  ;;  %v3070_v24 = vld [vmem:[#allocation2 + $0x74] sm:$0x1] }
 0x26c   : > { %v2837_v21 = vrot.slane %v2835_v15, 7  ;;  %v2832_v17 = vor.u32 %v2830_v49, %v2829_v56  ;;  %v2833_v45 = vrot.slane %v2829_v56, 4  ;;  %v3421_v9 = vsel %vm1247_vm9, %v3416_v2, %v3420_v22  ;;  %4168 = vmatpush1.bf16.msra.mxu0 %v5482_v26  ;;  %v3182_v15 = vld [vmem:[#allocation2 + $0x48] sm:$0xe] }
 0x26d   : > { %v3423_v61 = vshrl.u32 %v7018_v33, 16  ;;  %v5293_v37 = vpack.c.bf16 %v2580_v25, %v2580_v25  ;;  %v2581_v35 = vmax.f32 %v2549_v4, 0.0  ;;  %3566 = vrot.lane.b32.xlu1 %v3421_v9, %s5627_s22  ;;  %4169 = vmatprep.subr.bf16.mxu0 %v5626_v10  ;;  %v3425_v47 = vshll.u32 %v7018_v33, 16  ;;  %v3138_v26 = vld [vmem:[#allocation2 + $0x60] sm:$0xf] }
 0x26e   : > { %v2840_v40 = vor.u32 %v2838_v44, %v2837_v21  ;;  %v2842_v54 = vrot.slane %v2837_v21, 4  ;;  %v3067_v50 = vsel %vm5802_vm7, %v2832_v17, %v3066_v7  ;;  %v2444_v12 = vpop.f32.mrb[104].mxu0  ;;  %v3432_v49 = vrot.slane %v3430_v14, 1 }
 0x26f   : > { %v3660_v22 = vrot.slane %v6950_v57, 1  ;;  %3068 = vst [vmem:[#allocation2 + $0x6c] sm:$0xf] %v3067_v50  ;;  %v2844_v23 = vshrl.u32 %v5293_v37, 16  ;;  %v2847_v56 = vshll.u32 %v5293_v37, 16  ;;  %v2446_v2 = vpop.f32.mrb[105].mxu0  ;;  %v5294_v7 = vpack.c.bf16 %v2581_v35, %v2581_v35 }
 0x270   : > { %v2841_v44 = vsel %vm5808_vm8, %v2833_v45, %v2840_v40  ;;  %v3071_v58 = vsel %vm5722_vm2, %v2842_v54, %v3070_v24  ;;  %v2511_v14 = vadd.f32 %v2444_v12, %v6740_v1  ;;  %v2447_v21 = vpop.f32.mrb[106].mxu0  ;;  %v3427_v57 = vrot.slane %v3425_v47, 1  ;;  %v7042_v25 = vld [vmem:[#allocation2 + $0x64] sm:$0xf]  ;;  %v3073_v54 = vld [vmem:[#allocation2 + $0x78] sm:$0xf] }
 0x271   : > { %3069 = vst.msk [vmem:[#allocation2 + $0x70] sm:$0xf] %vm278_vm5, %v2841_v44  ;;  %3072 = vst [vmem:[#allocation2 + $0x74] sm:$0x1] %v3071_v58  ;;  %v7045_v4 = vsel %vm1554_vm10, %v3659_v48, %v3660_v22  ;;  %v2846_v17 = vrot.slane %v2844_v23, 7  ;;  %v2512_v45 = vadd.f32 %v2447_v21, %v6742_v42  ;;  %v2449_v24 = vpop.f32.mrb[107].mxu0  ;;  %v7049_v9 = vcombine.low %v3138_v26, %v7042_v25 }
 0x272   : > { %v7051_v40 = vld [vmem:[#allocation2 + $0x68] ss:$0 sps:$4 sm:$0x11]   ;;  %v5092_v35 = vcombine.low %v3182_v15, %v6978_v19  ;;  %v2852_v1 = vshrl.u32 %v5294_v7, 16  ;;  %v2855_v37 = vshll.u32 %v5294_v7, 16  ;;  %v2550_v50 = vadd.f32 %v6760_v52, %v2511_v14  ;;  %v5484_v48 = vld [vmem:[%s7866_s5 + $0x30] sm:$0xff]  }
 0x273   : > { %v3428_v12 = vor.u32 %v3427_v57, %v3423_v61  ;;  %v2849_v47 = vor.u32 %v2847_v56, %v2846_v17  ;;  %v2850_v42 = vrot.slane %v2846_v17, 4  ;;  %v2551_v22 = vadd.f32 %v6760_v52, %v2512_v45  ;;  %4170 = vmatpush1.bf16.msra.mxu0 %v5484_v48  ;;  %v3077_v2 = vld [vmem:[#allocation2 + $0x80] sm:$0x1]  ;;  %v7067_v17 = vld [vmem:[#allocation2 + $0x54] sm:$0xe] }
 0x274   : > { %v3435_v44 = vshrl.u32 %v7049_v9, 16  ;;  %v2854_v58 = vrot.slane %v2852_v1, 7  ;;  %v2582_v23 = vmax.f32 %v2550_v50, 0.0  ;;  %v3437_v15 = vshll.u32 %v7049_v9, 16  ;;  %4171 = vmatprep.subr.bf16.mxu0 %v5626_v10 }
 0x275   : > { %v3433_v19 = vsel %vm1247_vm9, %v3428_v12, %v3432_v49  ;;  %v3074_v61 = vsel %vm5802_vm7, %v2849_v47, %v3073_v54  ;;  %v2583_v26 = vmax.f32 %v2551_v22, 0.0  ;;  %v3442_v56 = vshll.u32 %v7051_v40, 16 }
 0x276   : > { %3568 = vrot.lane.b32.xlu0 %v3433_v19, %s5627_s22  ;;  %v3662_v7 = vrot.slane %v5092_v35, 1  ;;  %3075 = vst [vmem:[#allocation2 + $0x78] sm:$0xf] %v3074_v61  ;;  %v2857_v52 = vor.u32 %v2855_v37, %v2854_v58  ;;  %v2859_v14 = vrot.slane %v2854_v58, 4  ;;  %v5295_v21 = vpack.c.bf16 %v2582_v23, %v2582_v23  ;;  %v2452_v49 = vpop.f32.mrb[108].mxu0 }
 0x277   : > { %v3439_v57 = vrot.slane %v3437_v15, 1  ;;  %v5296_v45 = vpack.c.bf16 %v2583_v26, %v2583_v26  ;;  %v2513_v24 = vadd.f32 %v2452_v49, %v6749_v18  ;;  %v2454_v54 = vpop.f32.mrb[109].mxu0  ;;  %v3444_v1 = vrot.slane %v3442_v56, 1  ;;  %v3140_v61 = vld [vmem:[#allocation2 + $0x6c] sm:$0xf] }
 0x278   : > { %v7070_v50 = vld [vmem:[#allocation2 + $0x70] sm:$0xf]  ;;  %v5093_v35 = vcombine.low %v7067_v17, %v7003_v62  ;;  %v2858_v12 = vsel %vm5808_vm8, %v2850_v42, %v2857_v52  ;;  %v3078_v37 = vsel %vm5722_vm2, %v2859_v14, %v3077_v2  ;;  %v2861_v48 = vshrl.u32 %v5295_v21, 16  ;;  %v2455_v22 = vpop.f32.mrb[110].mxu0  ;;  %v7084_v62 = vld [vmem:[%s7865_s4] ss:$0 sm:$0xff] }
 0x279   : > { %v2864_v47 = vshll.u32 %v5295_v21, 16  ;;  %v7078_v58 = vld [vmem:[#allocation2 + $0x74] ss:$0 sps:$4 sm:$0x11]   ;;  %3076 = vst.msk [vmem:[#allocation2 + $0x7c] sm:$0xf] %vm278_vm5, %v2858_v12  ;;  %v2552_v42 = vadd.f32 %v7084_v62, %v2513_v24  ;;  %v2514_v19 = vadd.f32 %v2455_v22, %v6754_v5  ;;  %v3440_v26 = vor.u32 %v3439_v57, %v3435_v44 }
 0x27a   : > { %3079 = vst [vmem:[#allocation2 + $0x80] sm:$0x1] %v3078_v37  ;;  %v2869_v18 = vshrl.u32 %v5296_v45, 16  ;;  %v2872_v23 = vshll.u32 %v5296_v45, 16  ;;  %v2457_v15 = vpop.f32.mrb[111].mxu0  ;;  %v2863_v2 = vrot.slane %v2861_v48, 7  ;;  %v7089_v56 = vcombine.low %v3140_v61, %v7070_v50 }
 0x27b   : > { %v3454_v52 = vshll.u32 %v7078_v58, 16  ;;  %v3080_v14 = vld [vmem:[#allocation2 + $0x84] sm:$0xf]  ;;  %v2584_v49 = vmax.f32 %v2552_v42, 0.0  ;;  %v2553_v17 = vadd.f32 %v7084_v62, %v2514_v19  ;;  %v3663_v45 = vrot.slane %v6986_v53, 1 }
 0x27c   : > { %v2871_v21 = vrot.slane %v2869_v18, 7  ;;  %v2866_v54 = vor.u32 %v2864_v47, %v2863_v2  ;;  %v2867_v24 = vrot.slane %v2863_v2, 4  ;;  %v3084_v12 = vld [vmem:[#allocation2 + $0x8c] sm:$0x1]  ;;  %v3445_v5 = vsel %vm1247_vm9, %v3440_v26, %v3444_v1  ;;  %v7103_v15 = vld [vmem:[#allocation2 + $0x60] sm:$0xe] }
 0x27d   : > { %v3447_v37 = vshrl.u32 %v7089_v56, 16  ;;  %v5297_v48 = vpack.c.bf16 %v2584_v49, %v2584_v49  ;;  %v2585_v22 = vmax.f32 %v2553_v17, 0.0  ;;  %3570 = vrot.lane.b32.xlu1 %v3445_v5, %s5627_s22  ;;  %v3449_v19 = vshll.u32 %v7089_v56, 16 }
 0x27e   : > { %v2874_v44 = vor.u32 %v2872_v23, %v2871_v21  ;;  %v2876_v57 = vrot.slane %v2871_v21, 4  ;;  %v3081_v18 = vsel %vm5802_vm7, %v2866_v54, %v3080_v14  ;;  %v2460_v42 = vpop.f32.mrb[112].mxu0  ;;  %v3456_v53 = vrot.slane %v3454_v52, 1  ;;  %v3142_v14 = vld [vmem:[#allocation2 + $0x78] sm:$0xf] }
 0x27f   : > { %v7101_v47 = vsel %vm1554_vm10, %v3662_v7, %v3663_v45  ;;  %3082 = vst [vmem:[#allocation2 + $0x84] sm:$0xf] %v3081_v18  ;;  %v2878_v61 = vshrl.u32 %v5297_v48, 16  ;;  %v2881_v2 = vshll.u32 %v5297_v48, 16  ;;  %v2462_v26 = vpop.f32.mrb[113].mxu0  ;;  %v5298_v52 = vpack.c.bf16 %v2585_v22, %v2585_v22 }
 0x280   : > { %v2875_v1 = vsel %vm5808_vm8, %v2867_v24, %v2874_v44  ;;  %v3085_v23 = vsel %vm5722_vm2, %v2876_v57, %v3084_v12  ;;  %v2515_v7 = vadd.f32 %v2460_v42, %v6766_v6  ;;  %v2463_v21 = vpop.f32.mrb[114].mxu0  ;;  %v3451_v49 = vrot.slane %v3449_v19, 1  ;;  %v7111_v17 = vld [vmem:[#allocation2 + $0x7c] sm:$0xf]  ;;  %v3087_v48 = vld [vmem:[#allocation2 + $0x90] sm:$0xf] }
 0x281   : > { %3083 = vst.msk [vmem:[#allocation2 + $0x88] sm:$0xf] %vm278_vm5, %v2875_v1  ;;  %3086 = vst [vmem:[#allocation2 + $0x8c] sm:$0x1] %v3085_v23  ;;  %v5094_v45 = vcombine.low %v7103_v15, %v7042_v25  ;;  %v2880_v54 = vrot.slane %v2878_v61, 7  ;;  %v2516_v24 = vadd.f32 %v2463_v21, %v6770_v36  ;;  %v2465_v12 = vpop.f32.mrb[115].mxu0  ;;  %v7117_v5 = vcombine.low %v3142_v14, %v7111_v17 }
 0x282   : > { %v7119_v44 = vld [vmem:[#allocation2 + $0x80] ss:$0 sps:$4 sm:$0x11]   ;;  %v3665_v57 = vrot.slane %v5093_v35, 1  ;;  %v2886_v22 = vshrl.u32 %v5298_v52, 16  ;;  %v2889_v6 = vshll.u32 %v5298_v52, 16  ;;  %v2554_v18 = vadd.f32 %v7084_v62, %v2515_v7 }
 0x283   : > { %v3452_v42 = vor.u32 %v3451_v49, %v3447_v37  ;;  %v5486_v19 = vld [vmem:[%s7866_s5 + $0x38] sm:$0xff]   ;;  %v2883_v1 = vor.u32 %v2881_v2, %v2880_v54  ;;  %v2884_v23 = vrot.slane %v2880_v54, 4  ;;  %v2555_v36 = vadd.f32 %v7084_v62, %v2516_v24 }
 0x284   : > { %v3459_v61 = vshrl.u32 %v7117_v5, 16  ;;  %v2888_v26 = vrot.slane %v2886_v22, 7  ;;  %v2586_v14 = vmax.f32 %v2554_v18, 0.0  ;;  %v3461_v21 = vshll.u32 %v7117_v5, 16  ;;  %4172 = vmatpush1.bf16.msra.mxu0 %v5486_v19  ;;  %v3091_v52 = vld [vmem:[#allocation2 + $0x98] sm:$0x1] }
 0x285   : > { %v3457_v35 = vsel %vm1247_vm9, %v3452_v42, %v3456_v53  ;;  %v3088_v37 = vsel %vm5802_vm7, %v2883_v1, %v3087_v48  ;;  %v2587_v7 = vmax.f32 %v2555_v36, 0.0  ;;  %v3466_v2 = vshll.u32 %v7119_v44, 16  ;;  %4173 = vmatprep.subr.bf16.mxu0 %v5626_v10 }
 0x286   : > { %3572 = vrot.lane.b32.xlu0 %v3457_v35, %s5627_s22  ;;  %v3666_v49 = vrot.slane %v7012_v43, 1  ;;  %3089 = vst [vmem:[#allocation2 + $0x90] sm:$0xf] %v3088_v37  ;;  %v2891_v54 = vor.u32 %v2889_v6, %v2888_v26  ;;  %v2893_v24 = vrot.slane %v2888_v26, 4  ;;  %v5299_v53 = vpack.c.bf16 %v2586_v14, %v2586_v14  ;;  %v2468_v12 = vpop.f32.mrb[116].mxu0 }
 0x287   : > { %v3463_v22 = vrot.slane %v3461_v21, 1  ;;  %v5300_v18 = vpack.c.bf16 %v2587_v7, %v2587_v7  ;;  %v2517_v42 = vadd.f32 %v2468_v12, %v6776_v39  ;;  %v2470_v48 = vpop.f32.mrb[117].mxu0  ;;  %v3468_v19 = vrot.slane %v3466_v2, 1  ;;  %v3094_v12 = vld [vmem:[#allocation2 + $0x9c] sm:$0xf] }
 0x288   : > { %v7136_v1 = vld [vmem:[#allocation2 + $0x88] sm:$0xf]  ;;  %v7139_v36 = vsel %vm1554_vm10, %v3665_v57, %v3666_v49  ;;  %v2892_v43 = vsel %vm5808_vm8, %v2884_v23, %v2891_v54  ;;  %v3092_v6 = vsel %vm5722_vm2, %v2893_v24, %v3091_v52  ;;  %v2895_v26 = vshrl.u32 %v5299_v53, 16  ;;  %v2471_v35 = vpop.f32.mrb[118].mxu0  ;;  %v3144_v49 = vld [vmem:[#allocation2 + $0x84] sm:$0xf] }
 0x289   : > { %v2898_v14 = vshll.u32 %v5299_v53, 16  ;;  %v7145_v21 = vld [vmem:[#allocation2 + $0x8c] ss:$0 sps:$4 sm:$0x11]   ;;  %3090 = vst.msk [vmem:[#allocation2 + $0x94] sm:$0xf] %vm278_vm5, %v2892_v43  ;;  %v2556_v7 = vadd.f32 %v7084_v62, %v2517_v42  ;;  %v2518_v57 = vadd.f32 %v2471_v35, %v6784_v46  ;;  %v3464_v54 = vor.u32 %v3463_v22, %v3459_v61 }
 0x28a   : > { %3093 = vst [vmem:[#allocation2 + $0x98] sm:$0x1] %v3092_v6  ;;  %v2903_v39 = vshrl.u32 %v5300_v18, 16  ;;  %v2906_v37 = vshll.u32 %v5300_v18, 16  ;;  %v2473_v2 = vpop.f32.mrb[119].mxu0  ;;  %v2897_v23 = vrot.slane %v2895_v26, 7  ;;  %v7151_v52 = vcombine.low %v3144_v49, %v7136_v1 }
 0x28b   : > { %v3478_v24 = vshll.u32 %v7145_v21, 16  ;;  %v5489_v53 = vld [vmem:[%s7866_s5 + $0x40] sm:$0xff]   ;;  %v2588_v18 = vmax.f32 %v2556_v7, 0.0  ;;  %v2557_v42 = vadd.f32 %v7084_v62, %v2518_v57  ;;  %v3668_v46 = vrot.slane %v5094_v45, 1 }
 0x28c   : > { %v2905_v48 = vrot.slane %v2903_v39, 7  ;;  %v2900_v43 = vor.u32 %v2898_v14, %v2897_v23  ;;  %v2901_v61 = vrot.slane %v2897_v23, 4  ;;  %v3098_v22 = vld [vmem:[#allocation2 + $0xa4] sm:$0x1]  ;;  %v3469_v6 = vsel %vm1247_vm9, %v3464_v54, %v3468_v19  ;;  %4174 = vmatpush1.bf16.msra.mxu0 %v5489_v53  ;;  %v3185_v39 = vld [vmem:[#allocation2 + $0x6c] sm:$0xe] }
 0x28d   : > { %v3471_v26 = vshrl.u32 %v7151_v52, 16  ;;  %v5301_v49 = vpack.c.bf16 %v2588_v18, %v2588_v18  ;;  %v2589_v3 = vmax.f32 %v2557_v42, 0.0  ;;  %3574 = vrot.lane.b32.xlu1 %v3469_v6, %s5627_s22  ;;  %4175 = vmatprep.subr.bf16.mxu0 %v5626_v10  ;;  %v3473_v45 = vshll.u32 %v7151_v52, 16  ;;  %v3146_v53 = vld [vmem:[#allocation2 + $0x90] sm:$0xf] }
 0x28e   : > { %v2908_v35 = vor.u32 %v2906_v37, %v2905_v48  ;;  %v2910_v2 = vrot.slane %v2905_v48, 4  ;;  %v3095_v25 = vsel %vm5802_vm7, %v2900_v43, %v3094_v12  ;;  %v2476_v15 = vpop.f32.mrb[120].mxu0  ;;  %v3480_v14 = vrot.slane %v3478_v24, 1 }
 0x28f   : > { %v3669_v19 = vrot.slane %v7051_v40, 1  ;;  %3096 = vst [vmem:[#allocation2 + $0x9c] sm:$0xf] %v3095_v25  ;;  %v2912_v57 = vshrl.u32 %v5301_v49, 16  ;;  %v2915_v23 = vshll.u32 %v5301_v49, 16  ;;  %v2478_v54 = vpop.f32.mrb[121].mxu0  ;;  %v5302_v12 = vpack.c.bf16 %v2589_v3, %v2589_v3 }
 0x290   : > { %v2909_v37 = vsel %vm5808_vm8, %v2901_v61, %v2908_v35  ;;  %v3099_v7 = vsel %vm5722_vm2, %v2910_v2, %v3098_v22  ;;  %v2519_v24 = vadd.f32 %v2476_v15, %v6803_v32  ;;  %v2479_v48 = vpop.f32.mrb[122].mxu0  ;;  %v3475_v40 = vrot.slane %v3473_v45, 1  ;;  %v7175_v18 = vld [vmem:[#allocation2 + $0x94] sm:$0xf]  ;;  %v3101_v2 = vld [vmem:[#allocation2 + $0xa8] sm:$0xf] }
 0x291   : > { %3097 = vst.msk [vmem:[#allocation2 + $0xa0] sm:$0xf] %vm278_vm5, %v2909_v37  ;;  %3100 = vst [vmem:[#allocation2 + $0xa4] sm:$0x1] %v3099_v7  ;;  %v7178_v42 = vsel %vm1554_vm10, %v3668_v46, %v3669_v19  ;;  %v2914_v43 = vrot.slane %v2912_v57, 7  ;;  %v2520_v61 = vadd.f32 %v2479_v48, %v6811_v13  ;;  %v2481_v22 = vpop.f32.mrb[123].mxu0  ;;  %v7182_v6 = vcombine.low %v3146_v53, %v7175_v18 }
 0x292   : > { %v7184_v35 = vld [vmem:[#allocation2 + $0x98] ss:$0 sps:$4 sm:$0x11]   ;;  %v5095_v3 = vcombine.low %v3185_v39, %v7070_v50  ;;  %v2920_v32 = vshrl.u32 %v5302_v12, 16  ;;  %v2923_v49 = vshll.u32 %v5302_v12, 16  ;;  %v2558_v25 = vadd.f32 %v7084_v62, %v2519_v24  ;;  %v5492_v46 = vld [vmem:[%s7866_s5 + $0x48] sm:$0xff]  }
 0x293   : > { %v3476_v15 = vor.u32 %v3475_v40, %v3471_v26  ;;  %v2917_v45 = vor.u32 %v2915_v23, %v2914_v43  ;;  %v2918_v13 = vrot.slane %v2914_v43, 4  ;;  %v2559_v19 = vadd.f32 %v7084_v62, %v2520_v61  ;;  %4176 = vmatpush1.bf16.msra.mxu0 %v5492_v46  ;;  %v3105_v54 = vld [vmem:[#allocation2 + $0xb0] sm:$0x1]  ;;  %v3186_v61 = vld [vmem:[#allocation2 + $0x78] sm:$0xe] }
 0x294   : > { %v3483_v37 = vshrl.u32 %v7182_v6, 16  ;;  %v2922_v7 = vrot.slane %v2920_v32, 7  ;;  %v2590_v57 = vmax.f32 %v2558_v25, 0.0  ;;  %v3485_v39 = vshll.u32 %v7182_v6, 16  ;;  %4177 = vmatprep.subr.bf16.mxu0 %v5626_v10 }
 0x295   : > { %v3481_v50 = vsel %vm1247_vm9, %v3476_v15, %v3480_v14  ;;  %v3102_v26 = vsel %vm5802_vm7, %v2917_v45, %v3101_v2  ;;  %v2591_v53 = vmax.f32 %v2559_v19, 0.0  ;;  %v3490_v23 = vshll.u32 %v7184_v35, 16 }
 0x296   : > { %3576 = vrot.lane.b32.xlu0 %v3481_v50, %s5627_s22  ;;  %v3671_v12 = vrot.slane %v5095_v3, 1  ;;  %3103 = vst [vmem:[#allocation2 + $0xa8] sm:$0xf] %v3102_v26  ;;  %v2925_v24 = vor.u32 %v2923_v49, %v2922_v7  ;;  %v2927_v48 = vrot.slane %v2922_v7, 4  ;;  %v5303_v40 = vpack.c.bf16 %v2590_v57, %v2590_v57  ;;  %v2484_v14 = vpop.f32.mrb[124].mxu0 }
 0x297   : > { %v3487_v43 = vrot.slane %v3485_v39, 1  ;;  %v5304_v22 = vpack.c.bf16 %v2591_v53, %v2591_v53  ;;  %v2521_v32 = vadd.f32 %v2484_v14, %v6828_v31  ;;  %v2486_v2 = vpop.f32.mrb[125].mxu0  ;;  %v3492_v25 = vrot.slane %v3490_v23, 1  ;;  %v3148_v53 = vld [vmem:[#allocation2 + $0x9c] sm:$0xf] }
 0x298   : > { %v7201_v15 = vld [vmem:[#allocation2 + $0xa0] sm:$0xf]  ;;  %v5096_v46 = vcombine.low %v3186_v61, %v7111_v17  ;;  %v2926_v3 = vsel %vm5808_vm8, %v2918_v13, %v2925_v24  ;;  %v3106_v49 = vsel %vm5722_vm2, %v2927_v48, %v3105_v54  ;;  %v2929_v45 = vshrl.u32 %v5303_v40, 16  ;;  %v2487_v7 = vpop.f32.mrb[126].mxu0  ;;  %v3108_v48 = vld [vmem:[#allocation2 + $0xb4] sm:$0xf] }
 0x299   : > { %v2932_v19 = vshll.u32 %v5303_v40, 16  ;;  %v7208_v57 = vld [vmem:[#allocation2 + $0xa4] ss:$0 sps:$4 sm:$0x11]   ;;  %3104 = vst.msk [vmem:[#allocation2 + $0xac] sm:$0xf] %vm278_vm5, %v2926_v3  ;;  %v2560_v39 = vadd.f32 %v7084_v62, %v2521_v32  ;;  %v2522_v17 = vadd.f32 %v2487_v7, %v6834_v51  ;;  %v3488_v23 = vor.u32 %v3487_v43, %v3483_v37 }
 0x29a   : > { %3107 = vst [vmem:[#allocation2 + $0xb0] sm:$0x1] %v3106_v49  ;;  %v2937_v31 = vshrl.u32 %v5304_v22, 16  ;;  %v2940_v50 = vshll.u32 %v5304_v22, 16  ;;  %v2489_v26 = vpop.f32.mrb[127].mxu0  ;;  %v2931_v13 = vrot.slane %v2929_v45, 7  ;;  %v7214_v54 = vcombine.low %v3148_v53, %v7201_v15 }
 0x29b   : > { %v3502_v24 = vshll.u32 %v7208_v57, 16  ;;  %v2592_v14 = vmax.f32 %v2560_v39, 0.0  ;;  %v2561_v61 = vadd.f32 %v7084_v62, %v2522_v17  ;;  %v3672_v22 = vrot.slane %v7078_v58, 1  ;;  %v3112_v3 = vld [vmem:[#allocation2 + $0xbc] sm:$0x1] }
 0x29c   : > { %v2939_v40 = vrot.slane %v2937_v31, 7  ;;  %v2934_v2 = vor.u32 %v2932_v19, %v2931_v13  ;;  %v2935_v32 = vrot.slane %v2931_v13, 4  ;;  %v3493_v51 = vsel %vm1247_vm9, %v3488_v23, %v3492_v25  ;;  %v3187_v53 = vld [vmem:[#allocation2 + $0x84] sm:$0xe] }
 0x29d   : > { %v3495_v49 = vshrl.u32 %v7214_v54, 16  ;;  %v5305_v45 = vpack.c.bf16 %v2592_v14, %v2592_v14  ;;  %v2593_v7 = vmax.f32 %v2561_v61, 0.0  ;;  %3578 = vrot.lane.b32.xlu1 %v3493_v51, %s5627_s22  ;;  %v3497_v62 = vshll.u32 %v7214_v54, 16  ;;  %v3150_v26 = vld [vmem:[#allocation2 + $0xa8] sm:$0xf] }
 0x29e   : > { %v2942_v37 = vor.u32 %v2940_v50, %v2939_v40  ;;  %v2944_v43 = vrot.slane %v2939_v40, 4  ;;  %v3109_v31 = vsel %vm5802_vm7, %v2934_v2, %v3108_v48  ;;  %v3504_v39 = vrot.slane %v3502_v24, 1 }
 0x29f   : > { %v7226_v58 = vsel %vm1554_vm10, %v3671_v12, %v3672_v22  ;;  %3110 = vst [vmem:[#allocation2 + $0xb4] sm:$0xf] %v3109_v31  ;;  %v2946_v50 = vshrl.u32 %v5305_v45, 16  ;;  %v2949_v17 = vshll.u32 %v5305_v45, 16  ;;  %v5306_v13 = vpack.c.bf16 %v2593_v7, %v2593_v7 }
 0x2a0   : > { %v2943_v25 = vsel %vm5808_vm8, %v2935_v32, %v2942_v37  ;;  %v3113_v19 = vsel %vm5722_vm2, %v2944_v43, %v3112_v3  ;;  %v3499_v23 = vrot.slane %v3497_v62, 1  ;;  %v3151_v24 = vld [vmem:[#allocation2 + $0xac] sm:$0xf]  ;;  %v3674_v48 = vrot.slane %v5096_v46, 1  ;;  %v3115_v32 = vld [vmem:[#allocation2 + $0xc0] sm:$0xf] }
 0x2a1   : > { %3111 = vst.msk [vmem:[#allocation2 + $0xb8] sm:$0xf] %vm278_vm5, %v2943_v25  ;;  %3114 = vst [vmem:[#allocation2 + $0xbc] sm:$0x1] %v3113_v19  ;;  %v5097_v12 = vcombine.low %v3187_v53, %v7136_v1  ;;  %v2948_v40 = vrot.slane %v2946_v50, 7  ;;  %v7234_v14 = vcombine.low %v3150_v26, %v3151_v24  ;;  %v3675_v22 = vrot.slane %v7119_v44, 1 }
 0x2a2   : > { %v7236_v61 = vld [vmem:[#allocation2 + $0xb0] ss:$0 sps:$4 sm:$0x11]   ;;  %v3678_v2 = vrot.slane %v7145_v21, 1  ;;  %v2954_v3 = vshrl.u32 %v5306_v13, 16  ;;  %v2957_v51 = vshll.u32 %v5306_v13, 16  ;;  %v3500_v37 = vor.u32 %v3499_v23, %v3495_v49 }
 0x2a3   : > { %v3677_v43 = vrot.slane %v5097_v12, 1  ;;  %v5496_v46 = vld [vmem:[%s7866_s5 + $0x50] sm:$0xff]   ;;  %v2951_v45 = vor.u32 %v2949_v17, %v2948_v40  ;;  %v2952_v1 = vrot.slane %v2948_v40, 4  ;;  %v3507_v7 = vshrl.u32 %v7234_v14, 16  ;;  %v3119_v25 = vld [vmem:[#allocation2 + $0xc8] sm:$0x1] }
 0x2a4   : > { %v3509_v31 = vshll.u32 %v7234_v14, 16  ;;  %v2956_v62 = vrot.slane %v2954_v3, 7  ;;  %v3505_v44 = vsel %vm1247_vm9, %v3500_v37, %v3504_v39  ;;  %v3514_v21 = vshll.u32 %v7236_v61, 16  ;;  %v3188_v49 = vld [vmem:[#allocation2 + $0x90] sm:$0xe]  ;;  %4178 = vmatpush1.bf16.msra.mxu0 %v5496_v46 }
 0x2a5   : > { %v7248_v19 = vsel %vm1554_vm10, %v3674_v48, %v3675_v22  ;;  %v3116_v50 = vsel %vm5802_vm7, %v2951_v45, %v3115_v32  ;;  %3580 = vrot.lane.b32.xlu0 %v3505_v44, %s5627_s22  ;;  %v7254_v26 = vsel %vm1554_vm10, %v3677_v43, %v3678_v2  ;;  %v5098_v53 = vcombine.low %v3188_v49, %v7175_v18  ;;  %v3189_v13 = vld [vmem:[#allocation2 + $0x9c] sm:$0xe]  ;;  %v3190_v39 = vld [vmem:[#allocation2 + $0xa8] sm:$0xe]  ;;  %v3176_v49 = vld [vmem:[#allocation2] sm:$0xe] }
 0x2a6   : > { %v3511_v17 = vrot.slane %v3509_v31, 1  ;;  %4179 = vmatprep.subr.bf16.mxu0 %v5626_v10  ;;  %3117 = vst [vmem:[#allocation2 + $0xc0] sm:$0xf] %v3116_v50  ;;  %v2959_v23 = vor.u32 %v2957_v51, %v2956_v62  ;;  %v2961_v48 = vrot.slane %v2956_v62, 4  ;;  %v3516_v12 = vrot.slane %v3514_v21, 1 }
 0x2a7   : > { %v3152_v40 = vld [vmem:[#allocation2 + $0xb4] sm:$0xf]  ;;  %v3681_v59 = vrot.slane %v7184_v35, 1  ;;  %v3680_v3 = vrot.slane %v5098_v53, 1  ;;  %v5099_v37 = vcombine.low %v3189_v13, %v7201_v15  ;;  %v3684_v2 = vrot.slane %v7208_v57, 1 }
 0x2a8   : > { %v3512_v22 = vor.u32 %v3511_v17, %v3507_v7  ;;  %v3153_v32 = vld [vmem:[#allocation2 + $0xb8] sm:$0xf]  ;;  %v2960_v18 = vsel %vm5808_vm8, %v2952_v1, %v2959_v23  ;;  %v3120_v43 = vsel %vm5722_vm2, %v2961_v48, %v3119_v25  ;;  %v5467_v51 = vld [vmem:[#allocation2 + $0xbc] ss:$0 sps:$4 sm:$0x11]   ;;  %v5100_v45 = vcombine.low %v3190_v39, %v3151_v24 }
 0x2a9   : > { %v7265_v46 = vcombine.low %v3152_v40, %v3153_v32  ;;  %3118 = vst.msk [vmem:[#allocation2 + $0xc4] sm:$0xf] %vm278_vm5, %v2960_v18  ;;  %3121 = vst [vmem:[#allocation2 + $0xc8] sm:$0x1] %v3120_v43  ;;  %v7270_v7 = vsel %vm1554_vm10, %v3680_v3, %v3681_v59  ;;  %v3683_v15 = vrot.slane %v5099_v37, 1  ;;  %v3687_v57 = vrot.slane %v7236_v61, 1 }
 0x2aa   : > { %v3517_v35 = vsel %vm1247_vm9, %v3512_v22, %v3516_v12  ;;  %v3526_v63 = vshll.u32 %v5467_v51, 16  ;;  %v3686_v1 = vrot.slane %v5100_v45, 1  ;;  %v3191_v31 = vld [vmem:[#allocation2 + $0xb4] sm:$0xe]  ;;  %v5499_v24 = vld [vmem:[%s7866_s5 + $0x58] sm:$0xff]   ;;  %v3690_v21 = vrot.slane %v5467_v51, 1 }
 0x2ab   : > { %3582 = vrot.lane.b32.xlu1 %v3517_v35, %s5627_s22  ;;  %v3521_v0 = vshll.u32 %v7265_v46, 16  ;;  %v3519_v62 = vshrl.u32 %v7265_v46, 16  ;;  %v7280_v25 = vsel %vm1554_vm10, %v3683_v15, %v3684_v2  ;;  %v5101_v44 = vcombine.low %v3191_v31, %v3153_v32  ;;  %4180 = vmatpush1.bf16.msra.mxu0 %v5499_v24  ;;  %v5528_v17 = vld [vmem:[#allocation2 + $0x4] sm:$0xf] }
 0x2ac   : > { %v7283_v50 = vsel %vm1554_vm10, %v3686_v1, %v3687_v57  ;;  %v5086_v53 = vcombine.low %v3176_v49, %v5528_v17  ;;  %v5529_v13 = vld [vmem:[#allocation2 + $0x8] ss:$0 sps:$4 sm:$0x11]   ;;  %v7879_v23 = vshrl.u32 %v6800_v38, 16  ;;  %v3528_v59 = vrot.slane %v3526_v63, 1  ;;  %v5471_v1 = vld [vmem:[%s7866_s5 + $0xc0] sm:$0xff]  }
 0x2ad   : > { %v3523_v61 = vrot.slane %v3521_v0, 1  ;;  %v3645_v39 = vrot.slane %v5529_v13, 1  ;;  %v3689_v12 = vrot.slane %v5101_v44, 1  ;;  %v7880_v22 = vshll.u32 %v6843_v8, 16  ;;  %v3154_v37 = vld [vmem:[#allocation2 + $0xc0] sm:$0xf] }
 0x2ae   : > { %v3344_v48 = vor.u32 %v6854_v20, %v7879_v23  ;;  %v3644_v3 = vrot.slane %v5086_v53, 1  ;;  %v3192_v51 = vld [vmem:[#allocation2 + $0xc0] sm:$0xe]  ;;  %v5475_v53 = vld [vmem:[%s7866_s5 + $0xc8] sm:$0xff]  }
 0x2af   : > { %v3524_v40 = vor.u32 %v3523_v61, %v3519_v62  ;;  %v3348_v32 = vrot.slane %v7880_v22, 1  ;;  %v7291_v2 = vsel %vm1554_vm10, %v3689_v12, %v3690_v21  ;;  %v5477_v12 = vld [vmem:[%s7866_s5 + $0xd0] sm:$0xff]  }
 0x2b0   : > { %v3155_v43 = vld [vmem:[#allocation2 + $0xc4] sm:$0xf]  ;;  %v3646_v45 = vsel %vm1554_vm10, %v3644_v3, %v3645_v39  ;;  %v5473_v35 = vld [vmem:[#allocation2 + $0xc8] ss:$0 sps:$4 sm:$0x11]  }
 0x2b1   : > { %v3529_v18 = vsel %vm1247_vm9, %v3524_v40, %v3528_v59  ;;  %v7296_v20 = vcombine.low %v3154_v37, %v3155_v43  ;;  %v5102_v15 = vcombine.low %v3192_v51, %v3155_v43  ;;  %5168 = vmatprep.mubr.msk.bf16.mxu0 %vm1609_vm11, %v3646_v45  ;;  %v3349_v8 = vsel %vm1247_vm9, %v3344_v48, %v3348_v32  ;;  %v7322_v39 = vld [vmem:[#allocation2 + $0xd0] sm:$0xf]  ;;  %v7327_v48 = vld [vmem:[#allocation2 + $0xd4] ss:$0 sps:$4 sm:$0x11]   ;;  %v5479_v43 = vld [vmem:[%s7866_s5 + $0xd8] sm:$0xff]  }
 0x2b2   : > { %3584 = vrot.lane.b32.xlu0 %v3529_v18, %s5627_s22  ;;  %v3538_v0 = vshll.u32 %v5473_v35, 16  ;;  %v3693_v31 = vrot.slane %v5473_v35, 1  ;;  %v3550_v32 = vshll.u32 %v7327_v48, 16 }
 0x2b3   : > { %v3533_v57 = vshll.u32 %v7296_v20, 16  ;;  %v3692_v63 = vrot.slane %v5102_v15, 1  ;;  %v3531_v62 = vshrl.u32 %v7296_v20, 16  ;;  %v5481_v15 = vld [vmem:[%s7866_s5 + $0xe0] sm:$0xff]  }
 0x2b4   : > { %v3540_v17 = vrot.slane %v3538_v0, 1  ;;  %v3552_v18 = vrot.slane %v3550_v32, 1 }
 0x2b5   : > { %v3535_v44 = vrot.slane %v3533_v57, 1  ;;  %v7311_v49 = vsel %vm1554_vm10, %v3692_v63, %v3693_v31  ;;  %v5487_v63 = vld [vmem:[%s7866_s5 + $0xf8] sm:$0xff]  }
 0x2b6   : > { %v3557_v24 = vpop.permute.xlu0 %3556  ;;  %3554 = vrot.lane.b32.xlu0 %v3349_v8, %s5627_s22  ;;  %v5485_v8 = vld [vmem:[%s7866_s5 + $0xf0] sm:$0xff]  }
 0x2b7   : > { %v7308_v21 = vsel %vm1609_vm11, %v6824_v41, %v3557_v24  ;;  %v3536_v61 = vor.u32 %v3535_v44, %v3531_v62  ;;  %v3156_v41 = vld [vmem:[#allocation2 + $0xcc] sm:$0xf]  ;;  %v5497_v62 = vld [vmem:[%s7866_s5 + $0x110] sm:$0xff]  }
 0x2b8   : > { %3954 = vmatmul.mubr.bf16.vlgmr.msra.gmra.mrb[64].mxu1 %v7308_v21  ;;  %v7325_v23 = vcombine.low %v3156_v41, %v7322_v39  ;;  %v5493_v24 = vld [vmem:[%s7866_s5 + $0x108] sm:$0xff]  }
 0x2b9   : > { %4419 = vmatpush1.bf16.msra.mxu1 %v5471_v1  ;;  %5141 = vmatprep.mubr.msk.bf16.mxu1 %vm1609_vm11, %v6936_v30  ;;  %v3541_v13 = vsel %vm1247_vm9, %v3536_v61, %v3540_v17  ;;  %v5490_v1 = vld [vmem:[%s7866_s5 + $0x100] sm:$0xff]   ;;  %v5501_v61 = vld [vmem:[%s7866_s5 + $0x118] sm:$0xff]  }
 0x2ba   : > { %4420 = vmatprep.subr.bf16.mxu1 %v5626_v10  ;;  %3586 = vrot.lane.b32.xlu1 %v3541_v13, %s5627_s22  ;;  %v3543_v59 = vshrl.u32 %v7325_v23, 16  ;;  %v3545_v22 = vshll.u32 %v7325_v23, 16 }
 0x2bc   : > { %v3547_v37 = vrot.slane %v3545_v22, 1 }
 0x2bd   : > { %4421 = vmatpush1.bf16.msra.mxu1 %v5475_v53  ;;  %v3559_v40 = vpop.permute.xlu1 %3558 }
 0x2be   : > { %4422 = vmatprep.subr.bf16.mxu1 %v5626_v10  ;;  %v7338_v3 = vsel %vm1609_vm11, %v6865_v16, %v3559_v40  ;;  %v3548_v51 = vor.u32 %v3547_v37, %v3543_v59 }
 0x2c0   : > { %3962 = vmatmul.mubr.bf16.gmra.mrb[68].mxu1 %v7338_v3  ;;  %v3553_v35 = vsel %vm1247_vm9, %v3548_v51, %v3552_v18 }
 0x2c1   : > { %5142 = vmatprep.mubr.msk.bf16.mxu1 %vm1609_vm11, %v6968_v28  ;;  %4423 = vmatpush1.bf16.msra.mxu1 %v5477_v12 }
 0x2c2   : > { %4424 = vmatprep.subr.bf16.mxu1 %v5626_v10  ;;  %3588 = vrot.lane.b32.xlu1 %v3553_v35, %s5627_s22  ;;  %s4794_s22 = sshll.u32 %s269_s16, 8 }
 0x2c3   : > { %s7656_s19 = scalar_lea.vmem [#allocation3], %s4794_s22 }
 0x2c4   : > { %v3561_v45 = vpop.permute.xlu0 %3560  ;;  %s4728_s23 = sshll.u32 %s7656_s19, 4  ;;  %s7811_s23 = int_to_ptr.vmem [resolvable:$true] %s4728_s23 }
 0x2c5   : > { %v7350_v16 = vsel %vm1609_vm11, %v6887_v29, %v3561_v45  ;;  %4425 = vmatpush1.bf16.msra.mxu1 %v5479_v43  ;;  %v5483_v29 = vld [vmem:[%s7866_s5 + $0xe8] sm:$0xff]   ;;  %s5562_s13 = scalar_lea.vmem %s7811_s23, 4096  ;;  %p5569_p0 = scmp.lt.s32.totalorder %s7811_s23, %s5567_s15 }
 0x2c6   : > { %4426 = vmatprep.subr.bf16.mxu1 %v5626_v10  ;;  %p5563_p11 = scmp.ne.s32.totalorder %s7811_s23, %s5562_s13  ;;  %p5570_p1 = scmp.lt.s32.totalorder %s5568_s17, %s5562_s13 }
 0x2c8   : > { %3970 = vmatmul.mubr.bf16.gmra.mrb[72].mxu1 %v7350_v16  ;;  %p5564_p12 = pnand %p5563_p11, %p5709_p5  ;;  %p5571_p2 = por %p5570_p1, %p5569_p0 }
 0x2c9   : > { %5143 = vmatprep.mubr.msk.bf16.mxu1 %vm1609_vm11, %v7006_v11  ;;  %4427 = vmatpush1.bf16.msra.mxu1 %v5481_v15 }
 0x2ca   : > { %4428 = vmatprep.subr.bf16.mxu1 %v5626_v10  ;;  %p5565_p13 = pneg %p5564_p12 }
 0x2cc   : > { %p5572_p3 = pnand %p5571_p2, %p5565_p13 }
 0x2cd   : > { %4429 = vmatpush1.bf16.msra.mxu1 %v5483_v29 }
 0x2ce   : > { %4430 = vmatprep.subr.bf16.mxu1 %v5626_v10 }
 0x2cf   : > { %v3563_v57 = vpop.permute.xlu1 %3562 }
 0x2d0   : > { %v7370_v0 = vsel %vm1609_vm11, %v6919_v27, %v3563_v57 }
 0x2d1   : > { %4431 = vmatpush1.bf16.msra.mxu1 %v5485_v8 }
 0x2d2   : > { %3978 = vmatmul.mubr.bf16.gmra.mrb[76].mxu1 %v7370_v0  ;;  %4432 = vmatprep.subr.bf16.mxu1 %v5626_v10 }
 0x2d3   : > { %5144 = vmatprep.mubr.msk.bf16.mxu1 %vm1609_vm11, %v7045_v4 }
 0x2d5   : > { %4433 = vmatpush1.bf16.msra.mxu1 %v5487_v63 }
 0x2d6   : > { %4434 = vmatprep.subr.bf16.mxu1 %v5626_v10 }
 0x2d8   : > { %v3565_v27 = vpop.permute.xlu0 %3564 }
 0x2d9   : > { %v7385_v31 = vsel %vm1609_vm11, %v6956_v55, %v3565_v27  ;;  %4435 = vmatpush1.bf16.msra.mxu1 %v5490_v1 }
 0x2da   : > { %3986 = vmatmul.mubr.bf16.gmra.mrb[80].mxu1 %v7385_v31  ;;  %4436 = vmatprep.subr.bf16.mxu1 %v5626_v10 }
 0x2db   : > { %5145 = vmatprep.mubr.msk.bf16.mxu1 %vm1609_vm11, %v7101_v47 }
 0x2dd   : > { %4437 = vmatpush1.bf16.msra.mxu1 %v5493_v24 }
 0x2de   : > { %4438 = vmatprep.subr.bf16.mxu1 %v5626_v10 }
 0x2df   : > { %v3567_v55 = vpop.permute.xlu1 %3566 }
 0x2e0   : > { %v7400_v44 = vsel %vm1609_vm11, %v6984_v60, %v3567_v55 }
 0x2e1   : > { %4439 = vmatpush1.bf16.msra.mxu1 %v5497_v62 }
 0x2e2   : > { %3994 = vmatmul.mubr.bf16.gmra.mrb[84].mxu1 %v7400_v44  ;;  %4440 = vmatprep.subr.bf16.mxu1 %v5626_v10 }
 0x2e3   : > { %5146 = vmatprep.mubr.msk.bf16.mxu1 %vm1609_vm11, %v7139_v36 }
 0x2e5   : > { %4441 = vmatpush1.bf16.msra.mxu1 %v5501_v61 }
 0x2e8   : > { %v3569_v17 = vpop.permute.xlu0 %3568 }
 0x2e9   : > { %v7411_v53 = vsel %vm1609_vm11, %v7018_v33, %v3569_v17 }
 0x2ea   : > { %4002 = vmatmul.mubr.bf16.gmra.mrb[88].mxu1 %v7411_v53 }
 0x2eb   : > { %5147 = vmatprep.mubr.msk.bf16.mxu1 %vm1609_vm11, %v7178_v42 }
 0x2ef   : > { %v3571_v60 = vpop.permute.xlu1 %3570 }
 0x2f0   : > { %v7418_v13 = vsel %vm1609_vm11, %v7049_v9, %v3571_v60 }
 0x2f2   : > { %4010 = vmatmul.mubr.bf16.gmra.mrb[92].mxu1 %v7418_v13 }
 0x2f3   : > { %5148 = vmatprep.mubr.msk.bf16.mxu1 %vm1609_vm11, %v7226_v58 }
 0x2f8   : > { %v3573_v10 = vpop.permute.xlu0 %3572 }
 0x2f9   : > { %v7425_v33 = vsel %vm1609_vm11, %v7089_v56, %v3573_v10 }
 0x2fa   : > { %4018 = vmatmul.mubr.bf16.gmra.mrb[96].mxu1 %v7425_v33 }
 0x2fb   : > { %5149 = vmatprep.mubr.msk.bf16.mxu1 %vm1609_vm11, %v7248_v19 }
 0x2ff   : > { %v3575_v41 = vpop.permute.xlu1 %3574 }
 0x300   : > { %v7432_v9 = vsel %vm1609_vm11, %v7117_v5, %v3575_v41 }
 0x302   : > { %4026 = vmatmul.mubr.bf16.gmra.mrb[100].mxu1 %v7432_v9 }
 0x303   : > { %5150 = vmatprep.mubr.msk.bf16.mxu1 %vm1609_vm11, %v7254_v26 }
 0x308   : > { %v3577_v12 = vpop.permute.xlu0 %3576 }
 0x309   : > { %v7439_v56 = vsel %vm1609_vm11, %v7151_v52, %v3577_v12 }
 0x30a   : > { %4034 = vmatmul.mubr.bf16.gmra.mrb[104].mxu1 %v7439_v56 }
 0x30b   : > { %5151 = vmatprep.mubr.msk.bf16.mxu1 %vm1609_vm11, %v7270_v7 }
 0x30f   : > { %v3579_v40 = vpop.permute.xlu1 %3578 }
 0x310   : > { %v7446_v5 = vsel %vm1609_vm11, %v7182_v6, %v3579_v40 }
 0x312   : > { %4042 = vmatmul.mubr.bf16.gmra.mrb[108].mxu1 %v7446_v5 }
 0x313   : > { %5152 = vmatprep.mubr.msk.bf16.mxu1 %vm1609_vm11, %v7280_v25 }
 0x317   : > { %v3581_v59 = vpop.permute.xlu0 %3580 }
 0x318   : > { %v7453_v52 = vsel %vm1609_vm11, %v7214_v54, %v3581_v59 }
 0x31a   : > { %4050 = vmatmul.mubr.bf16.gmra.mrb[112].mxu1 %v7453_v52 }
 0x31b   : > { %5153 = vmatprep.mubr.msk.bf16.mxu1 %vm1609_vm11, %v7283_v50 }
 0x31d   : > { %v3583_v22 = vpop.permute.xlu1 %3582 }
 0x31e   : > { %v7460_v6 = vsel %vm1609_vm11, %v7234_v14, %v3583_v22 }
 0x322   : > { %4058 = vmatmul.mubr.bf16.gmra.mrb[116].mxu1 %v7460_v6 }
 0x323   : > { %5154 = vmatprep.mubr.msk.bf16.mxu1 %vm1609_vm11, %v7291_v2 }
 0x324   : > { %v3585_v32 = vpop.permute.xlu0 %3584 }
 0x325   : > { %v7467_v54 = vsel %vm1609_vm11, %v7265_v46, %v3585_v32 }
 0x328   : > { %v3555_v37 = vpop.permute.xlu0 %3554 }
 0x329   : > { %v3699_v18 = vsel %vm1609_vm11, %v6800_v38, %v3555_v37 }
 0x32a   : > { %4066 = vmatmul.mubr.bf16.gmra.mrb[120].mxu1 %v7467_v54  ;;  %4190 = vmatmul.mubr.bf16.vlgmr.msra.gmra.mrb[128].mxu0 %v3699_v18 }
 0x32b   : > { %5155 = vmatprep.mubr.msk.bf16.mxu1 %vm1609_vm11, %v7311_v49  ;;  %5169 = vmatprep.mubr.msk.bf16.mxu0 %vm1609_vm11, %v6841_v34 }
 0x32c   : > { %v3587_v14 = vpop.permute.xlu1 %3586 }
 0x32d   : > { %v7478_v43 = vsel %vm1609_vm11, %v7296_v20, %v3587_v14 }
 0x332   : > { %4074 = vmatmul.mubr.bf16.gmra.mrb[124].mxu1 %v7478_v43  ;;  %4198 = vmatmul.mubr.bf16.gmra.mrb[132].mxu0 %v7308_v21 }
 0x333   : > { %5220 = vmatprep.mubr.msk.bf16.mxu1 %vm1609_vm11, %v6936_v30  ;;  %5170 = vmatprep.mubr.msk.bf16.mxu0 %vm1609_vm11, %v6936_v30 }
 0x33a   : > { %4451 = vmatmul.mubr.bf16.vlgmr.msra.gmra.mrb[128].mxu1 %v7338_v3  ;;  %4206 = vmatmul.mubr.bf16.gmra.mrb[136].mxu0 %v7338_v3 }
 0x33b   : > { %5221 = vmatprep.mubr.msk.bf16.mxu1 %vm1609_vm11, %v6968_v28  ;;  %5171 = vmatprep.mubr.msk.bf16.mxu0 %vm1609_vm11, %v6968_v28 }
 0x342   : > { %4459 = vmatmul.mubr.bf16.gmra.mrb[132].mxu1 %v7350_v16  ;;  %4214 = vmatmul.mubr.bf16.gmra.mrb[140].mxu0 %v7350_v16 }
 0x343   : > { %5222 = vmatprep.mubr.msk.bf16.mxu1 %vm1609_vm11, %v7006_v11  ;;  %5172 = vmatprep.mubr.msk.bf16.mxu0 %vm1609_vm11, %v7006_v11 }
 0x34a   : > { %4467 = vmatmul.mubr.bf16.gmra.mrb[136].mxu1 %v7370_v0  ;;  %4222 = vmatmul.mubr.bf16.gmra.mrb[144].mxu0 %v7370_v0 }
 0x34b   : > { %5223 = vmatprep.mubr.msk.bf16.mxu1 %vm1609_vm11, %v7045_v4  ;;  %5173 = vmatprep.mubr.msk.bf16.mxu0 %vm1609_vm11, %v7045_v4 }
 0x352   : > { %4475 = vmatmul.mubr.bf16.gmra.mrb[140].mxu1 %v7385_v31  ;;  %4230 = vmatmul.mubr.bf16.gmra.mrb[148].mxu0 %v7385_v31 }
 0x353   : > { %5224 = vmatprep.mubr.msk.bf16.mxu1 %vm1609_vm11, %v7101_v47  ;;  %5174 = vmatprep.mubr.msk.bf16.mxu0 %vm1609_vm11, %v7101_v47 }
 0x35a   : > { %4483 = vmatmul.mubr.bf16.gmra.mrb[144].mxu1 %v7400_v44  ;;  %4238 = vmatmul.mubr.bf16.gmra.mrb[152].mxu0 %v7400_v44 }
 0x35b   : > { %5225 = vmatprep.mubr.msk.bf16.mxu1 %vm1609_vm11, %v7139_v36  ;;  %5175 = vmatprep.mubr.msk.bf16.mxu0 %vm1609_vm11, %v7139_v36 }
 0x362   : > { %4491 = vmatmul.mubr.bf16.gmra.mrb[148].mxu1 %v7411_v53  ;;  %4246 = vmatmul.mubr.bf16.gmra.mrb[156].mxu0 %v7411_v53 }
 0x363   : > { %5226 = vmatprep.mubr.msk.bf16.mxu1 %vm1609_vm11, %v7178_v42  ;;  %5176 = vmatprep.mubr.msk.bf16.mxu0 %vm1609_vm11, %v7178_v42 }
 0x36a   : > { %4499 = vmatmul.mubr.bf16.gmra.mrb[152].mxu1 %v7418_v13  ;;  %4254 = vmatmul.mubr.bf16.gmra.mrb[160].mxu0 %v7418_v13 }
 0x36b   : > { %5227 = vmatprep.mubr.msk.bf16.mxu1 %vm1609_vm11, %v7226_v58  ;;  %5177 = vmatprep.mubr.msk.bf16.mxu0 %vm1609_vm11, %v7226_v58 }
 0x372   : > { %4507 = vmatmul.mubr.bf16.gmra.mrb[156].mxu1 %v7425_v33  ;;  %4262 = vmatmul.mubr.bf16.gmra.mrb[164].mxu0 %v7425_v33 }
 0x373   : > { %5228 = vmatprep.mubr.msk.bf16.mxu1 %vm1609_vm11, %v7248_v19  ;;  %5178 = vmatprep.mubr.msk.bf16.mxu0 %vm1609_vm11, %v7248_v19 }
 0x37a   : > { %4515 = vmatmul.mubr.bf16.gmra.mrb[160].mxu1 %v7432_v9  ;;  %4270 = vmatmul.mubr.bf16.gmra.mrb[168].mxu0 %v7432_v9 }
 0x37b   : > { %5229 = vmatprep.mubr.msk.bf16.mxu1 %vm1609_vm11, %v7254_v26  ;;  %5179 = vmatprep.mubr.msk.bf16.mxu0 %vm1609_vm11, %v7254_v26  ;;  %v3193_v26 = vld [vmem:[#allocation2 + $0xcc] sm:$0xe] }
 0x382   : > { %4523 = vmatmul.mubr.bf16.gmra.mrb[164].mxu1 %v7439_v56  ;;  %4278 = vmatmul.mubr.bf16.gmra.mrb[172].mxu0 %v7439_v56 }
 0x383   : > { %5230 = vmatprep.mubr.msk.bf16.mxu1 %vm1609_vm11, %v7270_v7  ;;  %5180 = vmatprep.mubr.msk.bf16.mxu0 %vm1609_vm11, %v7270_v7  ;;  %v5103_v7 = vcombine.low %v3193_v26, %v7322_v39  ;;  %v3589_v39 = vpop.permute.xlu1 %3588 }
 0x38a   : > { %4531 = vmatmul.mubr.bf16.gmra.mrb[168].mxu1 %v7446_v5  ;;  %4286 = vmatmul.mubr.bf16.gmra.mrb[176].mxu0 %v7446_v5 }
 0x38b   : > { %5231 = vmatprep.mubr.msk.bf16.mxu1 %vm1609_vm11, %v7280_v25  ;;  %v7550_v38 = vpop.f32.mrb[64].mxu1  ;;  %5181 = vmatprep.mubr.msk.bf16.mxu0 %vm1609_vm11, %v7280_v25  ;;  %v3695_v25 = vrot.slane %v5103_v7, 1 }
 0x38c   : > { %v3957_v34 = vpop.f32.mrb[65].mxu1 }
 0x38d   : > { %v7554_v30 = vpop.f32.mrb[66].mxu1 }
 0x38e   : > { %v3960_v28 = vpop.f32.mrb[67].mxu1 }
 0x392   : > { %4539 = vmatmul.mubr.bf16.gmra.mrb[172].mxu1 %v7453_v52  ;;  %4294 = vmatmul.mubr.bf16.gmra.mrb[180].mxu0 %v7453_v52 }
 0x393   : > { %5232 = vmatprep.mubr.msk.bf16.mxu1 %vm1609_vm11, %v7283_v50  ;;  %v7560_v11 = vpop.f32.mrb[68].mxu1  ;;  %5182 = vmatprep.mubr.msk.bf16.mxu0 %vm1609_vm11, %v7283_v50  ;;  %v3696_v50 = vrot.slane %v7327_v48, 1  ;;  %v3750_v48 = vsel %vm1609_vm11, %v7325_v23, %v3589_v39 }
 0x394   : > { %v3965_v4 = vpop.f32.mrb[69].mxu1 }
 0x395   : > { %v7564_v47 = vpop.f32.mrb[70].mxu1  ;;  %v3697_v51 = vsel %vm1554_vm10, %v3695_v25, %v3696_v50 }
 0x396   : > { %v3968_v36 = vpop.f32.mrb[71].mxu1 }
 0x39a   : > { %4547 = vmatmul.mubr.bf16.gmra.mrb[176].mxu1 %v7460_v6  ;;  %4302 = vmatmul.mubr.bf16.gmra.mrb[184].mxu0 %v7460_v6 }
 0x39b   : > { %5233 = vmatprep.mubr.msk.bf16.mxu1 %vm1609_vm11, %v7291_v2  ;;  %v7570_v42 = vpop.f32.mrb[72].mxu1  ;;  %5183 = vmatprep.mubr.msk.bf16.mxu0 %vm1609_vm11, %v7291_v2 }
 0x39c   : > { %v3973_v58 = vpop.f32.mrb[73].mxu1 }
 0x39d   : > { %v7574_v19 = vpop.f32.mrb[74].mxu1 }
 0x39e   : > { %v3976_v46 = vpop.f32.mrb[75].mxu1 }
 0x3a2   : > { %4555 = vmatmul.mubr.bf16.gmra.mrb[180].mxu1 %v7467_v54  ;;  %4310 = vmatmul.mubr.bf16.gmra.mrb[188].mxu0 %v7467_v54 }
 0x3a3   : > { %5234 = vmatprep.mubr.msk.bf16.mxu1 %vm1609_vm11, %v7311_v49 }
 0x3a5   : > { %v7582_v20 = vpop.f32.mrb[76].mxu1 }
 0x3a6   : > { %v3981_v2 = vpop.f32.mrb[77].mxu1 }
 0x3a7   : > { %v7584_v21 = vpop.f32.mrb[78].mxu1 }
 0x3a8   : > { %v3984_v3 = vpop.f32.mrb[79].mxu1 }
 0x3aa   : > { %4563 = vmatmul.mubr.bf16.gmra.mrb[184].mxu1 %v7478_v43 }
 0x3ab   : > { %5235 = vmatprep.mubr.msk.bf16.mxu1 %vm1609_vm11, %v3697_v51 }
 0x3ad   : > { %v7589_v45 = vpop.f32.mrb[80].mxu1 }
 0x3ae   : > { %v3989_v35 = vpop.f32.mrb[81].mxu1 }
 0x3af   : > { %v7591_v49 = vpop.f32.mrb[82].mxu1 }
 0x3b0   : > { %v3992_v16 = vpop.f32.mrb[83].mxu1 }
 0x3b2   : > { %4571 = vmatmul.mubr.bf16.gmra.mrb[188].mxu1 %v3750_v48 }
 0x3b5   : > { %v7595_v15 = vpop.f32.mrb[84].mxu1 }
 0x3b6   : > { %v3997_v29 = vpop.f32.mrb[85].mxu1 }
 0x3b7   : > { %v7597_v8 = vpop.f32.mrb[86].mxu1 }
 0x3b8   : > { %v4000_v57 = vpop.f32.mrb[87].mxu1 }
 0x3bd   : > { %v7599_v0 = vpop.f32.mrb[88].mxu1 }
 0x3be   : > { %v4005_v63 = vpop.f32.mrb[89].mxu1 }
 0x3bf   : > { %v7601_v1 = vpop.f32.mrb[90].mxu1 }
 0x3c0   : > { %v4008_v27 = vpop.f32.mrb[91].mxu1 }
 0x3c5   : > { %v7603_v31 = vpop.f32.mrb[92].mxu1 }
 0x3c6   : > { %v4013_v24 = vpop.f32.mrb[93].mxu1 }
 0x3c7   : > { %v7605_v62 = vpop.f32.mrb[94].mxu1 }
 0x3c8   : > { %v4016_v23 = vpop.f32.mrb[95].mxu1 }
 0x3cd   : > { %v7607_v55 = vpop.f32.mrb[96].mxu1 }
 0x3ce   : > { %v4021_v44 = vpop.f32.mrb[97].mxu1 }
 0x3cf   : > { %v7609_v61 = vpop.f32.mrb[98].mxu1 }
 0x3d0   : > { %v4024_v17 = vpop.f32.mrb[99].mxu1 }
 0x3d5   : > { %v7611_v53 = vpop.f32.mrb[100].mxu1 }
 0x3d6   : > { %v4029_v60 = vpop.f32.mrb[101].mxu1 }
 0x3d7   : > { %v7613_v13 = vpop.f32.mrb[102].mxu1 }
 0x3d8   : > { %v4032_v10 = vpop.f32.mrb[103].mxu1 }
 0x3dd   : > { %v7615_v33 = vpop.f32.mrb[104].mxu1 }
 0x3de   : > { %v4037_v41 = vpop.f32.mrb[105].mxu1 }
 0x3df   : > { %v7617_v9 = vpop.f32.mrb[106].mxu1 }
 0x3e0   : > { %v4040_v12 = vpop.f32.mrb[107].mxu1 }
 0x3e5   : > { %v7619_v56 = vpop.f32.mrb[108].mxu1 }
 0x3e6   : > { %v4045_v40 = vpop.f32.mrb[109].mxu1 }
 0x3e7   : > { %v7621_v5 = vpop.f32.mrb[110].mxu1  ;;  %v5530_v40 = vld [vmem:[%s5764_s21] sm:$0xff] }
 0x3e8   : > { %v4048_v59 = vpop.f32.mrb[111].mxu1 }
 0x3ed   : > { %v7623_v52 = vpop.f32.mrb[112].mxu1 }
 0x3ee   : > { %v4053_v22 = vpop.f32.mrb[113].mxu1 }
 0x3ef   : > { %v7625_v6 = vpop.f32.mrb[114].mxu1 }
 0x3f0   : > { %v4056_v32 = vpop.f32.mrb[115].mxu1 }
 0x3f5   : > { %v7627_v54 = vpop.f32.mrb[116].mxu1 }
 0x3f6   : > { %v4061_v37 = vpop.f32.mrb[117].mxu1 }
 0x3f7   : > { %v7629_v18 = vpop.f32.mrb[118].mxu1 }
 0x3f8   : > { %v4064_v14 = vpop.f32.mrb[119].mxu1 }
 0x3fd   : > { %v7631_v43 = vpop.f32.mrb[120].mxu1  ;;  %v4191_v34 = vpop.f32.mrb[128].mxu0 }
 0x3fe   : > { %v4069_v28 = vpop.f32.mrb[121].mxu1  ;;  %v4192_v4 = vadd.f32 %v4191_v34, %v7550_v38  ;;  %v4193_v36 = vpop.f32.mrb[129].mxu0 }
 0x3ff   : > { %v7634_v58 = vpop.f32.mrb[122].mxu1  ;;  %v4194_v26 = vpop.f32.mrb[130].mxu0 }
 0x400   : > { %v4072_v46 = vpop.f32.mrb[123].mxu1  ;;  %v4195_v7 = vadd.f32 %v4194_v26, %v7554_v30  ;;  %v4196_v25 = vpop.f32.mrb[131].mxu0  ;;  %v7647_v30 = vld [vmem:[%s7867_s6] ss:$0 sm:$0xff] }
 0x405   : > { %v7637_v50 = vpop.f32.mrb[124].mxu1  ;;  %v4199_v2 = vpop.f32.mrb[132].mxu0 }
 0x406   : > { %v4077_v3 = vpop.f32.mrb[125].mxu1  ;;  %v4200_v51 = vadd.f32 %v4199_v2, %v7560_v11  ;;  %v4201_v39 = vpop.f32.mrb[133].mxu0 }
 0x407   : > { %v7640_v35 = vpop.f32.mrb[126].mxu1  ;;  %v4202_v38 = vpop.f32.mrb[134].mxu0  ;;  %v5532_v39 = vld [vmem:[%s5764_s21 + $0x10] sm:$0xff] }
 0x408   : > { %v4080_v48 = vpop.f32.mrb[127].mxu1  ;;  %v4203_v16 = vadd.f32 %v4202_v38, %v7564_v47  ;;  %v4204_v29 = vpop.f32.mrb[135].mxu0 }
 0x40d   : > { %v4452_v57 = vpop.f32.mrb[128].mxu1  ;;  %v4207_v63 = vpop.f32.mrb[136].mxu0 }
 0x40e   : > { %v4579_v11 = vadd.f32 %v4452_v57, %v4192_v4  ;;  %v4454_v27 = vpop.f32.mrb[129].mxu1  ;;  %v4208_v24 = vadd.f32 %v4207_v63, %v7570_v42  ;;  %v4209_v23 = vpop.f32.mrb[137].mxu0  ;;  %v5531_v42 = vld [vmem:[%s5764_s21 + $0x8] sm:$0xff] }
 0x40f   : > { %v4455_v44 = vpop.f32.mrb[130].mxu1  ;;  %v4210_v47 = vpop.f32.mrb[138].mxu0 }
 0x410   : > { %v4618_v17 = vadd.f32 %v7647_v30, %v4579_v11  ;;  %v4580_v60 = vadd.f32 %v4455_v44, %v4195_v7  ;;  %v4457_v10 = vpop.f32.mrb[131].mxu1  ;;  %v4211_v41 = vadd.f32 %v4210_v47, %v7574_v19  ;;  %v4212_v12 = vpop.f32.mrb[139].mxu0 }
 0x411   : > { %v5534_v12 = vld [vmem:[%s5764_s21 + $0x20] sm:$0xff] }
 0x412   : > { %v4650_v59 = vadd.f32 %v5530_v40, %v4618_v17  ;;  %v4619_v22 = vadd.f32 %v7647_v30, %v4580_v60 }
 0x414   : > { %4682 = vst.msk [vmem:[%s7656_s19] sm:$0xff] %vm1609_vm11, %v4650_v59  ;;  %v4651_v32 = vadd.f32 %v5531_v42, %v4619_v22 }
 0x415   : > { %v4460_v37 = vpop.f32.mrb[132].mxu1  ;;  %v4215_v14 = vpop.f32.mrb[140].mxu0 }
 0x416   : > { %4683 = vst.msk [vmem:[%s7656_s19 + $0x8] sm:$0xff] %vm1609_vm11, %v4651_v32  ;;  %v4581_v19 = vadd.f32 %v4460_v37, %v4200_v51  ;;  %v4462_v34 = vpop.f32.mrb[133].mxu1  ;;  %v4216_v28 = vadd.f32 %v4215_v14, %v7582_v20  ;;  %v4217_v4 = vpop.f32.mrb[141].mxu0  ;;  %v5533_v51 = vld [vmem:[%s5764_s21 + $0x18] sm:$0xff] }
 0x417   : > { %v4463_v36 = vpop.f32.mrb[134].mxu1  ;;  %v4218_v26 = vpop.f32.mrb[142].mxu0 }
 0x418   : > { %v4620_v46 = vadd.f32 %v7647_v30, %v4581_v19  ;;  %v4582_v7 = vadd.f32 %v4463_v36, %v4203_v16  ;;  %v4465_v25 = vpop.f32.mrb[135].mxu1  ;;  %v4219_v2 = vadd.f32 %v4218_v26, %v7584_v21  ;;  %v4220_v3 = vpop.f32.mrb[143].mxu0 }
 0x41a   : > { %v4652_v38 = vadd.f32 %v5532_v39, %v4620_v46  ;;  %v4621_v48 = vadd.f32 %v7647_v30, %v4582_v7  ;;  %v5536_v7 = vld [vmem:[%s5764_s21 + $0x30] sm:$0xff] }
 0x41c   : > { %4684 = vst.msk [vmem:[%s7656_s19 + $0x10] sm:$0xff] %vm1609_vm11, %v4652_v38  ;;  %v4653_v20 = vadd.f32 %v5533_v51, %v4621_v48 }
 0x41d   : > { %v4468_v29 = vpop.f32.mrb[136].mxu1  ;;  %v4223_v57 = vpop.f32.mrb[144].mxu0 }
 0x41e   : > { %4685 = vst.msk [vmem:[%s7656_s19 + $0x18] sm:$0xff] %vm1609_vm11, %v4653_v20  ;;  %v4583_v16 = vadd.f32 %v4468_v29, %v4208_v24  ;;  %v4470_v63 = vpop.f32.mrb[137].mxu1  ;;  %v4224_v21 = vadd.f32 %v4223_v57, %v7589_v45  ;;  %v4225_v11 = vpop.f32.mrb[145].mxu0  ;;  %v5535_v24 = vld [vmem:[%s5764_s21 + $0x28] sm:$0xff] }
 0x41f   : > { %v4471_v27 = vpop.f32.mrb[138].mxu1  ;;  %v4226_v23 = vpop.f32.mrb[146].mxu0 }
 0x420   : > { %v4622_v44 = vadd.f32 %v7647_v30, %v4583_v16  ;;  %v4584_v47 = vadd.f32 %v4471_v27, %v4211_v41  ;;  %v4473_v17 = vpop.f32.mrb[139].mxu1  ;;  %v4227_v60 = vadd.f32 %v4226_v23, %v7591_v49  ;;  %v4228_v10 = vpop.f32.mrb[147].mxu0  ;;  %v5538_v23 = vld [vmem:[%s5764_s21 + $0x40] sm:$0xff] }
 0x422   : > { %v4654_v40 = vadd.f32 %v5534_v12, %v4622_v44  ;;  %v4623_v59 = vadd.f32 %v7647_v30, %v4584_v47 }
 0x424   : > { %4686 = vst.msk [vmem:[%s7656_s19 + $0x20] sm:$0xff] %vm1609_vm11, %v4654_v40  ;;  %v4655_v45 = vadd.f32 %v5535_v24, %v4623_v59 }
 0x425   : > { %v4476_v22 = vpop.f32.mrb[140].mxu1  ;;  %v4231_v42 = vpop.f32.mrb[148].mxu0 }
 0x426   : > { %4687 = vst.msk [vmem:[%s7656_s19 + $0x28] sm:$0xff] %vm1609_vm11, %v4655_v45  ;;  %v4585_v41 = vadd.f32 %v4476_v22, %v4216_v28  ;;  %v4478_v32 = vpop.f32.mrb[141].mxu1  ;;  %v4232_v49 = vadd.f32 %v4231_v42, %v7595_v15  ;;  %v4233_v37 = vpop.f32.mrb[149].mxu0  ;;  %v5537_v28 = vld [vmem:[%s5764_s21 + $0x38] sm:$0xff] }
 0x427   : > { %v4479_v14 = vpop.f32.mrb[142].mxu1  ;;  %v4234_v19 = vpop.f32.mrb[150].mxu0  ;;  %v5540_v37 = vld [vmem:[%s5764_s21 + $0x50] sm:$0xff] }
 0x428   : > { %v4624_v34 = vadd.f32 %v7647_v30, %v4585_v41  ;;  %v4586_v4 = vadd.f32 %v4479_v14, %v4219_v2  ;;  %v4481_v36 = vpop.f32.mrb[143].mxu1  ;;  %v4235_v26 = vadd.f32 %v4234_v19, %v7597_v8  ;;  %v4236_v46 = vpop.f32.mrb[151].mxu0 }
 0x42a   : > { %v4656_v25 = vadd.f32 %v5536_v7, %v4624_v34  ;;  %v4625_v3 = vadd.f32 %v7647_v30, %v4586_v4 }
 0x42c   : > { %4688 = vst.msk [vmem:[%s7656_s19 + $0x30] sm:$0xff] %vm1609_vm11, %v4656_v25  ;;  %v4657_v15 = vadd.f32 %v5537_v28, %v4625_v3 }
 0x42d   : > { %v4484_v39 = vpop.f32.mrb[144].mxu1  ;;  %v4239_v38 = vpop.f32.mrb[152].mxu0 }
 0x42e   : > { %4689 = vst.msk [vmem:[%s7656_s19 + $0x38] sm:$0xff] %vm1609_vm11, %v4657_v15  ;;  %v4587_v2 = vadd.f32 %v4484_v39, %v4224_v21  ;;  %v4486_v48 = vpop.f32.mrb[145].mxu1  ;;  %v4240_v8 = vadd.f32 %v4239_v38, %v7599_v0  ;;  %v4241_v51 = vpop.f32.mrb[153].mxu0  ;;  %v5539_v21 = vld [vmem:[%s5764_s21 + $0x48] sm:$0xff] }
 0x42f   : > { %v4487_v20 = vpop.f32.mrb[146].mxu1  ;;  %v4242_v29 = vpop.f32.mrb[154].mxu0 }
 0x430   : > { %v4626_v57 = vadd.f32 %v7647_v30, %v4587_v2  ;;  %v4588_v16 = vadd.f32 %v4487_v20, %v4227_v60  ;;  %v4489_v63 = vpop.f32.mrb[147].mxu1  ;;  %v4243_v11 = vadd.f32 %v4242_v29, %v7601_v1  ;;  %v4244_v27 = vpop.f32.mrb[155].mxu0  ;;  %v5542_v2 = vld [vmem:[%s5764_s21 + $0x60] sm:$0xff] }
 0x432   : > { %v4658_v44 = vadd.f32 %v5538_v23, %v4626_v57  ;;  %v4627_v47 = vadd.f32 %v7647_v30, %v4588_v16 }
 0x434   : > { %4690 = vst.msk [vmem:[%s7656_s19 + $0x40] sm:$0xff] %vm1609_vm11, %v4658_v44  ;;  %v4659_v0 = vadd.f32 %v5539_v21, %v4627_v47 }
 0x435   : > { %v4492_v17 = vpop.f32.mrb[148].mxu1  ;;  %v4247_v10 = vpop.f32.mrb[156].mxu0 }
 0x436   : > { %4691 = vst.msk [vmem:[%s7656_s19 + $0x48] sm:$0xff] %vm1609_vm11, %v4659_v0  ;;  %v4589_v60 = vadd.f32 %v4492_v17, %v4232_v49  ;;  %v4494_v12 = vpop.f32.mrb[149].mxu1  ;;  %v4248_v1 = vadd.f32 %v4247_v10, %v7603_v31  ;;  %v4249_v40 = vpop.f32.mrb[157].mxu0  ;;  %v5541_v49 = vld [vmem:[%s5764_s21 + $0x58] sm:$0xff]  ;;  %v5544_v17 = vld [vmem:[%s5764_s21 + $0x70] sm:$0xff] }
 0x437   : > { %v4495_v59 = vpop.f32.mrb[150].mxu1  ;;  %v4250_v24 = vpop.f32.mrb[158].mxu0  ;;  %v5545_v12 = vld [vmem:[%s5764_s21 + $0x78] sm:$0xff] }
 0x438   : > { %v4628_v45 = vadd.f32 %v7647_v30, %v4589_v60  ;;  %v4590_v22 = vadd.f32 %v4495_v59, %v4235_v26  ;;  %v4497_v42 = vpop.f32.mrb[151].mxu1  ;;  %v4251_v41 = vadd.f32 %v4250_v24, %v7605_v62  ;;  %v4252_v32 = vpop.f32.mrb[159].mxu0 }
 0x43a   : > { %v4660_v14 = vadd.f32 %v5540_v37, %v4628_v45  ;;  %v4629_v19 = vadd.f32 %v7647_v30, %v4590_v22 }
 0x43c   : > { %4692 = vst.msk [vmem:[%s7656_s19 + $0x50] sm:$0xff] %vm1609_vm11, %v4660_v14  ;;  %v4661_v31 = vadd.f32 %v5541_v49, %v4629_v19  ;;  %v5546_v49 = vld [vmem:[%s5764_s21 + $0x80] sm:$0xff] }
 0x43d   : > { %v4500_v34 = vpop.f32.mrb[152].mxu1  ;;  %v4255_v4 = vpop.f32.mrb[160].mxu0 }
 0x43e   : > { %4693 = vst.msk [vmem:[%s7656_s19 + $0x58] sm:$0xff] %vm1609_vm11, %v4661_v31  ;;  %v4591_v36 = vadd.f32 %v4500_v34, %v4240_v8  ;;  %v4502_v26 = vpop.f32.mrb[153].mxu1  ;;  %v4256_v62 = vadd.f32 %v4255_v4, %v7607_v55  ;;  %v4257_v46 = vpop.f32.mrb[161].mxu0  ;;  %v5543_v8 = vld [vmem:[%s5764_s21 + $0x68] sm:$0xff] }
 0x43f   : > { %v4503_v7 = vpop.f32.mrb[154].mxu1  ;;  %v4258_v25 = vpop.f32.mrb[162].mxu0  ;;  %v5547_v4 = vld [vmem:[%s5764_s21 + $0x88] sm:$0xff] }
 0x440   : > { %v4630_v3 = vadd.f32 %v7647_v30, %v4591_v36  ;;  %v4592_v28 = vadd.f32 %v4503_v7, %v4243_v11  ;;  %v4505_v15 = vpop.f32.mrb[155].mxu1  ;;  %v4259_v39 = vadd.f32 %v4258_v25, %v7609_v61  ;;  %v4260_v38 = vpop.f32.mrb[163].mxu0 }
 0x442   : > { %v4662_v48 = vadd.f32 %v5542_v2, %v4630_v3  ;;  %v4631_v51 = vadd.f32 %v7647_v30, %v4592_v28 }
 0x444   : > { %4694 = vst.msk [vmem:[%s7656_s19 + $0x60] sm:$0xff] %vm1609_vm11, %v4662_v48  ;;  %v4663_v55 = vadd.f32 %v5543_v8, %v4631_v51  ;;  %v5548_v48 = vld [vmem:[%s5764_s21 + $0x90] sm:$0xff] }
 0x445   : > { %v4508_v20 = vpop.f32.mrb[156].mxu1  ;;  %v4263_v29 = vpop.f32.mrb[164].mxu0 }
 0x446   : > { %4695 = vst.msk [vmem:[%s7656_s19 + $0x68] sm:$0xff] %vm1609_vm11, %v4663_v55  ;;  %v4593_v57 = vadd.f32 %v4508_v20, %v4248_v1  ;;  %v4510_v16 = vpop.f32.mrb[157].mxu1  ;;  %v4264_v61 = vadd.f32 %v4263_v29, %v7611_v53  ;;  %v4265_v63 = vpop.f32.mrb[165].mxu0  ;;  %v5549_v55 = vld [vmem:[%s5764_s21 + $0x98] sm:$0xff] }
 0x447   : > { %v4511_v11 = vpop.f32.mrb[158].mxu1  ;;  %v4266_v27 = vpop.f32.mrb[166].mxu0 }
 0x448   : > { %v4632_v23 = vadd.f32 %v7647_v30, %v4593_v57  ;;  %v4594_v44 = vadd.f32 %v4511_v11, %v4251_v41  ;;  %v4513_v47 = vpop.f32.mrb[159].mxu1  ;;  %v4267_v21 = vadd.f32 %v4266_v27, %v7613_v13  ;;  %v4268_v0 = vpop.f32.mrb[167].mxu0 }
 0x449   : > { %v5550_v0 = vld [vmem:[%s5764_s21 + $0xa0] sm:$0xff] }
 0x44a   : > { %v4664_v10 = vadd.f32 %v5544_v17, %v4632_v23  ;;  %v4633_v60 = vadd.f32 %v7647_v30, %v4594_v44 }
 0x44c   : > { %4696 = vst.msk [vmem:[%s7656_s19 + $0x70] sm:$0xff] %vm1609_vm11, %v4664_v10  ;;  %v4665_v53 = vadd.f32 %v5545_v12, %v4633_v60  ;;  %v5551_v60 = vld [vmem:[%s5764_s21 + $0xa8] sm:$0xff] }
 0x44d   : > { %v4516_v1 = vpop.f32.mrb[160].mxu1  ;;  %v4271_v40 = vpop.f32.mrb[168].mxu0 }
 0x44e   : > { %4697 = vst.msk [vmem:[%s7656_s19 + $0x78] sm:$0xff] %vm1609_vm11, %v4665_v53  ;;  %v4595_v59 = vadd.f32 %v4516_v1, %v4256_v62  ;;  %v4518_v24 = vpop.f32.mrb[161].mxu1  ;;  %v4272_v13 = vadd.f32 %v4271_v40, %v7615_v33  ;;  %v4273_v45 = vpop.f32.mrb[169].mxu0 }
 0x44f   : > { %v4519_v22 = vpop.f32.mrb[162].mxu1  ;;  %v4274_v42 = vpop.f32.mrb[170].mxu0 }
 0x450   : > { %v4634_v41 = vadd.f32 %v7647_v30, %v4595_v59  ;;  %v4596_v32 = vadd.f32 %v4519_v22, %v4259_v39  ;;  %v4521_v37 = vpop.f32.mrb[163].mxu1  ;;  %v4275_v14 = vadd.f32 %v4274_v42, %v7617_v9  ;;  %v4276_v19 = vpop.f32.mrb[171].mxu0 }
 0x451   : > { %v5552_v37 = vld [vmem:[%s5764_s21 + $0xb0] sm:$0xff] }
 0x452   : > { %v4666_v31 = vadd.f32 %v5546_v49, %v4634_v41  ;;  %v4635_v34 = vadd.f32 %v7647_v30, %v4596_v32  ;;  %v5553_v49 = vld [vmem:[%s5764_s21 + $0xb8] sm:$0xff] }
 0x454   : > { %4698 = vst.msk [vmem:[%s7656_s19 + $0x80] sm:$0xff] %vm1609_vm11, %v4666_v31  ;;  %v4667_v33 = vadd.f32 %v5547_v4, %v4635_v34 }
 0x455   : > { %v4524_v36 = vpop.f32.mrb[164].mxu1  ;;  %v4279_v26 = vpop.f32.mrb[172].mxu0 }
 0x456   : > { %4699 = vst.msk [vmem:[%s7656_s19 + $0x88] sm:$0xff] %vm1609_vm11, %v4667_v33  ;;  %v4597_v62 = vadd.f32 %v4524_v36, %v4264_v61  ;;  %v4526_v46 = vpop.f32.mrb[165].mxu1  ;;  %v4280_v9 = vadd.f32 %v4279_v26, %v7619_v56  ;;  %v4281_v7 = vpop.f32.mrb[173].mxu0 }
 0x457   : > { %v4527_v25 = vpop.f32.mrb[166].mxu1  ;;  %v4282_v3 = vpop.f32.mrb[174].mxu0 }
 0x458   : > { %v4636_v28 = vadd.f32 %v7647_v30, %v4597_v62  ;;  %v4598_v15 = vadd.f32 %v4527_v25, %v4267_v21  ;;  %v4529_v39 = vpop.f32.mrb[167].mxu1  ;;  %v4283_v38 = vadd.f32 %v4282_v3, %v7621_v5  ;;  %v4284_v2 = vpop.f32.mrb[175].mxu0 }
 0x45a   : > { %v4668_v51 = vadd.f32 %v5548_v48, %v4636_v28  ;;  %v4637_v8 = vadd.f32 %v7647_v30, %v4598_v15  ;;  %v5554_v28 = vld [vmem:[%s5764_s21 + $0xc0] sm:$0xff] }
 0x45c   : > { %4700 = vst.msk [vmem:[%s7656_s19 + $0x90] sm:$0xff] %vm1609_vm11, %v4668_v51  ;;  %v4669_v56 = vadd.f32 %v5549_v55, %v4637_v8 }
 0x45d   : > { %v4532_v20 = vpop.f32.mrb[168].mxu1  ;;  %v4287_v29 = vpop.f32.mrb[176].mxu0 }
 0x45e   : > { %4701 = vst.msk [vmem:[%s7656_s19 + $0x98] sm:$0xff] %vm1609_vm11, %v4669_v56  ;;  %v4599_v57 = vadd.f32 %v4532_v20, %v4272_v13  ;;  %v4534_v16 = vpop.f32.mrb[169].mxu1  ;;  %v4288_v5 = vadd.f32 %v4287_v29, %v7623_v52  ;;  %v4289_v61 = vpop.f32.mrb[177].mxu0 }
 0x45f   : > { %v4535_v63 = vpop.f32.mrb[170].mxu1  ;;  %v4290_v11 = vpop.f32.mrb[178].mxu0 }
 0x460   : > { %v4638_v27 = vadd.f32 %v7647_v30, %v4599_v57  ;;  %v4600_v23 = vadd.f32 %v4535_v63, %v4275_v14  ;;  %v4537_v44 = vpop.f32.mrb[171].mxu1  ;;  %v4291_v47 = vadd.f32 %v4290_v11, %v7625_v6  ;;  %v4292_v21 = vpop.f32.mrb[179].mxu0  ;;  %v5556_v63 = vld [vmem:[%s5764_s21 + $0xd0] sm:$0xff] }
 0x462   : > { %v4670_v17 = vadd.f32 %v5550_v0, %v4638_v27  ;;  %v4639_v10 = vadd.f32 %v7647_v30, %v4600_v23 }
 0x464   : > { %4702 = vst.msk [vmem:[%s7656_s19 + $0xa0] sm:$0xff] %vm1609_vm11, %v4670_v17  ;;  %v4671_v52 = vadd.f32 %v5551_v60, %v4639_v10  ;;  %v5558_v60 = vld [vmem:[%s5764_s21 + $0xe0] sm:$0xff] }
 0x465   : > { %v4540_v12 = vpop.f32.mrb[172].mxu1  ;;  %v4295_v53 = vpop.f32.mrb[180].mxu0 }
 0x466   : > { %4703 = vst.msk [vmem:[%s7656_s19 + $0xa8] sm:$0xff] %vm1609_vm11, %v4671_v52  ;;  %v4601_v1 = vadd.f32 %v4540_v12, %v4280_v9  ;;  %v4542_v40 = vpop.f32.mrb[173].mxu1  ;;  %v4296_v6 = vadd.f32 %v4295_v53, %v7627_v54  ;;  %v4297_v59 = vpop.f32.mrb[181].mxu0  ;;  %v5559_v53 = vld [vmem:[%s5764_s21 + $0xe8] sm:$0xff] }
 0x467   : > { %v4543_v24 = vpop.f32.mrb[174].mxu1  ;;  %v4298_v13 = vpop.f32.mrb[182].mxu0 }
 0x468   : > { %v4640_v45 = vadd.f32 %v7647_v30, %v4601_v1  ;;  %v4602_v22 = vadd.f32 %v4543_v24, %v4283_v38  ;;  %v4545_v42 = vpop.f32.mrb[175].mxu1  ;;  %v4299_v41 = vadd.f32 %v4298_v13, %v7629_v18  ;;  %v4300_v32 = vpop.f32.mrb[183].mxu0  ;;  %v5555_v38 = vld [vmem:[%s5764_s21 + $0xc8] sm:$0xff] }
 0x469   : > { %v5560_v42 = vld [vmem:[%s5764_s21 + $0xf0] sm:$0xff] }
 0x46a   : > { %v4672_v14 = vadd.f32 %v5552_v37, %v4640_v45  ;;  %v4641_v19 = vadd.f32 %v7647_v30, %v4602_v22  ;;  %v5561_v37 = vld [vmem:[%s5764_s21 + $0xf8] sm:$0xff] }
 0x46c   : > { %4704 = vst.msk [vmem:[%s7656_s19 + $0xb0] sm:$0xff] %vm1609_vm11, %v4672_v14  ;;  %v4673_v54 = vadd.f32 %v5553_v49, %v4641_v19 }
 0x46d   : > { %v4548_v31 = vpop.f32.mrb[176].mxu1  ;;  %v4303_v34 = vpop.f32.mrb[184].mxu0 }
 0x46e   : > { %4705 = vst.msk [vmem:[%s7656_s19 + $0xb8] sm:$0xff] %vm1609_vm11, %v4673_v54  ;;  %v4603_v4 = vadd.f32 %v4548_v31, %v4288_v5  ;;  %v4550_v33 = vpop.f32.mrb[177].mxu1  ;;  %v4304_v18 = vadd.f32 %v4303_v34, %v7631_v43  ;;  %v4305_v36 = vpop.f32.mrb[185].mxu0 }
 0x46f   : > { %v4551_v26 = vpop.f32.mrb[178].mxu1  ;;  %v4306_v62 = vpop.f32.mrb[186].mxu0 }
 0x470   : > { %v4642_v46 = vadd.f32 %v7647_v30, %v4603_v4  ;;  %v4604_v9 = vadd.f32 %v4551_v26, %v4291_v47  ;;  %v4553_v7 = vpop.f32.mrb[179].mxu1  ;;  %v4307_v25 = vadd.f32 %v4306_v62, %v7634_v58  ;;  %v4308_v3 = vpop.f32.mrb[187].mxu0 }
 0x472   : > { %v4674_v15 = vadd.f32 %v5554_v28, %v4642_v46  ;;  %v4643_v39 = vadd.f32 %v7647_v30, %v4604_v9 }
 0x474   : > { %4706 = vst.msk [vmem:[%s7656_s19 + $0xc0] sm:$0xff] %vm1609_vm11, %v4674_v15  ;;  %v4675_v43 = vadd.f32 %v5555_v38, %v4643_v39 }
 0x475   : > { %v4556_v2 = vpop.f32.mrb[180].mxu1  ;;  %v4311_v48 = vpop.f32.mrb[188].mxu0 }
 0x476   : > { %4707 = vst.msk [vmem:[%s7656_s19 + $0xc8] sm:$0xff] %vm1609_vm11, %v4675_v43  ;;  %v4605_v51 = vadd.f32 %v4556_v2, %v4296_v6  ;;  %v4558_v8 = vpop.f32.mrb[181].mxu1  ;;  %v4312_v58 = vadd.f32 %v4311_v48, %v7637_v50  ;;  %v4313_v55 = vpop.f32.mrb[189].mxu0  ;;  %v5557_v50 = vld [vmem:[%s5764_s21 + $0xd8] sm:$0xff] }
 0x477   : > { %v4559_v56 = vpop.f32.mrb[182].mxu1  ;;  %v4314_v20 = vpop.f32.mrb[190].mxu0 }
 0x478   : > { %v4644_v29 = vadd.f32 %v7647_v30, %v4605_v51  ;;  %v4606_v57 = vadd.f32 %v4559_v56, %v4299_v41  ;;  %v4561_v16 = vpop.f32.mrb[183].mxu1  ;;  %v4315_v5 = vadd.f32 %v4314_v20, %v7640_v35  ;;  %v4316_v61 = vpop.f32.mrb[191].mxu0 }
 0x47a   : > { %v4676_v11 = vadd.f32 %v5556_v63, %v4644_v29  ;;  %v4645_v27 = vadd.f32 %v7647_v30, %v4606_v57 }
 0x47c   : > { %4708 = vst.msk [vmem:[%s7656_s19 + $0xd0] sm:$0xff] %vm1609_vm11, %v4676_v11  ;;  %v4677_v23 = vadd.f32 %v5557_v50, %v4645_v27 }
 0x47d   : > { %v4564_v44 = vpop.f32.mrb[184].mxu1 }
 0x47e   : > { %4709 = vst.msk [vmem:[%s7656_s19 + $0xd8] sm:$0xff] %vm1609_vm11, %v4677_v23  ;;  %v4607_v47 = vadd.f32 %v4564_v44, %v4304_v18  ;;  %v4566_v21 = vpop.f32.mrb[185].mxu1 }
 0x47f   : > { %v4567_v0 = vpop.f32.mrb[186].mxu1 }
 0x480   : > { %v4646_v35 = vadd.f32 %v7647_v30, %v4607_v47  ;;  %v4608_v17 = vadd.f32 %v4567_v0, %v4307_v25  ;;  %v4569_v10 = vpop.f32.mrb[187].mxu1 }
 0x482   : > { %v4678_v52 = vadd.f32 %v5558_v60, %v4646_v35  ;;  %v4647_v12 = vadd.f32 %v7647_v30, %v4608_v17 }
 0x484   : > { %4710 = vst.msk [vmem:[%s7656_s19 + $0xe0] sm:$0xff] %vm1609_vm11, %v4678_v52  ;;  %v4679_v1 = vadd.f32 %v5559_v53, %v4647_v12 }
 0x485   : > { %v4572_v40 = vpop.f32.mrb[188].mxu1 }
 0x486   : > { %4711 = vst.msk [vmem:[%s7656_s19 + $0xe8] sm:$0xff] %vm1609_vm11, %v4679_v1  ;;  %v4609_v6 = vadd.f32 %v4572_v40, %v4312_v58  ;;  %v4574_v59 = vpop.f32.mrb[189].mxu1 }
 0x487   : > { %v4575_v24 = vpop.f32.mrb[190].mxu1 }
 0x488   : > { %v4648_v13 = vadd.f32 %v7647_v30, %v4609_v6  ;;  %v4610_v45 = vadd.f32 %v4575_v24, %v4315_v5  ;;  %v4577_v22 = vpop.f32.mrb[191].mxu1 }
 0x48a   : > { %v4680_v41 = vadd.f32 %v5560_v42, %v4648_v13  ;;  %v4649_v32 = vadd.f32 %v7647_v30, %v4610_v45 }
 0x48c   : > { %4712 = vst.msk [vmem:[%s7656_s19 + $0xf0] sm:$0xff] %vm1609_vm11, %v4680_v41  ;;  %v4681_v14 = vadd.f32 %v5561_v37, %v4649_v32 }
 0x48e   : > { %4713 = vst.msk [vmem:[%s7656_s19 + $0xf8] sm:$0xff] %vm1609_vm11, %v4681_v14 }
 0x48f   : > { %5575 = shalt.err (!%p5572_p3)
}
 0x490   : > { %s5576_s21 = scalar_lea.hbm %s7809_s9, 4096  ;;  %s5580_s22 = scalar_lea.hbm %s7868_s7, 8192 }
 0x491   : > { %p5577_p4 = scmp.ne.s32.totalorder %s7809_s9, %s5576_s21  ;;  %p5581_p9 = scmp.lt.u32.totalorder %s7809_s9, %s7868_s7 }
 0x492   : > { %p5582_p10 = scmp.lt.u32.totalorder %s5580_s22, %s5576_s21  ;;  %p5584_p12 = scmp.lt.u32.totalorder %s5576_s21, %s7809_s9 }
 0x493   : > { %p5578_p7 = pnand %p5577_p4, %p5709_p5 }
 0x494   : > { %p5583_p11 = por %p5582_p10, %p5581_p9 }
 0x495   : > { %p5579_p8 = pneg %p5578_p7 }
 0x496   : > { %p5585_p13 = por %p5584_p12, %p5583_p11 }
 0x498   : > { %p5586_p0 = pnand %p5585_p13, %p5579_p8 }
 0x49a   : > { %5589 = shalt.err (!%p5586_p0)
}
 0x49b   : > { %s5629_s29 = smov 128   ;;  %s5630_s8 = smov 8  }
 0x49c   : > { %5308 = dma.vmem_to_hbm [thread:$0]  (%p5709_p5), %s7811_s23, 4096, %s7809_s9, %s7820_s28, %s5629_s29, %s5629_s29, %s5630_s8  }
 0x49d PF: > { %p5314_p1 = scmp.ge.s32.totalorder %s5624_s27, 2  ;;  %s4743_s13 = sand.u32 1, %s5612_s24  }
 0x49e   : > { %s4744_s14 = scalar_lea.sflag [#allocation4], %s4743_s13 }
 0x49f   : > { %p5311_p2 = pnand %p5314_p1, %p5713_p6 }
 0x4a1   : > { %5607 = dma.done.wait (!%p5311_p2), %s4744_s14, 4096  }
 0x4a2   : > { %5609 = vsyncadd (!%p5311_p2), %s4744_s14, 4294963200  ;;  %p17_p3 = scmp.ge.s32.totalorder %s5696_s30, 4   ;;  %s7881_s24 = smov %s5616_s25 }
 0x4a3   : > { %s7882_s25 = smov %s5620_s26  ;;  %s7883_s26 = smov %s5707_s10 }
 0x4a4   : > { %s7884_s27 = smov %s5696_s30  ;;  %19 = sbr.rel (!%p17_p3) target bundleno = 3 (0x3), region = 89 }
 0x4ab   :  { %4749 = vsyncpa [#allocation4], 1 }
 0x4ac   :  { %4751 = vsyncpa [#allocation4 + $0x1], 1 }

</bundles_post_ra>
